<compile_context>
chip_gen: v6e
topology: v6e:2x2x1
jax: 0.10.0
libtpu: 0.0.40
codegen_flags: <defaults>
</compile_context>

<pallas_src>
import functools

import jax
import jax.numpy as jnp
from jax.experimental import pallas as pl
from jax.experimental.pallas import tpu as pltpu


def _timelstm_kernel(xp_ref, ts_ref, wall_ref, wd_ref, wdb_ref, out_ref,
                     h_sc, c_sc, *, hidden_size, t_chunk):
    """Processes one (batch_tile, time_chunk) block of the recurrence.

    xp_ref : (T_CHUNK, b_tile, 4H)  hoisted U_all(x) + wall_b + uall_b
    ts_ref : (T_CHUNK, b_tile, 1)   timestamps for this chunk
    wall_ref: (H, 4H)               recurrent gate weight (applied to h)
    wd_ref : (H, H)                 time-decay weight (applied to c)
    wdb_ref: (1, H)                 time-decay bias
    out_ref: (b_tile, T_CHUNK, H)   hidden states, written batch-major
    h_sc, c_sc: (b_tile, H)         recurrent state carried across chunks (f32)
    """
    H = hidden_size
    bt = h_sc.shape[0]
    chunk = pl.program_id(1)

    @pl.when(chunk == 0)
    def _():
        # Fresh (h, c) at the start of each batch tile's sweep over time.
        h_sc[...] = jnp.zeros_like(h_sc)
        c_sc[...] = jnp.zeros_like(c_sc)

    w_all = wall_ref[...]                                   # (H, 4H)
    w_d = wd_ref[...]                                       # (H, H)
    # Hoist the bias broadcast out of the unrolled loop (no CSE inside).
    wd_b = jnp.broadcast_to(wdb_ref[...], (bt, H))

    # Register-carried recurrent state for the whole chunk: one load here,
    # one store after the loop (no per-timestep VMEM round trip).
    h = h_sc[...]
    c = c_sc[...]

    # TODO(synk): on v6e/v7x at small b_tile, stage W_all in the MXU once per
    # chunk via pltpu.matmul_push_rhs / matmul_acc_lhs to amortize the weight
    # push across t_chunk timesteps.
    for t in range(t_chunk):                                # static unroll
        # Time-decay path: c_s1 = tanh(W_d(c)), c_adj = (c - c_s1) + c_s1 * dt.
        c_s1 = jnp.tanh(
            jnp.dot(c, w_d, preferred_element_type=jnp.float32) + wd_b)
        dt = ts_ref[t]                                      # (bt, 1)
        c_adj = (c - c_s1) + c_s1 * dt

        # Gates: W_all(h) + [U_all(x_t) + wall_b + uall_b] (bracket hoisted).
        gates = jnp.dot(h, w_all, preferred_element_type=jnp.float32) + xp_ref[t]
        f = jax.nn.sigmoid(gates[:, 0 * H:1 * H])
        i = jax.nn.sigmoid(gates[:, 1 * H:2 * H])
        o = jax.nn.sigmoid(gates[:, 2 * H:3 * H])
        c_tmp = jax.nn.sigmoid(gates[:, 3 * H:4 * H])       # sigmoid: RETAIN quirk

        c = f * c_adj + i * c_tmp
        h = o * jnp.tanh(c)

        # Batch-major write (masked sublane store; off the latency-critical
        # recurrence path, see review -- lower priority than state/MXU items).
        out_ref[:, t, :] = h.astype(out_ref.dtype)

    h_sc[...] = h
    c_sc[...] = c


def _pick_b_tile(b):
    """Largest multiple-of-8 divisor of b (<=256), preferring >=2 tiles (v7x)."""
    divs = [d for d in range(8, min(b, 256) + 1, 8) if b % d == 0]
    if not divs:
        return b
    two_tile = [d for d in divs if b // d >= 2]
    return max(two_tile) if two_tile else max(divs)


def timelstm_forward(inputs, timestamps, params, *, reverse=False,
                     t_chunk=8, b_tile=None):
    """inputs: (b, seq, H) f32, timestamps: (b, seq) f32 -> (b, seq, H) f32."""
    b, seq, H = inputs.shape
    wall_w, wall_b, uall_w, uall_b, wd_w, wd_b = params

    # The reference forward applies W_all to h and U_all to x (swapped), which
    # only type-checks when input_size == hidden_size.
    assert wall_w.shape == (H, 4 * H) and uall_w.shape == (H, 4 * H), \
        "TimeLSTM forward requires input_size == hidden_size"
    assert wd_w.shape == (H, H)
    assert H % 128 == 0, "hidden_size must be a multiple of 128 (lane width)"
    assert t_chunk % 8 == 0, "t_chunk must be a multiple of 8 (sublane tiling)"

    if b_tile is None:
        b_tile = _pick_b_tile(b)
    assert b % b_tile == 0
    n_bt = b // b_tile

    # For long sequences, raise t_chunk to 16-32 to amortize per-grid-step
    # overhead (watch unrolled code size / vreg pressure).
    n_chunks = pl.cdiv(seq, t_chunk)
    seq_pad = n_chunks * t_chunk

    # --- Hoisted, fully parallel input projection (one big MXU matmul in XLA),
    #     emitted directly time-major so no extra transpose pass is needed.
    x_proj = jnp.einsum('bsh,hg->sbg', inputs, uall_w,
                        preferred_element_type=jnp.float32)   # (seq, b, 4H)
    x_proj = x_proj + (wall_b + uall_b)                       # fold both biases once
    ts_sb1 = jnp.transpose(timestamps, (1, 0))[:, :, None]    # (seq, b, 1)
    # TODO(synk): for long seq / large b*H, emit x_proj in bf16 (cast after the
    # f32 accumulation) and widen inside the kernel to halve the HBM stream.

    if seq_pad != seq:                                        # pad trailing steps
        pad = seq_pad - seq
        x_proj = jnp.pad(x_proj, ((0, pad), (0, 0), (0, 0)))
        ts_sb1 = jnp.pad(ts_sb1, ((0, pad), (0, 0), (0, 0)))

    wd_b2d = wd_b.reshape(1, H).astype(jnp.float32)

    kernel = functools.partial(_timelstm_kernel, hidden_size=H, t_chunk=t_chunk)

    out = pl.pallas_call(
        kernel,
        out_shape=jax.ShapeDtypeStruct((b, seq_pad, H), jnp.float32),
        grid_spec=pltpu.PrefetchScalarGridSpec(
            num_scalar_prefetch=0,
            grid=(n_bt, n_chunks),                            # (parallel, sequential)
            in_specs=[
                # x_proj slice for this (batch tile, time chunk)
                pl.BlockSpec((t_chunk, b_tile, 4 * H), lambda bt, i: (i, bt, 0)),
                # timestamps streamed per chunk (tiny, still pipelined)
                pl.BlockSpec((t_chunk, b_tile, 1), lambda bt, i: (i, bt, 0)),
                # constant weights / bias (block index never changes)
                # TODO(synk): at large H on v7x, single-buffer these
                # (pipeline_mode=pl.Buffered(1)) and/or store them in bf16 to
                # stay inside the 64 MiB VMEM budget.
                pl.BlockSpec((H, 4 * H), lambda bt, i: (0, 0)),
                pl.BlockSpec((H, H), lambda bt, i: (0, 0)),
                pl.BlockSpec((1, H), lambda bt, i: (0, 0)),
            ],
            # batch-major output written directly by the kernel
            out_specs=pl.BlockSpec((b_tile, t_chunk, H), lambda bt, i: (bt, i, 0)),
            scratch_shapes=[
                pltpu.VMEM((b_tile, H), jnp.float32),         # h carried across chunks
                pltpu.VMEM((b_tile, H), jnp.float32),         # c carried across chunks
            ],
        ),
        compiler_params=pltpu.CompilerParams(
            dimension_semantics=("parallel", "arbitrary")),   # batch ||, time serial
    )(x_proj, ts_sb1,
      wall_w.astype(jnp.float32), wd_w.astype(jnp.float32), wd_b2d)

    out = out[:, :seq, :]
    if reverse:
        # PyTorch code only reverses the list of outputs (iteration stays forward).
        out = out[:, ::-1, :]
    return out


def timelstm_reference(inputs, timestamps, params, reverse=False):
    """Pure-JAX reference mirroring the PyTorch loop exactly."""
    wall_w, wall_b, uall_w, uall_b, wd_w, wd_b = params
    b, seq, H = inputs.shape
    h = jnp.zeros((b, H), jnp.float32)
    c = jnp.zeros((b, H), jnp.float32)
    outs_list = []
    for s in range(seq):
        c_s1 = jnp.tanh(c @ wd_w + wd_b)
        c_s2 = c_s1 * timestamps[:, s:s + 1]
        c_adj = (c - c_s1) + c_s2
        outs = h @ wall_w + wall_b + inputs[:, s] @ uall_w + uall_b
        f = jax.nn.sigmoid(outs[:, 0 * H:1 * H])
        i = jax.nn.sigmoid(outs[:, 1 * H:2 * H])
        o = jax.nn.sigmoid(outs[:, 2 * H:3 * H])
        c_tmp = jax.nn.sigmoid(outs[:, 3 * H:4 * H])
        c = f * c_adj + i * c_tmp
        h = o * jnp.tanh(c)
        outs_list.append(h)
    out = jnp.stack(outs_list, axis=1)
    if reverse:
        out = out[:, ::-1, :]
    return out


def init_params(key, input_size, hidden_size):
    """Linear-style init (uniform +/- 1/sqrt(fan_in)), pre-transposed: y = x @ W + b."""
    k1, k2, k3, k4, k5, k6 = jax.random.split(key, 6)
    H = hidden_size
    bnd_w = 1.0 / jnp.sqrt(input_size)
    bnd_u = 1.0 / jnp.sqrt(H)
    wall_w = jax.random.uniform(k1, (input_size, 4 * H), jnp.float32, -bnd_w, bnd_w)
    wall_b = jax.random.uniform(k2, (1, 4 * H), jnp.float32, -bnd_w, bnd_w)
    uall_w = jax.random.uniform(k3, (H, 4 * H), jnp.float32, -bnd_u, bnd_u)
    uall_b = jax.random.uniform(k4, (1, 4 * H), jnp.float32, -bnd_u, bnd_u)
    wd_w = jax.random.uniform(k5, (H, H), jnp.float32, -bnd_u, bnd_u)
    wd_b = jax.random.uniform(k6, (1, H), jnp.float32, -bnd_u, bnd_u)
    return (wall_w, wall_b, uall_w, uall_b, wd_w, wd_b)


if __name__ == "__main__":
    # input_size == hidden_size is required by the module's own forward; H=128
    # is the smallest lane-friendly width. B=16 -> b_tile=8, n_bt=2 exercises
    # the parallel batch axis; SEQ=12 exercises the time-chunk padding path
    # (t_chunk=8 -> seq_pad=16, 2 chunks).
    B, SEQ, H = 16, 12, 128

    key = jax.random.PRNGKey(0)
    kx, kt, kp = jax.random.split(key, 3)
    inputs = jax.random.normal(kx, (B, SEQ, H), jnp.float32)
    timestamps = jax.random.uniform(kt, (B, SEQ), jnp.float32, 0.0, 1.0)
    params = init_params(kp, H, H)

    out = timelstm_forward(inputs, timestamps, params)
    out = jax.block_until_ready(out)
    ref = timelstm_reference(inputs, timestamps, params)

    # Tolerance accounts for possible MXU default-precision differences between
    # the Mosaic-lowered in-kernel dots and the XLA reference dots; a semantic
    # bug (wrong gate / activation / state handling) would be O(1e-1).
    assert out.shape == (B, SEQ, H)
    assert jnp.allclose(out, ref, atol=1e-3, rtol=1e-3), "mismatch vs reference"

    out_rev = jax.block_until_ready(
        timelstm_forward(inputs, timestamps, params, reverse=True))
    ref_rev = timelstm_reference(inputs, timestamps, params, reverse=True)
    assert jnp.allclose(out_rev, ref_rev, atol=1e-3, rtol=1e-3), "reverse mismatch"

    print("KERNEL_OK")
</pallas_src>

<mosaic_0001>
module attributes {stable_mosaic.version = 11 : i64} {
  func.func @_timelstm_kernel(%arg0: i32, %arg1: i32, %arg2: memref<8x8x512xf32, #tpu.memory_space<vmem>>, %arg3: memref<8x8x1xf32, #tpu.memory_space<vmem>>, %arg4: memref<128x512xf32, #tpu.memory_space<vmem>>, %arg5: memref<128x128xf32, #tpu.memory_space<vmem>>, %arg6: memref<1x128xf32, #tpu.memory_space<vmem>>, %arg7: memref<8x8x128xf32, #tpu.memory_space<vmem>>, %arg8: memref<8x128xf32, #tpu.memory_space<vmem>>, %arg9: memref<8x128xf32, #tpu.memory_space<vmem>>) attributes {dimension_semantics = [#tpu.dimension_semantics<parallel>, #tpu.dimension_semantics<arbitrary>], iteration_bounds = array<i64: 2, 2>, scalar_prefetch = 0 : i64, scratch_operands = 2 : i64, tpu.core_type = #tpu.core_type<tc>, window_params = [{transform_indices = @transform_0, window_bounds = array<i64: 8, 8, 512>}, {transform_indices = @transform_1, window_bounds = array<i64: 8, 8, 1>}, {pipeline_mode = #tpu.pipeline_mode<synchronous>, transform_indices = @transform_2, window_bounds = array<i64: 128, 512>}, {pipeline_mode = #tpu.pipeline_mode<synchronous>, transform_indices = @transform_3, window_bounds = array<i64: 128, 128>}, {pipeline_mode = #tpu.pipeline_mode<synchronous>, transform_indices = @transform_4, window_bounds = array<i64: 1, 128>}, {transform_indices = @transform_5, window_bounds = array<i64: 8, 8, 128>}]} {
    %c0_i32 = arith.constant 0 : i32
    %0 = arith.cmpi eq, %arg1, %c0_i32 : i32
    %1 = arith.extui %0 : i1 to i32
    %c0_i32_0 = arith.constant 0 : i32
    %2 = arith.cmpi ne, %1, %c0_i32_0 : i32
    scf.if %2 {
      %cst_126 = arith.constant 0.000000e+00 : f32
      %372 = vector.broadcast %cst_126 : f32 to vector<8x128xf32>
      %c0_127 = arith.constant 0 : index
      %c0_128 = arith.constant 0 : index
      %373 = vector.load %arg8[%c0_127, %c0_128] : memref<8x128xf32, #tpu.memory_space<vmem>>, vector<8x128xf32>
      tpu.vector_store %arg8[%c0_127, %c0_128], %372 {strides = array<i32>} : memref<8x128xf32, #tpu.memory_space<vmem>>, vector<8x128xf32>,
      %cst_129 = arith.constant 0.000000e+00 : f32
      %374 = vector.broadcast %cst_129 : f32 to vector<8x128xf32>
      %c0_130 = arith.constant 0 : index
      %c0_131 = arith.constant 0 : index
      %375 = vector.load %arg9[%c0_130, %c0_131] : memref<8x128xf32, #tpu.memory_space<vmem>>, vector<8x128xf32>
      tpu.vector_store %arg9[%c0_130, %c0_131], %374 {strides = array<i32>} : memref<8x128xf32, #tpu.memory_space<vmem>>, vector<8x128xf32>,
    } else {
    }
    %c0 = arith.constant 0 : index
    %c0_1 = arith.constant 0 : index
    %3 = vector.load %arg4[%c0, %c0_1] : memref<128x512xf32, #tpu.memory_space<vmem>>, vector<128x512xf32>
    %c0_2 = arith.constant 0 : index
    %c0_3 = arith.constant 0 : index
    %4 = vector.load %arg5[%c0_2, %c0_3] : memref<128x128xf32, #tpu.memory_space<vmem>>, vector<128x128xf32>
    %c0_4 = arith.constant 0 : index
    %c0_5 = arith.constant 0 : index
    %5 = vector.load %arg6[%c0_4, %c0_5] : memref<1x128xf32, #tpu.memory_space<vmem>>, vector<1x128xf32>
    %6 = vector.shape_cast %5 : vector<1x128xf32> to vector<1x128xf32>
    %7 = vector.broadcast %6 : vector<1x128xf32> to vector<8x128xf32>
    %c0_6 = arith.constant 0 : index
    %c0_7 = arith.constant 0 : index
    %8 = vector.load %arg8[%c0_6, %c0_7] : memref<8x128xf32, #tpu.memory_space<vmem>>, vector<8x128xf32>
    %c0_8 = arith.constant 0 : index
    %c0_9 = arith.constant 0 : index
    %9 = vector.load %arg9[%c0_8, %c0_9] : memref<8x128xf32, #tpu.memory_space<vmem>>, vector<8x128xf32>
    %cst = arith.constant dense<0.000000e+00> : vector<8x128xf32>
    %10 = tpu.matmul %9, %4, %cst {dimension_numbers = #tpu.dot_dimension_numbers<[1], [0], [0], [1], [0, 0, 1, 1], [], []>} : vector<8x128xf32>, vector<128x128xf32>, vector<8x128xf32> -> vector<8x128xf32>
    %11 = arith.addf %10, %7 : vector<8x128xf32>
    %12 = math.tanh %11 : vector<8x128xf32>
    %c0_10 = arith.constant 0 : index
    %c0_11 = arith.constant 0 : index
    %c0_12 = arith.constant 0 : index
    %13 = vector.load %arg3[%c0_10, %c0_11, %c0_12] : memref<8x8x1xf32, #tpu.memory_space<vmem>>, vector<1x8x1xf32>
    %14 = vector.shape_cast %13 : vector<1x8x1xf32> to vector<8x1xf32>
    %15 = arith.subf %9, %12 : vector<8x128xf32>
    %16 = vector.broadcast %14 : vector<8x1xf32> to vector<8x128xf32>
    %17 = arith.mulf %12, %16 : vector<8x128xf32>
    %18 = arith.addf %15, %17 : vector<8x128xf32>
    %cst_13 = arith.constant dense<0.000000e+00> : vector<8x512xf32>
    %19 = tpu.matmul %8, %3, %cst_13 {dimension_numbers = #tpu.dot_dimension_numbers<[1], [0], [0], [1], [0, 0, 1, 1], [], []>} : vector<8x128xf32>, vector<128x512xf32>, vector<8x512xf32> -> vector<8x512xf32>
    %c0_14 = arith.constant 0 : index
    %c0_15 = arith.constant 0 : index
    %c0_16 = arith.constant 0 : index
    %20 = vector.load %arg2[%c0_14, %c0_15, %c0_16] : memref<8x8x512xf32, #tpu.memory_space<vmem>>, vector<1x8x512xf32>
    %21 = vector.shape_cast %20 : vector<1x8x512xf32> to vector<8x512xf32>
    %22 = arith.addf %19, %21 : vector<8x512xf32>
    %23 = vector.extract_strided_slice %22 {offsets = [0, 0], sizes = [8, 128], strides = [1, 1]} : vector<8x512xf32> to vector<8x128xf32>
    %24 = arith.negf %23 : vector<8x128xf32>
    %25 = math.exp %24 : vector<8x128xf32>
    %cst_17 = arith.constant 1.000000e+00 : f32
    %26 = vector.broadcast %cst_17 : f32 to vector<8x128xf32>
    %27 = arith.addf %26, %25 : vector<8x128xf32>
    %28 = arith.divf %26, %27 : vector<8x128xf32>
    %29 = vector.extract_strided_slice %22 {offsets = [0, 128], sizes = [8, 128], strides = [1, 1]} : vector<8x512xf32> to vector<8x128xf32>
    %30 = arith.negf %29 : vector<8x128xf32>
    %31 = math.exp %30 : vector<8x128xf32>
    %cst_18 = arith.constant 1.000000e+00 : f32
    %32 = vector.broadcast %cst_18 : f32 to vector<8x128xf32>
    %33 = arith.addf %32, %31 : vector<8x128xf32>
    %34 = arith.divf %32, %33 : vector<8x128xf32>
    %35 = vector.extract_strided_slice %22 {offsets = [0, 256], sizes = [8, 128], strides = [1, 1]} : vector<8x512xf32> to vector<8x128xf32>
    %36 = arith.negf %35 : vector<8x128xf32>
    %37 = math.exp %36 : vector<8x128xf32>
    %cst_19 = arith.constant 1.000000e+00 : f32
    %38 = vector.broadcast %cst_19 : f32 to vector<8x128xf32>
    %39 = arith.addf %38, %37 : vector<8x128xf32>
    %40 = arith.divf %38, %39 : vector<8x128xf32>
    %41 = vector.extract_strided_slice %22 {offsets = [0, 384], sizes = [8, 128], strides = [1, 1]} : vector<8x512xf32> to vector<8x128xf32>
    %42 = arith.negf %41 : vector<8x128xf32>
    %43 = math.exp %42 : vector<8x128xf32>
    %cst_20 = arith.constant 1.000000e+00 : f32
    %44 = vector.broadcast %cst_20 : f32 to vector<8x128xf32>
    %45 = arith.addf %44, %43 : vector<8x128xf32>
    %46 = arith.divf %44, %45 : vector<8x128xf32>
    %47 = arith.mulf %28, %18 : vector<8x128xf32>
    %48 = arith.mulf %34, %46 : vector<8x128xf32>
    %49 = arith.addf %47, %48 : vector<8x128xf32>
    %50 = math.tanh %49 : vector<8x128xf32>
    %51 = arith.mulf %40, %50 : vector<8x128xf32>
    %c0_21 = arith.constant 0 : index
    %c0_22 = arith.constant 0 : index
    %c0_23 = arith.constant 0 : index
    %52 = vector.load %arg7[%c0_21, %c0_22, %c0_23] : memref<8x8x128xf32, #tpu.memory_space<vmem>>, vector<8x1x128xf32>
    %53 = vector.shape_cast %52 : vector<8x1x128xf32> to vector<8x128xf32>
    %54 = vector.shape_cast %51 : vector<8x128xf32> to vector<8x1x128xf32>
    tpu.vector_store %arg7[%c0_21, %c0_22, %c0_23], %54 {strides = array<i32>} : memref<8x8x128xf32, #tpu.memory_space<vmem>>, vector<8x1x128xf32>,
    %cst_24 = arith.constant dense<0.000000e+00> : vector<8x128xf32>
    %55 = tpu.matmul %49, %4, %cst_24 {dimension_numbers = #tpu.dot_dimension_numbers<[1], [0], [0], [1], [0, 0, 1, 1], [], []>} : vector<8x128xf32>, vector<128x128xf32>, vector<8x128xf32> -> vector<8x128xf32>
    %56 = arith.addf %55, %7 : vector<8x128xf32>
    %57 = math.tanh %56 : vector<8x128xf32>
    %c1 = arith.constant 1 : index
    %c0_25 = arith.constant 0 : index
    %c0_26 = arith.constant 0 : index
    %58 = vector.load %arg3[%c1, %c0_25, %c0_26] : memref<8x8x1xf32, #tpu.memory_space<vmem>>, vector<1x8x1xf32>
    %59 = vector.shape_cast %58 : vector<1x8x1xf32> to vector<8x1xf32>
    %60 = arith.subf %49, %57 : vector<8x128xf32>
    %61 = vector.broadcast %59 : vector<8x1xf32> to vector<8x128xf32>
    %62 = arith.mulf %57, %61 : vector<8x128xf32>
    %63 = arith.addf %60, %62 : vector<8x128xf32>
    %cst_27 = arith.constant dense<0.000000e+00> : vector<8x512xf32>
    %64 = tpu.matmul %51, %3, %cst_27 {dimension_numbers = #tpu.dot_dimension_numbers<[1], [0], [0], [1], [0, 0, 1, 1], [], []>} : vector<8x128xf32>, vector<128x512xf32>, vector<8x512xf32> -> vector<8x512xf32>
    %c1_28 = arith.constant 1 : index
    %c0_29 = arith.constant 0 : index
    %c0_30 = arith.constant 0 : index
    %65 = vector.load %arg2[%c1_28, %c0_29, %c0_30] : memref<8x8x512xf32, #tpu.memory_space<vmem>>, vector<1x8x512xf32>
    %66 = vector.shape_cast %65 : vector<1x8x512xf32> to vector<8x512xf32>
    %67 = arith.addf %64, %66 : vector<8x512xf32>
    %68 = vector.extract_strided_slice %67 {offsets = [0, 0], sizes = [8, 128], strides = [1, 1]} : vector<8x512xf32> to vector<8x128xf32>
    %69 = arith.negf %68 : vector<8x128xf32>
    %70 = math.exp %69 : vector<8x128xf32>
    %cst_31 = arith.constant 1.000000e+00 : f32
    %71 = vector.broadcast %cst_31 : f32 to vector<8x128xf32>
    %72 = arith.addf %71, %70 : vector<8x128xf32>
    %73 = arith.divf %71, %72 : vector<8x128xf32>
    %74 = vector.extract_strided_slice %67 {offsets = [0, 128], sizes = [8, 128], strides = [1, 1]} : vector<8x512xf32> to vector<8x128xf32>
    %75 = arith.negf %74 : vector<8x128xf32>
    %76 = math.exp %75 : vector<8x128xf32>
    %cst_32 = arith.constant 1.000000e+00 : f32
    %77 = vector.broadcast %cst_32 : f32 to vector<8x128xf32>
    %78 = arith.addf %77, %76 : vector<8x128xf32>
    %79 = arith.divf %77, %78 : vector<8x128xf32>
    %80 = vector.extract_strided_slice %67 {offsets = [0, 256], sizes = [8, 128], strides = [1, 1]} : vector<8x512xf32> to vector<8x128xf32>
    %81 = arith.negf %80 : vector<8x128xf32>
    %82 = math.exp %81 : vector<8x128xf32>
    %cst_33 = arith.constant 1.000000e+00 : f32
    %83 = vector.broadcast %cst_33 : f32 to vector<8x128xf32>
    %84 = arith.addf %83, %82 : vector<8x128xf32>
    %85 = arith.divf %83, %84 : vector<8x128xf32>
    %86 = vector.extract_strided_slice %67 {offsets = [0, 384], sizes = [8, 128], strides = [1, 1]} : vector<8x512xf32> to vector<8x128xf32>
    %87 = arith.negf %86 : vector<8x128xf32>
    %88 = math.exp %87 : vector<8x128xf32>
    %cst_34 = arith.constant 1.000000e+00 : f32
    %89 = vector.broadcast %cst_34 : f32 to vector<8x128xf32>
    %90 = arith.addf %89, %88 : vector<8x128xf32>
    %91 = arith.divf %89, %90 : vector<8x128xf32>
    %92 = arith.mulf %73, %63 : vector<8x128xf32>
    %93 = arith.mulf %79, %91 : vector<8x128xf32>
    %94 = arith.addf %92, %93 : vector<8x128xf32>
    %95 = math.tanh %94 : vector<8x128xf32>
    %96 = arith.mulf %85, %95 : vector<8x128xf32>
    %c0_35 = arith.constant 0 : index
    %c1_36 = arith.constant 1 : index
    %c0_37 = arith.constant 0 : index
    %97 = vector.load %arg7[%c0_35, %c1_36, %c0_37] : memref<8x8x128xf32, #tpu.memory_space<vmem>>, vector<8x1x128xf32>
    %98 = vector.shape_cast %97 : vector<8x1x128xf32> to vector<8x128xf32>
    %99 = vector.shape_cast %96 : vector<8x128xf32> to vector<8x1x128xf32>
    tpu.vector_store %arg7[%c0_35, %c1_36, %c0_37], %99 {strides = array<i32>} : memref<8x8x128xf32, #tpu.memory_space<vmem>>, vector<8x1x128xf32>,
    %cst_38 = arith.constant dense<0.000000e+00> : vector<8x128xf32>
    %100 = tpu.matmul %94, %4, %cst_38 {dimension_numbers = #tpu.dot_dimension_numbers<[1], [0], [0], [1], [0, 0, 1, 1], [], []>} : vector<8x128xf32>, vector<128x128xf32>, vector<8x128xf32> -> vector<8x128xf32>
    %101 = arith.addf %100, %7 : vector<8x128xf32>
    %102 = math.tanh %101 : vector<8x128xf32>
    %c2 = arith.constant 2 : index
    %c0_39 = arith.constant 0 : index
    %c0_40 = arith.constant 0 : index
    %103 = vector.load %arg3[%c2, %c0_39, %c0_40] : memref<8x8x1xf32, #tpu.memory_space<vmem>>, vector<1x8x1xf32>
    %104 = vector.shape_cast %103 : vector<1x8x1xf32> to vector<8x1xf32>
    %105 = arith.subf %94, %102 : vector<8x128xf32>
    %106 = vector.broadcast %104 : vector<8x1xf32> to vector<8x128xf32>
    %107 = arith.mulf %102, %106 : vector<8x128xf32>
    %108 = arith.addf %105, %107 : vector<8x128xf32>
    %cst_41 = arith.constant dense<0.000000e+00> : vector<8x512xf32>
    %109 = tpu.matmul %96, %3, %cst_41 {dimension_numbers = #tpu.dot_dimension_numbers<[1], [0], [0], [1], [0, 0, 1, 1], [], []>} : vector<8x128xf32>, vector<128x512xf32>, vector<8x512xf32> -> vector<8x512xf32>
    %c2_42 = arith.constant 2 : index
    %c0_43 = arith.constant 0 : index
    %c0_44 = arith.constant 0 : index
    %110 = vector.load %arg2[%c2_42, %c0_43, %c0_44] : memref<8x8x512xf32, #tpu.memory_space<vmem>>, vector<1x8x512xf32>
    %111 = vector.shape_cast %110 : vector<1x8x512xf32> to vector<8x512xf32>
    %112 = arith.addf %109, %111 : vector<8x512xf32>
    %113 = vector.extract_strided_slice %112 {offsets = [0, 0], sizes = [8, 128], strides = [1, 1]} : vector<8x512xf32> to vector<8x128xf32>
    %114 = arith.negf %113 : vector<8x128xf32>
    %115 = math.exp %114 : vector<8x128xf32>
    %cst_45 = arith.constant 1.000000e+00 : f32
    %116 = vector.broadcast %cst_45 : f32 to vector<8x128xf32>
    %117 = arith.addf %116, %115 : vector<8x128xf32>
    %118 = arith.divf %116, %117 : vector<8x128xf32>
    %119 = vector.extract_strided_slice %112 {offsets = [0, 128], sizes = [8, 128], strides = [1, 1]} : vector<8x512xf32> to vector<8x128xf32>
    %120 = arith.negf %119 : vector<8x128xf32>
    %121 = math.exp %120 : vector<8x128xf32>
    %cst_46 = arith.constant 1.000000e+00 : f32
    %122 = vector.broadcast %cst_46 : f32 to vector<8x128xf32>
    %123 = arith.addf %122, %121 : vector<8x128xf32>
    %124 = arith.divf %122, %123 : vector<8x128xf32>
    %125 = vector.extract_strided_slice %112 {offsets = [0, 256], sizes = [8, 128], strides = [1, 1]} : vector<8x512xf32> to vector<8x128xf32>
    %126 = arith.negf %125 : vector<8x128xf32>
    %127 = math.exp %126 : vector<8x128xf32>
    %cst_47 = arith.constant 1.000000e+00 : f32
    %128 = vector.broadcast %cst_47 : f32 to vector<8x128xf32>
    %129 = arith.addf %128, %127 : vector<8x128xf32>
    %130 = arith.divf %128, %129 : vector<8x128xf32>
    %131 = vector.extract_strided_slice %112 {offsets = [0, 384], sizes = [8, 128], strides = [1, 1]} : vector<8x512xf32> to vector<8x128xf32>
    %132 = arith.negf %131 : vector<8x128xf32>
    %133 = math.exp %132 : vector<8x128xf32>
    %cst_48 = arith.constant 1.000000e+00 : f32
    %134 = vector.broadcast %cst_48 : f32 to vector<8x128xf32>
    %135 = arith.addf %134, %133 : vector<8x128xf32>
    %136 = arith.divf %134, %135 : vector<8x128xf32>
    %137 = arith.mulf %118, %108 : vector<8x128xf32>
    %138 = arith.mulf %124, %136 : vector<8x128xf32>
    %139 = arith.addf %137, %138 : vector<8x128xf32>
    %140 = math.tanh %139 : vector<8x128xf32>
    %141 = arith.mulf %130, %140 : vector<8x128xf32>
    %c0_49 = arith.constant 0 : index
    %c2_50 = arith.constant 2 : index
    %c0_51 = arith.constant 0 : index
    %142 = vector.load %arg7[%c0_49, %c2_50, %c0_51] : memref<8x8x128xf32, #tpu.memory_space<vmem>>, vector<8x1x128xf32>
    %143 = vector.shape_cast %142 : vector<8x1x128xf32> to vector<8x128xf32>
    %144 = vector.shape_cast %141 : vector<8x128xf32> to vector<8x1x128xf32>
    tpu.vector_store %arg7[%c0_49, %c2_50, %c0_51], %144 {strides = array<i32>} : memref<8x8x128xf32, #tpu.memory_space<vmem>>, vector<8x1x128xf32>,
    %cst_52 = arith.constant dense<0.000000e+00> : vector<8x128xf32>
    %145 = tpu.matmul %139, %4, %cst_52 {dimension_numbers = #tpu.dot_dimension_numbers<[1], [0], [0], [1], [0, 0, 1, 1], [], []>} : vector<8x128xf32>, vector<128x128xf32>, vector<8x128xf32> -> vector<8x128xf32>
    %146 = arith.addf %145, %7 : vector<8x128xf32>
    %147 = math.tanh %146 : vector<8x128xf32>
    %c3 = arith.constant 3 : index
    %c0_53 = arith.constant 0 : index
    %c0_54 = arith.constant 0 : index
    %148 = vector.load %arg3[%c3, %c0_53, %c0_54] : memref<8x8x1xf32, #tpu.memory_space<vmem>>, vector<1x8x1xf32>
    %149 = vector.shape_cast %148 : vector<1x8x1xf32> to vector<8x1xf32>
    %150 = arith.subf %139, %147 : vector<8x128xf32>
    %151 = vector.broadcast %149 : vector<8x1xf32> to vector<8x128xf32>
    %152 = arith.mulf %147, %151 : vector<8x128xf32>
    %153 = arith.addf %150, %152 : vector<8x128xf32>
    %cst_55 = arith.constant dense<0.000000e+00> : vector<8x512xf32>
    %154 = tpu.matmul %141, %3, %cst_55 {dimension_numbers = #tpu.dot_dimension_numbers<[1], [0], [0], [1], [0, 0, 1, 1], [], []>} : vector<8x128xf32>, vector<128x512xf32>, vector<8x512xf32> -> vector<8x512xf32>
    %c3_56 = arith.constant 3 : index
    %c0_57 = arith.constant 0 : index
    %c0_58 = arith.constant 0 : index
    %155 = vector.load %arg2[%c3_56, %c0_57, %c0_58] : memref<8x8x512xf32, #tpu.memory_space<vmem>>, vector<1x8x512xf32>
    %156 = vector.shape_cast %155 : vector<1x8x512xf32> to vector<8x512xf32>
    %157 = arith.addf %154, %156 : vector<8x512xf32>
    %158 = vector.extract_strided_slice %157 {offsets = [0, 0], sizes = [8, 128], strides = [1, 1]} : vector<8x512xf32> to vector<8x128xf32>
    %159 = arith.negf %158 : vector<8x128xf32>
    %160 = math.exp %159 : vector<8x128xf32>
    %cst_59 = arith.constant 1.000000e+00 : f32
    %161 = vector.broadcast %cst_59 : f32 to vector<8x128xf32>
    %162 = arith.addf %161, %160 : vector<8x128xf32>
    %163 = arith.divf %161, %162 : vector<8x128xf32>
    %164 = vector.extract_strided_slice %157 {offsets = [0, 128], sizes = [8, 128], strides = [1, 1]} : vector<8x512xf32> to vector<8x128xf32>
    %165 = arith.negf %164 : vector<8x128xf32>
    %166 = math.exp %165 : vector<8x128xf32>
    %cst_60 = arith.constant 1.000000e+00 : f32
    %167 = vector.broadcast %cst_60 : f32 to vector<8x128xf32>
    %168 = arith.addf %167, %166 : vector<8x128xf32>
    %169 = arith.divf %167, %168 : vector<8x128xf32>
    %170 = vector.extract_strided_slice %157 {offsets = [0, 256], sizes = [8, 128], strides = [1, 1]} : vector<8x512xf32> to vector<8x128xf32>
    %171 = arith.negf %170 : vector<8x128xf32>
    %172 = math.exp %171 : vector<8x128xf32>
    %cst_61 = arith.constant 1.000000e+00 : f32
    %173 = vector.broadcast %cst_61 : f32 to vector<8x128xf32>
    %174 = arith.addf %173, %172 : vector<8x128xf32>
    %175 = arith.divf %173, %174 : vector<8x128xf32>
    %176 = vector.extract_strided_slice %157 {offsets = [0, 384], sizes = [8, 128], strides = [1, 1]} : vector<8x512xf32> to vector<8x128xf32>
    %177 = arith.negf %176 : vector<8x128xf32>
    %178 = math.exp %177 : vector<8x128xf32>
    %cst_62 = arith.constant 1.000000e+00 : f32
    %179 = vector.broadcast %cst_62 : f32 to vector<8x128xf32>
    %180 = arith.addf %179, %178 : vector<8x128xf32>
    %181 = arith.divf %179, %180 : vector<8x128xf32>
    %182 = arith.mulf %163, %153 : vector<8x128xf32>
    %183 = arith.mulf %169, %181 : vector<8x128xf32>
    %184 = arith.addf %182, %183 : vector<8x128xf32>
    %185 = math.tanh %184 : vector<8x128xf32>
    %186 = arith.mulf %175, %185 : vector<8x128xf32>
    %c0_63 = arith.constant 0 : index
    %c3_64 = arith.constant 3 : index
    %c0_65 = arith.constant 0 : index
    %187 = vector.load %arg7[%c0_63, %c3_64, %c0_65] : memref<8x8x128xf32, #tpu.memory_space<vmem>>, vector<8x1x128xf32>
    %188 = vector.shape_cast %187 : vector<8x1x128xf32> to vector<8x128xf32>
    %189 = vector.shape_cast %186 : vector<8x128xf32> to vector<8x1x128xf32>
    tpu.vector_store %arg7[%c0_63, %c3_64, %c0_65], %189 {strides = array<i32>} : memref<8x8x128xf32, #tpu.memory_space<vmem>>, vector<8x1x128xf32>,
    %cst_66 = arith.constant dense<0.000000e+00> : vector<8x128xf32>
    %190 = tpu.matmul %184, %4, %cst_66 {dimension_numbers = #tpu.dot_dimension_numbers<[1], [0], [0], [1], [0, 0, 1, 1], [], []>} : vector<8x128xf32>, vector<128x128xf32>, vector<8x128xf32> -> vector<8x128xf32>
    %191 = arith.addf %190, %7 : vector<8x128xf32>
    %192 = math.tanh %191 : vector<8x128xf32>
    %c4 = arith.constant 4 : index
    %c0_67 = arith.constant 0 : index
    %c0_68 = arith.constant 0 : index
    %193 = vector.load %arg3[%c4, %c0_67, %c0_68] : memref<8x8x1xf32, #tpu.memory_space<vmem>>, vector<1x8x1xf32>
    %194 = vector.shape_cast %193 : vector<1x8x1xf32> to vector<8x1xf32>
    %195 = arith.subf %184, %192 : vector<8x128xf32>
    %196 = vector.broadcast %194 : vector<8x1xf32> to vector<8x128xf32>
    %197 = arith.mulf %192, %196 : vector<8x128xf32>
    %198 = arith.addf %195, %197 : vector<8x128xf32>
    %cst_69 = arith.constant dense<0.000000e+00> : vector<8x512xf32>
    %199 = tpu.matmul %186, %3, %cst_69 {dimension_numbers = #tpu.dot_dimension_numbers<[1], [0], [0], [1], [0, 0, 1, 1], [], []>} : vector<8x128xf32>, vector<128x512xf32>, vector<8x512xf32> -> vector<8x512xf32>
    %c4_70 = arith.constant 4 : index
    %c0_71 = arith.constant 0 : index
    %c0_72 = arith.constant 0 : index
    %200 = vector.load %arg2[%c4_70, %c0_71, %c0_72] : memref<8x8x512xf32, #tpu.memory_space<vmem>>, vector<1x8x512xf32>
    %201 = vector.shape_cast %200 : vector<1x8x512xf32> to vector<8x512xf32>
    %202 = arith.addf %199, %201 : vector<8x512xf32>
    %203 = vector.extract_strided_slice %202 {offsets = [0, 0], sizes = [8, 128], strides = [1, 1]} : vector<8x512xf32> to vector<8x128xf32>
    %204 = arith.negf %203 : vector<8x128xf32>
    %205 = math.exp %204 : vector<8x128xf32>
    %cst_73 = arith.constant 1.000000e+00 : f32
    %206 = vector.broadcast %cst_73 : f32 to vector<8x128xf32>
    %207 = arith.addf %206, %205 : vector<8x128xf32>
    %208 = arith.divf %206, %207 : vector<8x128xf32>
    %209 = vector.extract_strided_slice %202 {offsets = [0, 128], sizes = [8, 128], strides = [1, 1]} : vector<8x512xf32> to vector<8x128xf32>
    %210 = arith.negf %209 : vector<8x128xf32>
    %211 = math.exp %210 : vector<8x128xf32>
    %cst_74 = arith.constant 1.000000e+00 : f32
    %212 = vector.broadcast %cst_74 : f32 to vector<8x128xf32>
    %213 = arith.addf %212, %211 : vector<8x128xf32>
    %214 = arith.divf %212, %213 : vector<8x128xf32>
    %215 = vector.extract_strided_slice %202 {offsets = [0, 256], sizes = [8, 128], strides = [1, 1]} : vector<8x512xf32> to vector<8x128xf32>
    %216 = arith.negf %215 : vector<8x128xf32>
    %217 = math.exp %216 : vector<8x128xf32>
    %cst_75 = arith.constant 1.000000e+00 : f32
    %218 = vector.broadcast %cst_75 : f32 to vector<8x128xf32>
    %219 = arith.addf %218, %217 : vector<8x128xf32>
    %220 = arith.divf %218, %219 : vector<8x128xf32>
    %221 = vector.extract_strided_slice %202 {offsets = [0, 384], sizes = [8, 128], strides = [1, 1]} : vector<8x512xf32> to vector<8x128xf32>
    %222 = arith.negf %221 : vector<8x128xf32>
    %223 = math.exp %222 : vector<8x128xf32>
    %cst_76 = arith.constant 1.000000e+00 : f32
    %224 = vector.broadcast %cst_76 : f32 to vector<8x128xf32>
    %225 = arith.addf %224, %223 : vector<8x128xf32>
    %226 = arith.divf %224, %225 : vector<8x128xf32>
    %227 = arith.mulf %208, %198 : vector<8x128xf32>
    %228 = arith.mulf %214, %226 : vector<8x128xf32>
    %229 = arith.addf %227, %228 : vector<8x128xf32>
    %230 = math.tanh %229 : vector<8x128xf32>
    %231 = arith.mulf %220, %230 : vector<8x128xf32>
    %c0_77 = arith.constant 0 : index
    %c4_78 = arith.constant 4 : index
    %c0_79 = arith.constant 0 : index
    %232 = vector.load %arg7[%c0_77, %c4_78, %c0_79] : memref<8x8x128xf32, #tpu.memory_space<vmem>>, vector<8x1x128xf32>
    %233 = vector.shape_cast %232 : vector<8x1x128xf32> to vector<8x128xf32>
    %234 = vector.shape_cast %231 : vector<8x128xf32> to vector<8x1x128xf32>
    tpu.vector_store %arg7[%c0_77, %c4_78, %c0_79], %234 {strides = array<i32>} : memref<8x8x128xf32, #tpu.memory_space<vmem>>, vector<8x1x128xf32>,
    %cst_80 = arith.constant dense<0.000000e+00> : vector<8x128xf32>
    %235 = tpu.matmul %229, %4, %cst_80 {dimension_numbers = #tpu.dot_dimension_numbers<[1], [0], [0], [1], [0, 0, 1, 1], [], []>} : vector<8x128xf32>, vector<128x128xf32>, vector<8x128xf32> -> vector<8x128xf32>
    %236 = arith.addf %235, %7 : vector<8x128xf32>
    %237 = math.tanh %236 : vector<8x128xf32>
    %c5 = arith.constant 5 : index
    %c0_81 = arith.constant 0 : index
    %c0_82 = arith.constant 0 : index
    %238 = vector.load %arg3[%c5, %c0_81, %c0_82] : memref<8x8x1xf32, #tpu.memory_space<vmem>>, vector<1x8x1xf32>
    %239 = vector.shape_cast %238 : vector<1x8x1xf32> to vector<8x1xf32>
    %240 = arith.subf %229, %237 : vector<8x128xf32>
    %241 = vector.broadcast %239 : vector<8x1xf32> to vector<8x128xf32>
    %242 = arith.mulf %237, %241 : vector<8x128xf32>
    %243 = arith.addf %240, %242 : vector<8x128xf32>
    %cst_83 = arith.constant dense<0.000000e+00> : vector<8x512xf32>
    %244 = tpu.matmul %231, %3, %cst_83 {dimension_numbers = #tpu.dot_dimension_numbers<[1], [0], [0], [1], [0, 0, 1, 1], [], []>} : vector<8x128xf32>, vector<128x512xf32>, vector<8x512xf32> -> vector<8x512xf32>
    %c5_84 = arith.constant 5 : index
    %c0_85 = arith.constant 0 : index
    %c0_86 = arith.constant 0 : index
    %245 = vector.load %arg2[%c5_84, %c0_85, %c0_86] : memref<8x8x512xf32, #tpu.memory_space<vmem>>, vector<1x8x512xf32>
    %246 = vector.shape_cast %245 : vector<1x8x512xf32> to vector<8x512xf32>
    %247 = arith.addf %244, %246 : vector<8x512xf32>
    %248 = vector.extract_strided_slice %247 {offsets = [0, 0], sizes = [8, 128], strides = [1, 1]} : vector<8x512xf32> to vector<8x128xf32>
    %249 = arith.negf %248 : vector<8x128xf32>
    %250 = math.exp %249 : vector<8x128xf32>
    %cst_87 = arith.constant 1.000000e+00 : f32
    %251 = vector.broadcast %cst_87 : f32 to vector<8x128xf32>
    %252 = arith.addf %251, %250 : vector<8x128xf32>
    %253 = arith.divf %251, %252 : vector<8x128xf32>
    %254 = vector.extract_strided_slice %247 {offsets = [0, 128], sizes = [8, 128], strides = [1, 1]} : vector<8x512xf32> to vector<8x128xf32>
    %255 = arith.negf %254 : vector<8x128xf32>
    %256 = math.exp %255 : vector<8x128xf32>
    %cst_88 = arith.constant 1.000000e+00 : f32
    %257 = vector.broadcast %cst_88 : f32 to vector<8x128xf32>
    %258 = arith.addf %257, %256 : vector<8x128xf32>
    %259 = arith.divf %257, %258 : vector<8x128xf32>
    %260 = vector.extract_strided_slice %247 {offsets = [0, 256], sizes = [8, 128], strides = [1, 1]} : vector<8x512xf32> to vector<8x128xf32>
    %261 = arith.negf %260 : vector<8x128xf32>
    %262 = math.exp %261 : vector<8x128xf32>
    %cst_89 = arith.constant 1.000000e+00 : f32
    %263 = vector.broadcast %cst_89 : f32 to vector<8x128xf32>
    %264 = arith.addf %263, %262 : vector<8x128xf32>
    %265 = arith.divf %263, %264 : vector<8x128xf32>
    %266 = vector.extract_strided_slice %247 {offsets = [0, 384], sizes = [8, 128], strides = [1, 1]} : vector<8x512xf32> to vector<8x128xf32>
    %267 = arith.negf %266 : vector<8x128xf32>
    %268 = math.exp %267 : vector<8x128xf32>
    %cst_90 = arith.constant 1.000000e+00 : f32
    %269 = vector.broadcast %cst_90 : f32 to vector<8x128xf32>
    %270 = arith.addf %269, %268 : vector<8x128xf32>
    %271 = arith.divf %269, %270 : vector<8x128xf32>
    %272 = arith.mulf %253, %243 : vector<8x128xf32>
    %273 = arith.mulf %259, %271 : vector<8x128xf32>
    %274 = arith.addf %272, %273 : vector<8x128xf32>
    %275 = math.tanh %274 : vector<8x128xf32>
    %276 = arith.mulf %265, %275 : vector<8x128xf32>
    %c0_91 = arith.constant 0 : index
    %c5_92 = arith.constant 5 : index
    %c0_93 = arith.constant 0 : index
    %277 = vector.load %arg7[%c0_91, %c5_92, %c0_93] : memref<8x8x128xf32, #tpu.memory_space<vmem>>, vector<8x1x128xf32>
    %278 = vector.shape_cast %277 : vector<8x1x128xf32> to vector<8x128xf32>
    %279 = vector.shape_cast %276 : vector<8x128xf32> to vector<8x1x128xf32>
    tpu.vector_store %arg7[%c0_91, %c5_92, %c0_93], %279 {strides = array<i32>} : memref<8x8x128xf32, #tpu.memory_space<vmem>>, vector<8x1x128xf32>,
    %cst_94 = arith.constant dense<0.000000e+00> : vector<8x128xf32>
    %280 = tpu.matmul %274, %4, %cst_94 {dimension_numbers = #tpu.dot_dimension_numbers<[1], [0], [0], [1], [0, 0, 1, 1], [], []>} : vector<8x128xf32>, vector<128x128xf32>, vector<8x128xf32> -> vector<8x128xf32>
    %281 = arith.addf %280, %7 : vector<8x128xf32>
    %282 = math.tanh %281 : vector<8x128xf32>
    %c6 = arith.constant 6 : index
    %c0_95 = arith.constant 0 : index
    %c0_96 = arith.constant 0 : index
    %283 = vector.load %arg3[%c6, %c0_95, %c0_96] : memref<8x8x1xf32, #tpu.memory_space<vmem>>, vector<1x8x1xf32>
    %284 = vector.shape_cast %283 : vector<1x8x1xf32> to vector<8x1xf32>
    %285 = arith.subf %274, %282 : vector<8x128xf32>
    %286 = vector.broadcast %284 : vector<8x1xf32> to vector<8x128xf32>
    %287 = arith.mulf %282, %286 : vector<8x128xf32>
    %288 = arith.addf %285, %287 : vector<8x128xf32>
    %cst_97 = arith.constant dense<0.000000e+00> : vector<8x512xf32>
    %289 = tpu.matmul %276, %3, %cst_97 {dimension_numbers = #tpu.dot_dimension_numbers<[1], [0], [0], [1], [0, 0, 1, 1], [], []>} : vector<8x128xf32>, vector<128x512xf32>, vector<8x512xf32> -> vector<8x512xf32>
    %c6_98 = arith.constant 6 : index
    %c0_99 = arith.constant 0 : index
    %c0_100 = arith.constant 0 : index
    %290 = vector.load %arg2[%c6_98, %c0_99, %c0_100] : memref<8x8x512xf32, #tpu.memory_space<vmem>>, vector<1x8x512xf32>
    %291 = vector.shape_cast %290 : vector<1x8x512xf32> to vector<8x512xf32>
    %292 = arith.addf %289, %291 : vector<8x512xf32>
    %293 = vector.extract_strided_slice %292 {offsets = [0, 0], sizes = [8, 128], strides = [1, 1]} : vector<8x512xf32> to vector<8x128xf32>
    %294 = arith.negf %293 : vector<8x128xf32>
    %295 = math.exp %294 : vector<8x128xf32>
    %cst_101 = arith.constant 1.000000e+00 : f32
    %296 = vector.broadcast %cst_101 : f32 to vector<8x128xf32>
    %297 = arith.addf %296, %295 : vector<8x128xf32>
    %298 = arith.divf %296, %297 : vector<8x128xf32>
    %299 = vector.extract_strided_slice %292 {offsets = [0, 128], sizes = [8, 128], strides = [1, 1]} : vector<8x512xf32> to vector<8x128xf32>
    %300 = arith.negf %299 : vector<8x128xf32>
    %301 = math.exp %300 : vector<8x128xf32>
    %cst_102 = arith.constant 1.000000e+00 : f32
    %302 = vector.broadcast %cst_102 : f32 to vector<8x128xf32>
    %303 = arith.addf %302, %301 : vector<8x128xf32>
    %304 = arith.divf %302, %303 : vector<8x128xf32>
    %305 = vector.extract_strided_slice %292 {offsets = [0, 256], sizes = [8, 128], strides = [1, 1]} : vector<8x512xf32> to vector<8x128xf32>
    %306 = arith.negf %305 : vector<8x128xf32>
    %307 = math.exp %306 : vector<8x128xf32>
    %cst_103 = arith.constant 1.000000e+00 : f32
    %308 = vector.broadcast %cst_103 : f32 to vector<8x128xf32>
    %309 = arith.addf %308, %307 : vector<8x128xf32>
    %310 = arith.divf %308, %309 : vector<8x128xf32>
    %311 = vector.extract_strided_slice %292 {offsets = [0, 384], sizes = [8, 128], strides = [1, 1]} : vector<8x512xf32> to vector<8x128xf32>
    %312 = arith.negf %311 : vector<8x128xf32>
    %313 = math.exp %312 : vector<8x128xf32>
    %cst_104 = arith.constant 1.000000e+00 : f32
    %314 = vector.broadcast %cst_104 : f32 to vector<8x128xf32>
    %315 = arith.addf %314, %313 : vector<8x128xf32>
    %316 = arith.divf %314, %315 : vector<8x128xf32>
    %317 = arith.mulf %298, %288 : vector<8x128xf32>
    %318 = arith.mulf %304, %316 : vector<8x128xf32>
    %319 = arith.addf %317, %318 : vector<8x128xf32>
    %320 = math.tanh %319 : vector<8x128xf32>
    %321 = arith.mulf %310, %320 : vector<8x128xf32>
    %c0_105 = arith.constant 0 : index
    %c6_106 = arith.constant 6 : index
    %c0_107 = arith.constant 0 : index
    %322 = vector.load %arg7[%c0_105, %c6_106, %c0_107] : memref<8x8x128xf32, #tpu.memory_space<vmem>>, vector<8x1x128xf32>
    %323 = vector.shape_cast %322 : vector<8x1x128xf32> to vector<8x128xf32>
    %324 = vector.shape_cast %321 : vector<8x128xf32> to vector<8x1x128xf32>
    tpu.vector_store %arg7[%c0_105, %c6_106, %c0_107], %324 {strides = array<i32>} : memref<8x8x128xf32, #tpu.memory_space<vmem>>, vector<8x1x128xf32>,
    %cst_108 = arith.constant dense<0.000000e+00> : vector<8x128xf32>
    %325 = tpu.matmul %319, %4, %cst_108 {dimension_numbers = #tpu.dot_dimension_numbers<[1], [0], [0], [1], [0, 0, 1, 1], [], []>} : vector<8x128xf32>, vector<128x128xf32>, vector<8x128xf32> -> vector<8x128xf32>
    %326 = arith.addf %325, %7 : vector<8x128xf32>
    %327 = math.tanh %326 : vector<8x128xf32>
    %c7 = arith.constant 7 : index
    %c0_109 = arith.constant 0 : index
    %c0_110 = arith.constant 0 : index
    %328 = vector.load %arg3[%c7, %c0_109, %c0_110] : memref<8x8x1xf32, #tpu.memory_space<vmem>>, vector<1x8x1xf32>
    %329 = vector.shape_cast %328 : vector<1x8x1xf32> to vector<8x1xf32>
    %330 = arith.subf %319, %327 : vector<8x128xf32>
    %331 = vector.broadcast %329 : vector<8x1xf32> to vector<8x128xf32>
    %332 = arith.mulf %327, %331 : vector<8x128xf32>
    %333 = arith.addf %330, %332 : vector<8x128xf32>
    %cst_111 = arith.constant dense<0.000000e+00> : vector<8x512xf32>
    %334 = tpu.matmul %321, %3, %cst_111 {dimension_numbers = #tpu.dot_dimension_numbers<[1], [0], [0], [1], [0, 0, 1, 1], [], []>} : vector<8x128xf32>, vector<128x512xf32>, vector<8x512xf32> -> vector<8x512xf32>
    %c7_112 = arith.constant 7 : index
    %c0_113 = arith.constant 0 : index
    %c0_114 = arith.constant 0 : index
    %335 = vector.load %arg2[%c7_112, %c0_113, %c0_114] : memref<8x8x512xf32, #tpu.memory_space<vmem>>, vector<1x8x512xf32>
    %336 = vector.shape_cast %335 : vector<1x8x512xf32> to vector<8x512xf32>
    %337 = arith.addf %334, %336 : vector<8x512xf32>
    %338 = vector.extract_strided_slice %337 {offsets = [0, 0], sizes = [8, 128], strides = [1, 1]} : vector<8x512xf32> to vector<8x128xf32>
    %339 = arith.negf %338 : vector<8x128xf32>
    %340 = math.exp %339 : vector<8x128xf32>
    %cst_115 = arith.constant 1.000000e+00 : f32
    %341 = vector.broadcast %cst_115 : f32 to vector<8x128xf32>
    %342 = arith.addf %341, %340 : vector<8x128xf32>
    %343 = arith.divf %341, %342 : vector<8x128xf32>
    %344 = vector.extract_strided_slice %337 {offsets = [0, 128], sizes = [8, 128], strides = [1, 1]} : vector<8x512xf32> to vector<8x128xf32>
    %345 = arith.negf %344 : vector<8x128xf32>
    %346 = math.exp %345 : vector<8x128xf32>
    %cst_116 = arith.constant 1.000000e+00 : f32
    %347 = vector.broadcast %cst_116 : f32 to vector<8x128xf32>
    %348 = arith.addf %347, %346 : vector<8x128xf32>
    %349 = arith.divf %347, %348 : vector<8x128xf32>
    %350 = vector.extract_strided_slice %337 {offsets = [0, 256], sizes = [8, 128], strides = [1, 1]} : vector<8x512xf32> to vector<8x128xf32>
    %351 = arith.negf %350 : vector<8x128xf32>
    %352 = math.exp %351 : vector<8x128xf32>
    %cst_117 = arith.constant 1.000000e+00 : f32
    %353 = vector.broadcast %cst_117 : f32 to vector<8x128xf32>
    %354 = arith.addf %353, %352 : vector<8x128xf32>
    %355 = arith.divf %353, %354 : vector<8x128xf32>
    %356 = vector.extract_strided_slice %337 {offsets = [0, 384], sizes = [8, 128], strides = [1, 1]} : vector<8x512xf32> to vector<8x128xf32>
    %357 = arith.negf %356 : vector<8x128xf32>
    %358 = math.exp %357 : vector<8x128xf32>
    %cst_118 = arith.constant 1.000000e+00 : f32
    %359 = vector.broadcast %cst_118 : f32 to vector<8x128xf32>
    %360 = arith.addf %359, %358 : vector<8x128xf32>
    %361 = arith.divf %359, %360 : vector<8x128xf32>
    %362 = arith.mulf %343, %333 : vector<8x128xf32>
    %363 = arith.mulf %349, %361 : vector<8x128xf32>
    %364 = arith.addf %362, %363 : vector<8x128xf32>
    %365 = math.tanh %364 : vector<8x128xf32>
    %366 = arith.mulf %355, %365 : vector<8x128xf32>
    %c0_119 = arith.constant 0 : index
    %c7_120 = arith.constant 7 : index
    %c0_121 = arith.constant 0 : index
    %367 = vector.load %arg7[%c0_119, %c7_120, %c0_121] : memref<8x8x128xf32, #tpu.memory_space<vmem>>, vector<8x1x128xf32>
    %368 = vector.shape_cast %367 : vector<8x1x128xf32> to vector<8x128xf32>
    %369 = vector.shape_cast %366 : vector<8x128xf32> to vector<8x1x128xf32>
    tpu.vector_store %arg7[%c0_119, %c7_120, %c0_121], %369 {strides = array<i32>} : memref<8x8x128xf32, #tpu.memory_space<vmem>>, vector<8x1x128xf32>,
    %c0_122 = arith.constant 0 : index
    %c0_123 = arith.constant 0 : index
    %370 = vector.load %arg8[%c0_122, %c0_123] : memref<8x128xf32, #tpu.memory_space<vmem>>, vector<8x128xf32>
    tpu.vector_store %arg8[%c0_122, %c0_123], %366 {strides = array<i32>} : memref<8x128xf32, #tpu.memory_space<vmem>>, vector<8x128xf32>,
    %c0_124 = arith.constant 0 : index
    %c0_125 = arith.constant 0 : index
    %371 = vector.load %arg9[%c0_124, %c0_125] : memref<8x128xf32, #tpu.memory_space<vmem>>, vector<8x128xf32>
    tpu.vector_store %arg9[%c0_124, %c0_125], %364 {strides = array<i32>} : memref<8x128xf32, #tpu.memory_space<vmem>>, vector<8x128xf32>,
    return
  }
  func.func @transform_0(%arg0: i32, %arg1: i32) -> (i32, i32, i32) {
    %c0_i32 = arith.constant 0 : i32
    %c0_i32_0 = arith.constant 0 : i32
    return %arg1, %arg0, %c0_i32 : i32, i32, i32
  }
  func.func @transform_1(%arg0: i32, %arg1: i32) -> (i32, i32, i32) {
    %c0_i32 = arith.constant 0 : i32
    %c0_i32_0 = arith.constant 0 : i32
    return %arg1, %arg0, %c0_i32 : i32, i32, i32
  }
  func.func @transform_2(%arg0: i32, %arg1: i32) -> (i32, i32) {
    %c0_i32 = arith.constant 0 : i32
    %c0_i32_0 = arith.constant 0 : i32
    %c0_i32_1 = arith.constant 0 : i32
    return %c0_i32, %c0_i32_0 : i32, i32
  }
  func.func @transform_3(%arg0: i32, %arg1: i32) -> (i32, i32) {
    %c0_i32 = arith.constant 0 : i32
    %c0_i32_0 = arith.constant 0 : i32
    %c0_i32_1 = arith.constant 0 : i32
    return %c0_i32, %c0_i32_0 : i32, i32
  }
  func.func @transform_4(%arg0: i32, %arg1: i32) -> (i32, i32) {
    %c0_i32 = arith.constant 0 : i32
    %c0_i32_0 = arith.constant 0 : i32
    %c0_i32_1 = arith.constant 0 : i32
    return %c0_i32, %c0_i32_0 : i32, i32
  }
  func.func @transform_5(%arg0: i32, %arg1: i32) -> (i32, i32, i32) {
    %c0_i32 = arith.constant 0 : i32
    %c0_i32_0 = arith.constant 0 : i32
    return %arg0, %arg1, %c0_i32 : i32, i32, i32
  }
}

</mosaic_0001>

<bundles_post_ra>
// kernel: tpu_custom_call.1
= control target key start
LH: loop header
LB: loop body
LE: loop exit
PB: predicated region body
PF: predicated region fallthrough
CT: control target
= control target key end

     0   :  { %s6197_s0 = inlined_call_operand.hbm [shape: f32[16,16,512], index: 0, kind: input, shape index: {}]   ;;  %s6198_s1 = inlined_call_operand.vmem [shape: f32[16,16,1], index: 1, kind: input, shape index: {}]   ;;  %s6199_s2 = inlined_call_operand.hbm [shape: f32[128,512], index: 2, kind: input, shape index: {}]   ;;  %s6200_s3 = inlined_call_operand.vmem [shape: f32[128,128], index: 3, kind: input, shape index: {}]   ;;  %s6201_s4 = inlined_call_operand.vmem [shape: f32[1,128], index: 4, kind: input, shape index: {}]   ;;  %s6202_s5 = inlined_call_operand.hbm [shape: f32[16,16,128], index: 5, kind: output, shape index: {}]  }
   0x1   :  { %6333 = sst [smem:[#allocation60_spill]] %s6199_s2 }
   0x2   :  { %10 = vsyncpa [#allocation5], 0 }
   0x3   :  { %12 = vsyncpa [#allocation5 + $0x1], 0 }
   0x4   :  { %13 = vsyncpa [#allocation9], 0 }
   0x5   :  { %14 = vsyncpa [#allocation6], 0 }
   0x6   :  { %16 = vsyncpa [#allocation6 + $0x1], 0  ;;  %s4348_s18 = smov 0   ;;  %s4350_s19 = smov 0  }
   0x7   :  { %s4352_s20 = smov 0   ;;  %s4354_s21 = smov 0  }
   0x8   :  { %s4356_s22 = smov 0   ;;  %s4358_s23 = smov 0  }
   0x9   :  { %s4360_s24 = smov 0   ;;  %s4362_s25 = smov 0  }
   0xa LB: > { %6334 = sst [smem:[#allocation14_spill]] %s4272_s18  ;;  %s3182_s26 = sadd.s32 4294967295, %s4300_s25   ;;  %s4300_s25 = sphi %s4362_s25, %s22_s25   ;;  %s4296_s24 = sphi %s4360_s24, %s6553_s24   ;;  %s4292_s23 = sphi %s4358_s23, %s6552_s23   ;;  %s4288_s22 = sphi %s4356_s22, %s6551_s22   ;;  %s4284_s21 = sphi %s4354_s21, %s6550_s21   ;;  %s4280_s20 = sphi %s4352_s20, %s6545_s20   ;;  %s4276_s19 = sphi %s4350_s19, %s6549_s19   ;;  %s4272_s18 = sphi %s4348_s18, %s6548_s18  }
   0xb   : > { %6335 = sst [smem:[#allocation15_spill]] %s4280_s20  ;;  %s3183_s27 = sadd.s32 4294967294, %s4300_s25  }
   0xc   : > { %6336 = sst [smem:[#allocation16_spill]] %s4300_s25  ;;  %s31_s28 = sadd.s32 1, %s4292_s23 }
   0xd   : > { %s34_s29 = sadd.s32 1, %s4296_s24  ;;  %p32_p0 = scmp.ge.s32.totalorder %s31_s28, 2 }
   0xe   : > { %s43_s30 = sadd.s32 1, %s4280_s20  ;;  %p50_p1 = scmp.ne.s32.totalorder %s4280_s20, %s4276_s19 }
   0xf   : > { %p51_p2 = scmp.eq.s32.totalorder %s4300_s25, 0  ;;  %s6555_s28 = smov (%p32_p0, %s31_s28), 0 }
  0x10   : > { %6337 = sst [smem:[#allocation17_spill]] %s6555_s28  ;;  %s6557_s29 = smov (!%p32_p0, %s34_s29), %s4296_s24 }
  0x11   : > { %s38_s6 = ssub.s32 %s4292_s23, %s6555_s28  ;;  %p4401_p3 = por %p51_p2, %p50_p1 }
  0x12   : > { %p36_p4 = scmp.ge.s32.totalorder %s6557_s29, 2  ;;  %p56_p5 = scmp.ne.s32.totalorder %s4276_s19, %s4272_s18 }
  0x13   : > { %p4407_p6 = scmp.eq.s32.totalorder %s3182_s26, 0  ;;  %p173_p7 = scmp.eq.s32.totalorder %s3182_s26, 3 }
  0x14   : > { %s6559_s29 = smov (%p36_p4, %s6557_s29), 0  ;;  %p179_p10 = scmp.eq.s32.totalorder %s3183_s27, 3 }
  0x15   : > { %6340 = sst [smem:[#allocation18_spill]] %s6559_s29  ;;  %p4415_p8 = por %p4407_p6, %p56_p5 }
  0x16   : > { %p4419_p9 = por %p173_p7, %p50_p1  ;;  %s39_s11 = ssub.s32 %s4296_s24, %s6559_s29 }
  0x17   : > { %s6341_s9 = scalar_select %p4415_p8, 1, 0 }
  0x18   : > { %s6342_s10 = scalar_select %p4419_p9, 1, 0 }
  0x19   : > { %s40_s12 = sor.u32 %s39_s11, %s38_s6  ;;  %p3184_p11 = scmp.ge.s32.totalorder %s4300_s25, 1 }
  0x1a   : > { %p41_p12 = scmp.eq.s32.totalorder %s40_s12, 0  ;;  %p4426_p13 = por %p179_p10, %p56_p5 }
  0x1b   : > { %p186_p0 = scmp.lt.s32.totalorder %s4300_s25, 5  ;;  %s4302_s16 = smov [#allocation8]  }
  0x1c   : > { %s6343_s13 = scalar_select %p4426_p13, 1, 0 }
  0x1d   : > { %s4432_s14 = scalar_select %p41_p12, %s4280_s20, %s43_s30  }
  0x1e   : > { %6344 = sst [smem:[#allocation19_spill]] %s6343_s13  ;;  %p4434_p2 = pnand %p3184_p11, %p186_p0 }
  0x1f   : > { %6345 = sst [smem:[#allocation20_spill]] %s4432_s14  ;;  %s198_s17 = sshll.u32 %s4302_s16, 4  ;;  %s199_s17 = int_to_ptr.vmem [resolvable:$true] %s198_s17 }
  0x20   : > { %p3735_p1 = pneg %p4434_p2  ;;  %s4159_s26 = scalar_lea.vmem %s199_s17, 8192 }
  0x21   : > { %p4160_p5 = scmp.ne.s32.totalorder %s199_s17, %s4159_s26  ;;  %p4167_p9 = scmp.lt.s32.totalorder %s199_s17, %s199_s17 }
  0x22   : > { %p3736_p4 = pnand %p3735_p1, %p4407_p6  ;;  %p4168_p12 = scmp.lt.s32.totalorder %s4159_s26, %s4159_s26 }
  0x24   : > { %p4150_p7 = pneg %p3736_p4  ;;  %p4169_p8 = por %p4168_p12, %p4167_p9 }
  0x26   : > { %p4162_p10 = pnand %p4160_p5, %p4150_p7 }
  0x28   : > { %p4163_p13 = pneg %p4162_p10 }
  0x2a   : > { %p4170_p11 = pnand %p4169_p8, %p4163_p13 }
  0x2c   : > { %4173 = shalt.err (!%p4170_p11)
}
  0x2d   : > { %s4303_s27 = smov 512   ;;  %s4304_s30 = smov 32  }
  0x2e   : > { %s6347_s2 = sld [smem:[#allocation60_spill]]  ;;  %p3186_p0 = scmp.ge.s32.totalorder %s4300_s25, 4 }
  0x2f   : > { %s4447_s12 = sand.u32 (!%p3186_p0), 1, %s4280_s20   ;;  %s3189_s16 = sshll.u32 (!%p3186_p0), %s4296_s24, 2 }
  0x30   : > { %214 = sbr.rel (%p3186_p0) target bundleno = 76 (0x4c), region = 28  ;;  %s3187_s26 = sshll.u32 (!%p3186_p0), %s4447_s12, 8 }
  0x31   : > { %s3308_s29 = sshll.u32 (!%p3186_p0), %s4292_s23, 6  ;;  %s222_s14 = scalar_lea.vmem (!%p3186_p0), [#allocation4], %s3187_s26 }
  0x32   : > { %s229_s28 = sadd.s32 (!%p3186_p0), %s3308_s29, %s3189_s16  ;;  %s232_s13 = sshll.u32 (!%p3186_p0), %s222_s14, 4  ;;  %s233_s13 = int_to_ptr.vmem [resolvable:$true] %s232_s13 }
  0x33   : > { %s3191_s18 = sshll.u32 (!%p3186_p0), %s229_s28, 7  ;;  %s219_s6 = scalar_lea.sflag (!%p3186_p0), [#allocation5], %s4447_s12 }
  0x34   : > { %3738 = dma.hbm_to_vmem [thread:$0]  (!%p3736_p4), %s6347_s2, 8192, %s199_s17, [#allocation9], %s4303_s27, %s4303_s27, %s4304_s30  }
  0x35   : > { %s231_s30 = scalar_lea.hbm %s6197_s0, %s3191_s18  ;;  %s4186_s11 = scalar_lea.vmem %s233_s13, 4096 }
  0x36   : > { %p4187_p8 = scmp.ne.s32.totalorder %s233_s13, %s4186_s11  ;;  %s4305_s2 = smov [#allocation4]  }
  0x37   : > { %s4190_s20 = sshll.u32 %s4305_s2, 4  ;;  %s4191_s20 = int_to_ptr.vmem [resolvable:$false] %s4190_s20 }
  0x38   : > { %p4188_p9 = pnand %p4187_p8, %p4401_p3  ;;  %s4192_s25 = scalar_lea.vmem %s4191_s20, 8192 }
  0x39   : > { %p4193_p1 = scmp.lt.s32.totalorder %s233_s13, %s4191_s20  ;;  %p4194_p4 = scmp.lt.s32.totalorder %s4192_s25, %s4186_s11 }
  0x3a   : > { %p4189_p13 = pneg %p4188_p9 }
  0x3b   : > { %p4195_p7 = por %p4194_p4, %p4193_p1 }
  0x3d   : > { %p4196_p5 = pnand %p4195_p7, %p4189_p13 }
  0x3f   : > { %4199 = shalt.err (!%p4196_p5)
}
  0x40   : > { %s4306_s28 = smov 1024   ;;  %s4307_s29 = smov 512  }
  0x41   : > { %s4308_s14 = smov 32   ;;  %241 = sbr.rel (!%p4401_p3) target bundleno = 76 (0x4c), region = 36 }
  0x42   : > { %3729 = dma.hbm_to_vmem [thread:$0]  (%p4401_p3), %s231_s30, 4096, %s233_s13, %s219_s6, %s4306_s28, %s4307_s29, %s4308_s14  }
  0x43   : > { %s3192_s2 = sshll.u32 (%p4401_p3), %s4447_s12, 6  ;;  %s3309_s18 = sshll.u32 (%p4401_p3), %s4292_s23, 4 }
  0x44   : > { %s248_s16 = sadd.s32 (%p4401_p3), %s4296_s24, %s3309_s18  ;;  %s245_s27 = scalar_lea.vmem (%p4401_p3), [#allocation7], %s3192_s2 }
  0x45   : > { %s3195_s20 = sshll.u32 (%p4401_p3), %s248_s16, 3 }
  0x46   : > { %s250_s17 = scalar_lea.vmem %s6198_s1, %s3195_s20 }
  0x47   : > { %v293_v0 = vld [vmem:[%s250_s17] sm:$0xff]  ;;  %v295_v1 = vld [vmem:[%s250_s17 + $0x10] sm:$0xff] }
  0x48   : > { %v297_v2 = vld [vmem:[%s250_s17 + $0x20] sm:$0xff]  ;;  %294 = vst [vmem:[%s245_s27] sm:$0xff] %v293_v0  ;;  %296 = vst [vmem:[%s245_s27 + $0x8] sm:$0xff] %v295_v1  ;;  %v299_v3 = vld [vmem:[%s250_s17 + $0x30] sm:$0xff] }
  0x49   : > { %298 = vst [vmem:[%s245_s27 + $0x10] sm:$0xff] %v297_v2  ;;  %v301_v4 = vld [vmem:[%s250_s17 + $0x40] sm:$0xff]  ;;  %v303_v5 = vld [vmem:[%s250_s17 + $0x50] sm:$0xff]  ;;  %300 = vst [vmem:[%s245_s27 + $0x18] sm:$0xff] %v299_v3 }
  0x4a   : > { %302 = vst [vmem:[%s245_s27 + $0x20] sm:$0xff] %v301_v4  ;;  %304 = vst [vmem:[%s245_s27 + $0x28] sm:$0xff] %v303_v5  ;;  %v305_v6 = vld [vmem:[%s250_s17 + $0x60] sm:$0xff]  ;;  %v307_v7 = vld [vmem:[%s250_s17 + $0x70] sm:$0xff] }
  0x4b   : > { %306 = vst [vmem:[%s245_s27 + $0x30] sm:$0xff] %v305_v6  ;;  %308 = vst [vmem:[%s245_s27 + $0x38] sm:$0xff] %v307_v7 }
  0x4c PF: > { %317 = sbr.rel (%p4434_p2) target bundleno = 2300 (0x8fc), region = 74 }
  0x51   : > { %s4471_s7 = sand.u32 1, %s4276_s19   ;;  %p6348_p3 = scmp.ne.s32.totalorder %s6341_s9, 0 }
  0x52   : > { %s3197_s13 = sshll.u32 %s4471_s7, 8  ;;  %s320_s12 = scalar_lea.sflag [#allocation5], %s4471_s7 }
  0x53   : > { %s4475_s30 = scalar_lea.vmem [#allocation4], %s3197_s13 }
  0x54   : > { %4259 = dma.done.wait (%p6348_p3), %s320_s12, 4096  }
  0x55   : > { %4261 = vsyncadd (%p6348_p3), %s320_s12, 4294963200  ;;  %s3198_s6 = sshll.u32 %s4471_s7, 6 }
  0x56   : > { %s4482_s15 = scalar_lea.vmem [#allocation7], %s3198_s6 }
  0x57   : > { %4263 = dma.done.wait (%p4407_p6), [#allocation9], 8192  }
  0x58   : > { %4265 = vsyncadd (%p4407_p6), [#allocation9], 4294959104  ;;  %s4488_s11 = scalar_lea.vmem [#allocation10], %s3198_s6  ;;  %p3201_p2 = scmp.ne.s32.totalorder %s4284_s21, 0 }
  0x5a   : > { %371 = sbr.rel (%p3201_p2) target bundleno = 97 (0x61), region = 90 }
  0x5f   : > { %v4309_v8 = vmov 0.0  }
  0x60   : > { %372 = vst [vmem:[#allocation2] sm:$0xff] %v4309_v8  ;;  %373 = vst [vmem:[#allocation3] sm:$0xff] %v4309_v8 }
  0x61 PF: > { %v4491_v9 = vld [vmem:[#allocation8 + $0x1e8] sm:$0xff]  ;;  %v4498_v11 = vld [vmem:[#allocation8 + $0x1e0] sm:$0xff]  ;;  %v6256_v12 = vmov 0.0   ;;  %v4520_v17 = vld [vmem:[%s6200_s3 + $0x68] sm:$0xff]  ;;  %vm4311_vm0 = vmmov 0   ;;  %v6212_v2 = vmov 0  }
  0x62   : > { %v4496_v10 = vld [vmem:[%s6200_s3 + $0x78] sm:$0xff]  ;;  %3447 = vmatprep.subr.mxu0 %v6256_v12  ;;  %547 = vmatprep.subr.mxu1 %v4491_v9  ;;  %v4507_v14 = vld [vmem:[%s6200_s3 + $0x70] sm:$0xff]  ;;  %6351 = vst [vmem:[#allocation23_spill] sm:$0xff] %v4520_v17  ;;  %v4533_v20 = vld [vmem:[%s6200_s3 + $0x60] sm:$0xff]  ;;  %s3048_s2 = scalar_lea.sflag [#allocation6], %s4471_s7  ;;  %p6539_p10 = scmp.ne.s32.totalorder %s6342_s10, 0 }
  0x63   : > { %6349 = vst [vmem:[#allocation21_spill] sm:$0xff] %v4496_v10  ;;  %v4502_v13 = vld [vmem:[#allocation8 + $0x1c8] sm:$0xff]  ;;  %6350 = vst [vmem:[#allocation22_spill] sm:$0xff] %v4507_v14  ;;  %v4509_v15 = vld [vmem:[#allocation8 + $0x1c0] sm:$0xff]  ;;  %3448 = vmatpush3.msra.mxu0 %v4496_v10  ;;  %548 = vmatpush1.msra.mxu1 %v4498_v11  ;;  %s4314_s16 = smov [#allocation10]  }
  0x64   : > { %v4513_v16 = vld [vmem:[#allocation8 + $0x1a8] sm:$0xff]  ;;  %3449 = vmatprep.subr.mxu0 %v6256_v12  ;;  %549 = vmatprep.subr.mxu1 %v4502_v13  ;;  %v4522_v18 = vld [vmem:[#allocation8 + $0x1a0] sm:$0xff]  ;;  %6352 = vst [vmem:[#allocation24_spill] sm:$0xff] %v4533_v20  ;;  %v4572_v29 = vld [vmem:[%s6200_s3 + $0x48] sm:$0xff]  ;;  %s4204_s20 = sshll.u32 %s4314_s16, 4  ;;  %s4205_s20 = int_to_ptr.vmem [resolvable:$false] %s4204_s20 }
  0x65   : > { %3450 = vmatpush3.msra.mxu0 %v4507_v14  ;;  %550 = vmatpush1.msra.mxu1 %v4509_v15  ;;  %v4526_v19 = vld [vmem:[#allocation8 + $0x188] sm:$0xff]  ;;  %v4535_v21 = vld [vmem:[#allocation8 + $0x180] sm:$0xff]  ;;  %6355 = vst [vmem:[#allocation27_spill] sm:$0xff] %v4572_v29  ;;  %v4585_v32 = vld [vmem:[%s6200_s3 + $0x40] sm:$0xff]  ;;  %s4206_s25 = scalar_lea.vmem %s4205_s20, 2048 }
  0x66   : > { %3451 = vmatprep.subr.mxu0 %v6256_v12  ;;  %551 = vmatprep.subr.mxu1 %v4513_v16  ;;  %v4539_v22 = vld [vmem:[#allocation8 + $0x168] sm:$0xff]  ;;  %v4548_v24 = vld [vmem:[#allocation8 + $0x160] sm:$0xff]  ;;  %6356 = vst [vmem:[#allocation28_spill] sm:$0xff] %v4585_v32  ;;  %v4624_v41 = vld [vmem:[%s6200_s3 + $0x28] sm:$0xff] }
  0x67   : > { %3452 = vmatpush3.msra.mxu0 %v4520_v17  ;;  %552 = vmatpush1.msra.mxu1 %v4522_v18  ;;  %v4546_v23 = vld [vmem:[%s6200_s3 + $0x58] sm:$0xff]  ;;  %v4559_v26 = vld [vmem:[%s6200_s3 + $0x50] sm:$0xff]  ;;  %v4637_v44 = vld [vmem:[%s6200_s3 + $0x20] sm:$0xff] }
  0x68   : > { %3453 = vmatprep.subr.mxu0 %v6256_v12  ;;  %553 = vmatprep.subr.mxu1 %v4526_v19  ;;  %6353 = vst [vmem:[#allocation25_spill] sm:$0xff] %v4546_v23  ;;  %v4552_v25 = vld [vmem:[#allocation8 + $0x148] sm:$0xff]  ;;  %6354 = vst [vmem:[#allocation26_spill] sm:$0xff] %v4559_v26  ;;  %v4561_v27 = vld [vmem:[#allocation8 + $0x140] sm:$0xff] }
  0x69   : > { %3454 = vmatpush3.msra.mxu0 %v4533_v20  ;;  %554 = vmatpush1.msra.mxu1 %v4535_v21  ;;  %v4565_v28 = vld [vmem:[#allocation8 + $0x128] sm:$0xff]  ;;  %v4574_v30 = vld [vmem:[#allocation8 + $0x120] sm:$0xff]  ;;  %v4676_v53 = vld [vmem:[%s6200_s3 + $0x8] sm:$0xff] }
  0x6a   : > { %3455 = vmatprep.subr.mxu0 %v6256_v12  ;;  %555 = vmatprep.subr.mxu1 %v4539_v22  ;;  %v4578_v31 = vld [vmem:[#allocation8 + $0x108] sm:$0xff]  ;;  %v4587_v33 = vld [vmem:[#allocation8 + $0x100] sm:$0xff]  ;;  %v4689_v56 = vld [vmem:[%s6200_s3] sm:$0xff] }
  0x6b   : > { %3456 = vmatpush3.msra.mxu0 %v4546_v23  ;;  %556 = vmatpush1.msra.mxu1 %v4548_v24  ;;  %v4591_v34 = vld [vmem:[#allocation8 + $0xe8] sm:$0xff]  ;;  %v4600_v36 = vld [vmem:[#allocation8 + $0xe0] sm:$0xff]  ;;  %v4697_v58 = vld [vmem:[#allocation3] sm:$0xff] }
  0x6c   : > { %3457 = vmatprep.subr.mxu0 %v6256_v12  ;;  %557 = vmatprep.subr.mxu1 %v4552_v25  ;;  %6357 = vst [vmem:[#allocation29_spill] sm:$0xff] %v4591_v34  ;;  %v4598_v35 = vld [vmem:[%s6200_s3 + $0x38] sm:$0xff]  ;;  %6359 = vst [vmem:[#allocation31_spill] sm:$0xff] %v4600_v36  ;;  %v4611_v38 = vld [vmem:[%s6200_s3 + $0x30] sm:$0xff] }
  0x6d   : > { %3458 = vmatpush3.msra.mxu0 %v4559_v26  ;;  %558 = vmatpush1.msra.mxu1 %v4561_v27  ;;  %6358 = vst [vmem:[#allocation30_spill] sm:$0xff] %v4598_v35  ;;  %v4604_v37 = vld [vmem:[#allocation8 + $0xc8] sm:$0xff]  ;;  %v4613_v39 = vld [vmem:[#allocation8 + $0xc0] sm:$0xff]  ;;  %v4699_v59 = vld [vmem:[#allocation2] sm:$0xff] }
  0x6e   : > { %3459 = vmatprep.subr.mxu0 %v6256_v12  ;;  %559 = vmatprep.subr.mxu1 %v4565_v28  ;;  %6360 = vst [vmem:[#allocation32_spill] sm:$0xff] %v4604_v37  ;;  %6361 = vst [vmem:[#allocation33_spill] sm:$0xff] %v4613_v39  ;;  %v4617_v40 = vld [vmem:[#allocation8 + $0xa8] sm:$0xff]  ;;  %v4626_v42 = vld [vmem:[#allocation8 + $0xa0] sm:$0xff] }
  0x6f   : > { %3460 = vmatpush3.msra.mxu0 %v4572_v29  ;;  %560 = vmatpush1.msra.mxu1 %v4574_v30  ;;  %6362 = vst [vmem:[#allocation34_spill] sm:$0xff] %v4617_v40  ;;  %6363 = vst [vmem:[#allocation35_spill] sm:$0xff] %v4626_v42  ;;  %v4630_v43 = vld [vmem:[#allocation8 + $0x88] sm:$0xff]  ;;  %v4639_v45 = vld [vmem:[#allocation8 + $0x80] sm:$0xff] }
  0x70   : > { %3461 = vmatprep.subr.mxu0 %v6256_v12  ;;  %561 = vmatprep.subr.mxu1 %v4578_v31  ;;  %6364 = vst [vmem:[#allocation36_spill] sm:$0xff] %v4630_v43  ;;  %6365 = vst [vmem:[#allocation37_spill] sm:$0xff] %v4639_v45  ;;  %v4643_v46 = vld [vmem:[#allocation8 + $0x68] sm:$0xff]  ;;  %v4652_v48 = vld [vmem:[#allocation8 + $0x60] sm:$0xff] }
  0x71   : > { %3462 = vmatpush3.msra.mxu0 %v4585_v32  ;;  %562 = vmatpush1.msra.mxu1 %v4587_v33  ;;  %6366 = vst [vmem:[#allocation38_spill] sm:$0xff] %v4643_v46  ;;  %v4650_v47 = vld [vmem:[%s6200_s3 + $0x18] sm:$0xff]  ;;  %6367 = vst [vmem:[#allocation39_spill] sm:$0xff] %v4652_v48  ;;  %v4663_v50 = vld [vmem:[%s6200_s3 + $0x10] sm:$0xff] }
  0x72   : > { %3463 = vmatprep.subr.mxu0 %v6256_v12  ;;  %563 = vmatprep.subr.mxu1 %v4591_v34  ;;  %v4656_v49 = vld [vmem:[#allocation8 + $0x48] sm:$0xff]  ;;  %v4665_v51 = vld [vmem:[#allocation8 + $0x40] sm:$0xff]  ;;  %v4704_v60 = vld [vmem:[#allocation8 + $0x1f8] sm:$0xff] }
  0x73   : > { %3464 = vmatpush3.msra.mxu0 %v4598_v35  ;;  %564 = vmatpush1.msra.mxu1 %v4600_v36  ;;  %6368 = vst [vmem:[#allocation40_spill] sm:$0xff] %v4656_v49  ;;  %6369 = vst [vmem:[#allocation41_spill] sm:$0xff] %v4665_v51  ;;  %v4669_v52 = vld [vmem:[#allocation8 + $0x28] sm:$0xff]  ;;  %v4678_v54 = vld [vmem:[#allocation8 + $0x20] sm:$0xff] }
  0x74   : > { %3465 = vmatprep.subr.mxu0 %v6256_v12  ;;  %565 = vmatprep.subr.mxu1 %v4604_v37  ;;  %6370 = vst [vmem:[#allocation42_spill] sm:$0xff] %v4669_v52  ;;  %6371 = vst [vmem:[#allocation43_spill] sm:$0xff] %v4678_v54  ;;  %v4682_v55 = vld [vmem:[#allocation8 + $0x8] sm:$0xff]  ;;  %v4693_v57 = vld [vmem:[#allocation8] sm:$0xff] }
  0x75   : > { %3466 = vmatpush3.msra.mxu0 %v4611_v38  ;;  %566 = vmatpush1.msra.mxu1 %v4613_v39  ;;  %6372 = vst [vmem:[#allocation44_spill] sm:$0xff] %v4682_v55  ;;  %6373 = vst [vmem:[#allocation45_spill] sm:$0xff] %v4693_v57  ;;  %v4708_v61 = vld [vmem:[#allocation8 + $0x1f0] sm:$0xff]  ;;  %v4712_v62 = vld [vmem:[#allocation8 + $0x1d8] sm:$0xff] }
  0x76   : > { %3467 = vmatprep.subr.mxu0 %v6256_v12  ;;  %567 = vmatprep.subr.mxu1 %v4617_v40  ;;  %v534_v63 = vld [vmem:[%s4482_s15] sm:$0xff]  ;;  %v4716_v0 = vld [vmem:[#allocation8 + $0x1d0] sm:$0xff]  ;;  %v4720_v1 = vld [vmem:[#allocation8 + $0x1b8] sm:$0xff] }
  0x77   : > { %3468 = vmatpush3.msra.mxu0 %v4624_v41  ;;  %568 = vmatpush1.msra.mxu1 %v4626_v42  ;;  %v4724_v3 = vld [vmem:[#allocation8 + $0x1b0] sm:$0xff]  ;;  %v4727_v4 = vld [vmem:[#allocation8 + $0x198] sm:$0xff]  ;;  %v3211_v5 = vld [vmem:[%s4482_s15 + $0x8] sm:$0xff] }
  0x78   : > { %3469 = vmatprep.subr.mxu0 %v6256_v12  ;;  %569 = vmatprep.subr.mxu1 %v4630_v43  ;;  %6374 = vst [vmem:[#allocation46_spill] sm:$0xff] %v4727_v4  ;;  %v4732_v6 = vld [vmem:[#allocation8 + $0x190] sm:$0xff]  ;;  %v4736_v7 = vld [vmem:[#allocation8 + $0x178] sm:$0xff] }
  0x79   : > { %3470 = vmatpush3.msra.mxu0 %v4637_v44  ;;  %570 = vmatpush1.msra.mxu1 %v4639_v45  ;;  %6375 = vst [vmem:[#allocation47_spill] sm:$0xff] %v4732_v6  ;;  %6376 = vst [vmem:[#allocation48_spill] sm:$0xff] %v4736_v7  ;;  %v4740_v8 = vld [vmem:[#allocation8 + $0x170] sm:$0xff] }
  0x7a   : > { %3471 = vmatprep.subr.mxu0 %v6256_v12  ;;  %571 = vmatprep.subr.mxu1 %v4643_v46 }
  0x7b   : > { %3472 = vmatpush3.msra.mxu0 %v4650_v47  ;;  %572 = vmatpush1.msra.mxu1 %v4652_v48 }
  0x7c   : > { %3473 = vmatprep.subr.mxu0 %v6256_v12  ;;  %573 = vmatprep.subr.mxu1 %v4656_v49 }
  0x7d   : > { %3474 = vmatpush3.msra.mxu0 %v4663_v50  ;;  %574 = vmatpush1.msra.mxu1 %v4665_v51 }
  0x7e   : > { %3475 = vmatprep.subr.mxu0 %v6256_v12  ;;  %575 = vmatprep.subr.mxu1 %v4669_v52 }
  0x7f   : > { %3476 = vmatpush3.msra.mxu0 %v4676_v53  ;;  %576 = vmatpush1.msra.mxu1 %v4678_v54 }
  0x80   : > { %3477 = vmatprep.subr.mxu0 %v6256_v12  ;;  %577 = vmatprep.subr.mxu1 %v4682_v55 }
  0x81   : > { %3478 = vmatpush3.msra.mxu0 %v4689_v56  ;;  %3479 = vmatprep.mubr.msk.f32.mxu0 %vm4311_vm0, %v6256_v12 }
  0x82   : > { %578 = vmatpush1.msra.mxu1 %v4693_v57  ;;  %611 = vmatprep.mubr.f32.mxu1 %v6256_v12 }
  0x83   : > { %3480 = vmatmul.mubr.f32.vlgmr.msra.gmra.mxu0 %v4697_v58  ;;  %612 = vmatmul.mubr.f32.vlgmr.msra.gmra.mxu1 %v4699_v59 }
  0x84   : > { %618 = vmatprep.subr.mxu0 %v4704_v60  ;;  %682 = vmatprep.mubr.f32.mxu0 %v6256_v12 }
  0x85   : > { %619 = vmatpush1.msra.mxu0 %v4708_v61  ;;  %3824 = vset.pattern.permute.xlu0 %v6212_v2  ;;  %v3250_v2 = vld [vmem:[%s4482_s15 + $0x20] sm:$0xff] }
  0x86   : > { %620 = vmatprep.subr.mxu0 %v4712_v62  ;;  %538 = vperm.xlu0 %3824, %v534_v63   ;;  %v4743_v63 = vld [vmem:[#allocation8 + $0x158] sm:$0xff] }
  0x87   : > { %621 = vmatpush1.msra.mxu0 %v4716_v0  ;;  %3482 = vmatprep.subr.mxu1 %v6256_v12 }
  0x88   : > { %622 = vmatprep.subr.mxu0 %v4720_v1  ;;  %3483 = vmatpush3.msra.mxu1 %v4496_v10  ;;  %v4748_v10 = vld [vmem:[#allocation8 + $0x150] sm:$0xff] }
  0x89   : > { %623 = vmatpush1.msra.mxu0 %v4724_v3  ;;  %3484 = vmatprep.subr.mxu1 %v6256_v12  ;;  %6377 = vst [vmem:[#allocation49_spill] sm:$0xff] %v4748_v10 }
  0x8a   : > { %624 = vmatprep.subr.mxu0 %v4727_v4  ;;  %860 = vperm.xlu0 %3824, %v3211_v5   ;;  %v4752_v4 = vld [vmem:[#allocation8 + $0x138] sm:$0xff]  ;;  %v4756_v5 = vld [vmem:[#allocation8 + $0x130] sm:$0xff] }
  0x8b   : > { %625 = vmatpush1.msra.mxu0 %v4732_v6  ;;  %3485 = vmatpush3.msra.mxu1 %v4507_v14  ;;  %6378 = vst [vmem:[#allocation50_spill] sm:$0xff] %v4756_v5  ;;  %v4759_v14 = vld [vmem:[#allocation8 + $0x118] sm:$0xff]  ;;  %v4764_v6 = vld [vmem:[#allocation8 + $0x110] sm:$0xff] }
  0x8c   : > { %626 = vmatprep.subr.mxu0 %v4736_v7  ;;  %3486 = vmatprep.subr.mxu1 %v6256_v12  ;;  %v3276_v7 = vld [vmem:[%s4482_s15 + $0x30] sm:$0xff] }
  0x8d   : > { %627 = vmatpush1.msra.mxu0 %v4740_v8  ;;  %3487 = vmatpush3.msra.mxu1 %v4520_v17  ;;  %v4768_v17 = vld [vmem:[#allocation8 + $0xf8] sm:$0xff] }
  0x8e   : > { %628 = vmatprep.subr.mxu0 %v4743_v63  ;;  %1829 = vperm.xlu0 %3824, %v3250_v2   ;;  %6379 = vst [vmem:[#allocation51_spill] sm:$0xff] %v4768_v17  ;;  %v4772_v2 = vld [vmem:[#allocation8 + $0xf0] sm:$0xff] }
  0x8f   : > { %629 = vmatpush1.msra.mxu0 %v4748_v10  ;;  %3488 = vmatprep.subr.mxu1 %v6256_v12  ;;  %6380 = vst [vmem:[#allocation52_spill] sm:$0xff] %v4772_v2  ;;  %v4775_v10 = vld [vmem:[#allocation8 + $0xd8] sm:$0xff] }
  0x90   : > { %630 = vmatprep.subr.mxu0 %v4752_v4  ;;  %3489 = vmatpush3.msra.mxu1 %v4533_v20  ;;  %6381 = vst [vmem:[#allocation53_spill] sm:$0xff] %v4775_v10  ;;  %v4779_v20 = vld [vmem:[#allocation8 + $0xd0] sm:$0xff] }
  0x91   : > { %631 = vmatpush1.msra.mxu0 %v4756_v5  ;;  %3490 = vmatprep.subr.mxu1 %v6256_v12  ;;  %6382 = vst [vmem:[#allocation54_spill] sm:$0xff] %v4779_v20  ;;  %v4783_v5 = vld [vmem:[#allocation8 + $0xb8] sm:$0xff] }
  0x92   : > { %632 = vmatprep.subr.mxu0 %v4759_v14  ;;  %2475 = vperm.xlu0 %3824, %v3276_v7   ;;  %6383 = vst [vmem:[#allocation55_spill] sm:$0xff] %v4783_v5  ;;  %v4787_v7 = vld [vmem:[#allocation8 + $0xb0] sm:$0xff] }
  0x93   : > { %633 = vmatpush1.msra.mxu0 %v4764_v6  ;;  %3491 = vmatpush3.msra.mxu1 %v4546_v23  ;;  %6384 = vst [vmem:[#allocation56_spill] sm:$0xff] %v4787_v7  ;;  %v4791_v23 = vld [vmem:[#allocation8 + $0x98] sm:$0xff] }
  0x94   : > { %634 = vmatprep.subr.mxu0 %v4768_v17  ;;  %3492 = vmatprep.subr.mxu1 %v6256_v12  ;;  %6385 = vst [vmem:[#allocation57_spill] sm:$0xff] %v4791_v23  ;;  %v4795_v17 = vld [vmem:[#allocation8 + $0x90] sm:$0xff] }
  0x95   : > { %635 = vmatpush1.msra.mxu0 %v4772_v2  ;;  %3493 = vmatpush3.msra.mxu1 %v4559_v26  ;;  %v4799_v26 = vld [vmem:[#allocation8 + $0x78] sm:$0xff] }
  0x96   : > { %636 = vmatprep.subr.mxu0 %v4775_v10  ;;  %3494 = vmatprep.subr.mxu1 %v6256_v12  ;;  %6386 = vst [vmem:[#allocation58_spill] sm:$0xff] %v4799_v26  ;;  %v4803_v10 = vld [vmem:[#allocation8 + $0x70] sm:$0xff] }
  0x97   : > { %637 = vmatpush1.msra.mxu0 %v4779_v20  ;;  %3495 = vmatpush3.msra.mxu1 %v4572_v29  ;;  %v4807_v29 = vld [vmem:[#allocation8 + $0x58] sm:$0xff] }
  0x98   : > { %638 = vmatprep.subr.mxu0 %v4783_v5  ;;  %3496 = vmatprep.subr.mxu1 %v6256_v12  ;;  %v4811_v5 = vld [vmem:[#allocation8 + $0x50] sm:$0xff] }
  0x99   : > { %639 = vmatpush1.msra.mxu0 %v4787_v7  ;;  %3497 = vmatpush3.msra.mxu1 %v4585_v32  ;;  %v4815_v32 = vld [vmem:[#allocation8 + $0x38] sm:$0xff] }
  0x9a   : > { %640 = vmatprep.subr.mxu0 %v4791_v23  ;;  %3498 = vmatprep.subr.mxu1 %v6256_v12  ;;  %v4819_v23 = vld [vmem:[#allocation8 + $0x30] sm:$0xff] }
  0x9b   : > { %641 = vmatpush1.msra.mxu0 %v4795_v17  ;;  %3499 = vmatpush3.msra.mxu1 %v4598_v35  ;;  %v4823_v35 = vld [vmem:[#allocation8 + $0x18] sm:$0xff] }
  0x9c   : > { %642 = vmatprep.subr.mxu0 %v4799_v26  ;;  %3500 = vmatprep.subr.mxu1 %v6256_v12  ;;  %v4827_v26 = vld [vmem:[#allocation8 + $0x10] sm:$0xff] }
  0x9d   : > { %643 = vmatpush1.msra.mxu0 %v4803_v10  ;;  %3501 = vmatpush3.msra.mxu1 %v4611_v38 }
  0x9e   : > { %644 = vmatprep.subr.mxu0 %v4807_v29  ;;  %3502 = vmatprep.subr.mxu1 %v6256_v12 }
  0x9f   : > { %645 = vmatpush1.msra.mxu0 %v4811_v5  ;;  %3503 = vmatpush3.msra.mxu1 %v4624_v41 }
  0xa0   : > { %646 = vmatprep.subr.mxu0 %v4815_v32  ;;  %3504 = vmatprep.subr.mxu1 %v6256_v12 }
  0xa1   : > { %647 = vmatpush1.msra.mxu0 %v4819_v23  ;;  %3505 = vmatpush3.msra.mxu1 %v4637_v44 }
  0xa2   : > { %648 = vmatprep.subr.mxu0 %v4823_v35  ;;  %3506 = vmatprep.subr.mxu1 %v6256_v12 }
  0xa3   : > { %649 = vmatpush1.msra.mxu0 %v4827_v26  ;;  %3507 = vmatpush3.msra.mxu1 %v4650_v47 }
  0xa4   : > { %683 = vmatmul.mubr.f32.vlgmr.msra.gmra.mxu0 %v4699_v59  ;;  %870 = vmatprep.subr.mxu0 %v4491_v9  ;;  %v6387_v59 = vmov 0  }
  0xa5   : > { %871 = vmatpush1.msra.mxu0 %v4498_v11  ;;  %3508 = vmatprep.subr.mxu1 %v6256_v12 }
  0xa6   : > { %872 = vmatprep.subr.mxu0 %v4502_v13  ;;  %3509 = vmatpush3.msra.mxu1 %v4663_v50 }
  0xa7   : > { %873 = vmatpush1.msra.mxu0 %v4509_v15  ;;  %3510 = vmatprep.subr.mxu1 %v6256_v12 }
  0xa8   : > { %874 = vmatprep.subr.mxu0 %v4513_v16  ;;  %3511 = vmatpush3.msra.mxu1 %v4676_v53 }
  0xa9   : > { %875 = vmatpush1.msra.mxu0 %v4522_v18  ;;  %3512 = vmatprep.subr.mxu1 %v6256_v12 }
  0xaa   : > { %876 = vmatprep.subr.mxu0 %v4526_v19  ;;  %3513 = vmatpush3.msra.mxu1 %v4689_v56 }
  0xab   : > { %877 = vmatpush1.msra.mxu0 %v4535_v21  ;;  %3514 = vmatprep.mubr.msk.f32.mxu1 %vm4311_vm0, %v6256_v12 }
  0xac   : > { %878 = vmatprep.subr.mxu0 %v4539_v22  ;;  %941 = vmatprep.subr.mxu1 %v4704_v60 }
  0xad   : > { %879 = vmatpush1.msra.mxu0 %v4548_v24  ;;  %934 = vmatprep.mubr.f32.mxu0 %v6256_v12 }
  0xae   : > { %880 = vmatprep.subr.mxu0 %v4552_v25  ;;  %3825 = vset.pattern.permute.xlu1 %v6387_v59 }
  0xaf   : > { %881 = vmatpush1.msra.mxu0 %v4561_v27 }
  0xb0   : > { %882 = vmatprep.subr.mxu0 %v4565_v28 }
  0xb1   : > { %883 = vmatpush1.msra.mxu0 %v4574_v30 }
  0xb2   : > { %884 = vmatprep.subr.mxu0 %v4578_v31 }
  0xb3   : > { %885 = vmatpush1.msra.mxu0 %v4587_v33 }
  0xb4   : > { %886 = vmatprep.subr.mxu0 %v4591_v34 }
  0xb5   : > { %887 = vmatpush1.msra.mxu0 %v4600_v36 }
  0xb6   : > { %888 = vmatprep.subr.mxu0 %v4604_v37  ;;  %v546_v37 = vld [vmem:[%s4475_s30 + $0x18] sm:$0xff] }
  0xb7   : > { %889 = vmatpush1.msra.mxu0 %v4613_v39 }
  0xb8   : > { %890 = vmatprep.subr.mxu0 %v4617_v40 }
  0xb9   : > { %891 = vmatpush1.msra.mxu0 %v4626_v42 }
  0xba   : > { %892 = vmatprep.subr.mxu0 %v4630_v43  ;;  %v543_v43 = vld [vmem:[%s4475_s30] sm:$0xff] }
  0xbb   : > { %893 = vmatpush1.msra.mxu0 %v4639_v45 }
  0xbc   : > { %894 = vmatprep.subr.mxu0 %v4643_v46 }
  0xbd   : > { %895 = vmatpush1.msra.mxu0 %v4652_v48  ;;  %v544_v48 = vld [vmem:[%s4475_s30 + $0x8] sm:$0xff] }
  0xbe   : > { %896 = vmatprep.subr.mxu0 %v4656_v49 }
  0xbf   : > { %897 = vmatpush1.msra.mxu0 %v4665_v51 }
  0xc0   : > { %898 = vmatprep.subr.mxu0 %v4669_v52 }
  0xc1   : > { %899 = vmatpush1.msra.mxu0 %v4678_v54 }
  0xc2   : > { %900 = vmatprep.subr.mxu0 %v4682_v55 }
  0xc3   : > { %901 = vmatpush1.msra.mxu0 %v4693_v57 }
  0xc4   : > { %3517 = vmatprep.subr.mxu0 %v6256_v12  ;;  %v545_v12 = vld [vmem:[%s4475_s30 + $0x10] sm:$0xff] }
 0x143   : > { %v529_v59 = vpop.f32.mrf.mxu0  ;;  %v613_v46 = vpop.f32.mrf.mxu1 }
 0x144   : > { %v614_v42 = vadd.f32 %v613_v46, %v543_v43 }
 0x145   : > { %v3481_v45 = vpop.f32.mrf.mxu0  ;;  %v615_v49 = vpop.f32.mrf.mxu1 }
 0x146   : > { %v616_v51 = vadd.f32 %v615_v49, %v544_v48  ;;  %v3203_v40 = vmul.f32 -1.442695, %v614_v42  ;;  %v4887_v45 = vld [vmem:[%s6201_s4] ss:$0 sm:$0xff] }
 0x147   : > { %6388 = vst [vmem:[#allocation59_spill] sm:$0xff] %v4887_v45  ;;  %v530_v36 = vadd.f32 %v4887_v45, %v529_v59 }
 0x148   : > { %v3204_v52 = vmul.f32 -1.442695, %v616_v51  ;;  %3826 = vpow2.f32 %v3203_v40 }
 0x14a   : > { %3828 = vpow2.f32 %v3204_v52 }
 0x155   : > { %v3827_v46 = vpop.eup %3826 }
 0x156   : > { %v692_v49 = vadd.f32 1.0, %v3827_v46 }
 0x157   : > { %v3829_v42 = vpop.eup %3828 }
 0x158   : > { %v698_v40 = vadd.f32 1.0, %v3829_v42 }
 0x164   : > { %v684_v39 = vpop.f32.mrf.mxu0 }
 0x165   : > { %v685_v43 = vadd.f32 %v684_v39, %v545_v12 }
 0x166   : > { %v686_v55 = vpop.f32.mrf.mxu0 }
 0x167   : > { %v687_v54 = vadd.f32 %v686_v55, %v546_v37  ;;  %v3205_v48 = vmul.f32 -1.442695, %v685_v43 }
 0x169   : > { %v3206_v57 = vmul.f32 -1.442695, %v687_v54  ;;  %v539_v54 = vpop.permute.xlu0 %538 }
 0x16b   : > { %3830 = vpow2.f32 %v3206_v57 }
 0x16c   : > { %3832 = vtanh.f32 %v530_v36 }
 0x16d   : > { %3834 = vpow2.f32 %v3205_v48  ;;  %v6389_v48 = vmov 0.0  }
 0x16e   : > { %3836 = vrcp.f32 %v692_v49  ;;  %v6390_v49 = vld [vmem:[#allocation46_spill] sm:$0xff] }
 0x16f   : > { %3838 = vrcp.f32 %v698_v40  ;;  %v6391_v40 = vld [vmem:[#allocation47_spill] sm:$0xff] }
 0x178   : > { %v3831_v51 = vpop.eup %3830 }
 0x179   : > { %v710_v37 = vadd.f32 1.0, %v3831_v51  ;;  %v3833_v52 = vpop.eup %3832  ;;  %v6392_v51 = vld [vmem:[#allocation48_spill] sm:$0xff] }
 0x17a   : > { %v535_v55 = vsub.f32 %v4697_v58, %v3833_v52  ;;  %v541_v57 = vmul.f32 %v3833_v52, %v539_v54  ;;  %v3835_v34 = vpop.eup %3834  ;;  %v6393_v54 = vld [vmem:[#allocation49_spill] sm:$0xff] }
 0x17b   : > { %3840 = vrcp.f32 %v710_v37  ;;  %v3837_v59 = vpop.eup %3836  ;;  %v704_v36 = vadd.f32 1.0, %v3835_v34  ;;  %v4313_v34 = vmov 1966171168  }
 0x17c   : > { %v3839_v12 = vpop.eup %3838  ;;  %v542_v39 = vadd.f32 %v541_v57, %v535_v55  ;;  %v721_v58 = vunpack.c.l.s4 %v4313_v34  ;;  %v6396_v34 = vld [vmem:[#allocation21_spill] sm:$0xff] }
 0x17d   : > { %3842 = vrcp.f32 %v704_v36  ;;  %v6395_v36 = vld [vmem:[#allocation51_spill] sm:$0xff] }
 0x17e   : > { %v713_v43 = vmul.f32 %v3837_v59, %v542_v39  ;;  %v722_v37 = vunpack.c.0.s8 %v721_v58 }
 0x188   : > { %v3841_v45 = vpop.eup %3840 }
 0x189   : > { %v714_v46 = vmul.f32 %v3841_v45, %v3839_v12  ;;  %v723_v45 = vlaneseq  ;;  %v6394_v12 = vld [vmem:[#allocation50_spill] sm:$0xff] }
 0x18a   : > { %v3843_v55 = vpop.eup %3842 }
 0x18b   : > { %v4892_v42 = vadd.f32 %v714_v46, %v713_v43  ;;  %v724_v52 = vshrl.u32 %v723_v45, 7 }
 0x18d   : > { %3844 = vtanh.f32 %v4892_v42  ;;  %3515 = vmatmul.mubr.f32.vlgmr.msra.gmra.mxu1 %v4892_v42  ;;  %v4909_v57 = vsub.s32 %v722_v37, %v724_v52  ;;  %v6397_v52 = vld [vmem:[#allocation53_spill] sm:$0xff] }
 0x18e   : > { %942 = vmatpush1.msra.mxu1 %v4708_v61  ;;  %1005 = vmatprep.mubr.f32.mxu1 %v6389_v48 }
 0x18f   : > { %943 = vmatprep.subr.mxu1 %v4712_v62 }
 0x190   : > { %944 = vmatpush1.msra.mxu1 %v4716_v0 }
 0x191   : > { %945 = vmatprep.subr.mxu1 %v4720_v1 }
 0x192   : > { %946 = vmatpush1.msra.mxu1 %v4724_v3 }
 0x193   : > { %947 = vmatprep.subr.mxu1 %v6390_v49 }
 0x194   : > { %948 = vmatpush1.msra.mxu1 %v6391_v40 }
 0x195   : > { %949 = vmatprep.subr.mxu1 %v6392_v51 }
 0x196   : > { %950 = vmatpush1.msra.mxu1 %v4740_v8 }
 0x197   : > { %951 = vmatprep.subr.mxu1 %v4743_v63 }
 0x198   : > { %952 = vmatpush1.msra.mxu1 %v6393_v54 }
 0x199   : > { %953 = vmatprep.subr.mxu1 %v4752_v4 }
 0x19a   : > { %v3845_v59 = vpop.eup %3844  ;;  %954 = vmatpush1.msra.mxu1 %v6394_v12 }
 0x19b   : > { %955 = vmatprep.subr.mxu1 %v4759_v14  ;;  %v717_v39 = vmul.f32 %v3845_v59, %v3843_v55  ;;  %v6398_v55 = vld [vmem:[#allocation22_spill] sm:$0xff] }
 0x19c   : > { %956 = vmatpush1.msra.mxu1 %v4764_v6 }
 0x19d   : > { %957 = vmatprep.subr.mxu1 %v6395_v36  ;;  %v719_v43 = vcombine.high %v717_v39, %v717_v39  ;;  %v726_v46 = vrot.slane %v717_v39, %v4909_v57  ;;  %935 = vmatmul.mubr.f32.vlgmr.msra.gmra.mxu0 %v717_v39  ;;  %v6400_v36 = vld [vmem:[#allocation57_spill] sm:$0xff] }
 0x19e   : > { %958 = vmatpush1.msra.mxu1 %v4772_v2  ;;  %3518 = vmatpush3.msra.mxu0 %v6396_v34 }
 0x19f   : > { %v733_v58 = vrot.slane %v719_v43, %v4909_v57  ;;  %v734_v45 = vcombine.high %v726_v46, %v726_v46  ;;  %v742_v37 = vrot.slane %v726_v46, %v4909_v57  ;;  %3207 = vst.sshfl [vmem:[%s4488_s11] sm:$0x1 pattern:$0x73625140] %v726_v46  ;;  %959 = vmatprep.subr.mxu1 %v6397_v52  ;;  %v6399_v46 = vld [vmem:[#allocation55_spill] sm:$0xff] }
 0x1a0   : > { %3519 = vmatprep.subr.mxu0 %v6389_v48  ;;  %960 = vmatpush1.msra.mxu1 %v4779_v20 }
 0x1a1   : > { %3520 = vmatpush3.msra.mxu0 %v6398_v55  ;;  %v735_v59 = vcombine.high %v733_v58, %v733_v58  ;;  %v749_v2 = vrot.slane %v733_v58, %v4909_v57  ;;  %v756_v34 = vrot.slane %v734_v45, %v4909_v57  ;;  %v764_v43 = vcombine.high %v742_v37, %v742_v37  ;;  %v6401_v37 = vld [vmem:[#allocation23_spill] sm:$0xff] }
 0x1a2   : > { %3208 = vst.sshfl [vmem:[%s4488_s11 + $0x8] sm:$0x1 pattern:$0x73625140] %v734_v45  ;;  %961 = vmatprep.subr.mxu1 %v6399_v46  ;;  %3521 = vmatprep.subr.mxu0 %v6389_v48  ;;  %v6402_v45 = vld [vmem:[#allocation58_spill] sm:$0xff] }
 0x1a3   : > { %3209 = vst.sshfl [vmem:[%s4488_s11 + $0x20] sm:$0x1 pattern:$0x73625140] %v733_v58  ;;  %962 = vmatpush1.msra.mxu1 %v4787_v7  ;;  %v763_v20 = vrot.slane %v735_v59, %v4909_v57  ;;  %v765_v55 = vcombine.high %v749_v2, %v749_v2  ;;  %v766_v52 = vcombine.high %v756_v34, %v756_v34  ;;  %778 = vst [vmem:[%s4488_s11 + $0x10] sm:$0x1] %v764_v43 }
 0x1a4   : > { %3210 = vst.sshfl [vmem:[%s4488_s11 + $0x28] sm:$0x1 pattern:$0x73625140] %v735_v59  ;;  %963 = vmatprep.subr.mxu1 %v6400_v36  ;;  %3522 = vmatpush3.msra.mxu0 %v6401_v37  ;;  %v6403_v7 = vld [vmem:[#allocation24_spill] sm:$0xff]  ;;  %v6404_v2 = vld [vmem:[#allocation25_spill] sm:$0xff] }
 0x1a5   : > { %964 = vmatpush1.msra.mxu1 %v4795_v17  ;;  %3523 = vmatprep.subr.mxu0 %v6389_v48  ;;  %v767_v58 = vcombine.high %v763_v20, %v763_v20  ;;  %779 = vst [vmem:[%s4488_s11 + $0x18] sm:$0x1] %v766_v52  ;;  %782 = vst [vmem:[%s4488_s11 + $0x30] sm:$0x1] %v765_v55  ;;  %v6405_v20 = vld [vmem:[#allocation26_spill] sm:$0xff]  ;;  %v6407_v52 = vld [vmem:[#allocation28_spill] sm:$0xff] }
 0x1a6   : > { %965 = vmatprep.subr.mxu1 %v6402_v45  ;;  %3524 = vmatpush3.msra.mxu0 %v6403_v7  ;;  %v6406_v7 = vld [vmem:[#allocation27_spill] sm:$0xff]  ;;  %v6408_v59 = vld [vmem:[#allocation30_spill] sm:$0xff]  ;;  %v3212_v37 = vld [vmem:[%s4475_s30 + $0x20] sm:$0xff] }
 0x1a7   : > { %966 = vmatpush1.msra.mxu1 %v4803_v10  ;;  %3525 = vmatprep.subr.mxu0 %v6389_v48  ;;  %783 = vst [vmem:[%s4488_s11 + $0x38] sm:$0x1] %v767_v58  ;;  %v3213_v58 = vld [vmem:[%s4475_s30 + $0x28] sm:$0xff] }
 0x1a8   : > { %967 = vmatprep.subr.mxu1 %v4807_v29  ;;  %3526 = vmatpush3.msra.mxu0 %v6404_v2 }
 0x1a9   : > { %968 = vmatpush1.msra.mxu1 %v4811_v5  ;;  %3527 = vmatprep.subr.mxu0 %v6389_v48 }
 0x1aa   : > { %969 = vmatprep.subr.mxu1 %v4815_v32  ;;  %3528 = vmatpush3.msra.mxu0 %v6405_v20 }
 0x1ab   : > { %970 = vmatpush1.msra.mxu1 %v4819_v23  ;;  %3529 = vmatprep.subr.mxu0 %v6389_v48 }
 0x1ac   : > { %971 = vmatprep.subr.mxu1 %v4823_v35  ;;  %3530 = vmatpush3.msra.mxu0 %v6406_v7 }
 0x1ad   : > { %972 = vmatpush1.msra.mxu1 %v4827_v26  ;;  %3531 = vmatprep.subr.mxu0 %v6389_v48 }
 0x1ae   : > { %1006 = vmatmul.mubr.f32.vlgmr.msra.gmra.mxu1 %v717_v39  ;;  %3532 = vmatpush3.msra.mxu0 %v6407_v52  ;;  %v3289_v39 = vld [vmem:[%s4482_s15 + $0x38] sm:$0xff] }
 0x1af   : > { %3533 = vmatprep.subr.mxu0 %v6389_v48  ;;  %1193 = vmatprep.subr.mxu1 %v4491_v9  ;;  %v6409_v9 = vld [vmem:[#allocation29_spill] sm:$0xff] }
 0x1b0   : > { %3534 = vmatpush3.msra.mxu0 %v6408_v59  ;;  %1194 = vmatpush1.msra.mxu1 %v4498_v11  ;;  %v6410_v11 = vld [vmem:[#allocation31_spill] sm:$0xff] }
 0x1b1   : > { %3535 = vmatprep.subr.mxu0 %v6389_v48  ;;  %1195 = vmatprep.subr.mxu1 %v4502_v13  ;;  %v6411_v13 = vld [vmem:[#allocation32_spill] sm:$0xff] }
 0x1b2   : > { %3536 = vmatpush3.msra.mxu0 %v4611_v38  ;;  %1196 = vmatpush1.msra.mxu1 %v4509_v15  ;;  %v6412_v15 = vld [vmem:[#allocation33_spill] sm:$0xff]  ;;  %v3224_v38 = vld [vmem:[%s4482_s15 + $0x10] sm:$0xff] }
 0x1b3   : > { %3537 = vmatprep.subr.mxu0 %v6389_v48  ;;  %1197 = vmatprep.subr.mxu1 %v4513_v16  ;;  %v6413_v16 = vld [vmem:[#allocation34_spill] sm:$0xff] }
 0x1b4   : > { %3538 = vmatpush3.msra.mxu0 %v4624_v41  ;;  %1198 = vmatpush1.msra.mxu1 %v4522_v18  ;;  %v6414_v18 = vld [vmem:[#allocation35_spill] sm:$0xff]  ;;  %v3237_v41 = vld [vmem:[%s4482_s15 + $0x18] sm:$0xff] }
 0x1b5   : > { %3539 = vmatprep.subr.mxu0 %v6389_v48  ;;  %1199 = vmatprep.subr.mxu1 %v4526_v19  ;;  %v6415_v19 = vld [vmem:[#allocation36_spill] sm:$0xff] }
 0x1b6   : > { %3540 = vmatpush3.msra.mxu0 %v4637_v44  ;;  %1200 = vmatpush1.msra.mxu1 %v4535_v21  ;;  %v6416_v21 = vld [vmem:[#allocation37_spill] sm:$0xff]  ;;  %v3263_v44 = vld [vmem:[%s4482_s15 + $0x28] sm:$0xff] }
 0x1b7   : > { %3541 = vmatprep.subr.mxu0 %v6389_v48  ;;  %1201 = vmatprep.subr.mxu1 %v4539_v22  ;;  %v6417_v22 = vld [vmem:[#allocation38_spill] sm:$0xff] }
 0x1b8   : > { %3542 = vmatpush3.msra.mxu0 %v4650_v47  ;;  %1202 = vmatpush1.msra.mxu1 %v4548_v24  ;;  %v6418_v24 = vld [vmem:[#allocation39_spill] sm:$0xff] }
 0x1b9   : > { %3543 = vmatprep.subr.mxu0 %v6389_v48  ;;  %1203 = vmatprep.subr.mxu1 %v4552_v25  ;;  %v6419_v25 = vld [vmem:[#allocation40_spill] sm:$0xff] }
 0x1ba   : > { %3544 = vmatpush3.msra.mxu0 %v4663_v50  ;;  %1204 = vmatpush1.msra.mxu1 %v4561_v27  ;;  %v6420_v27 = vld [vmem:[#allocation41_spill] sm:$0xff] }
 0x1bb   : > { %3545 = vmatprep.subr.mxu0 %v6389_v48  ;;  %1205 = vmatprep.subr.mxu1 %v4565_v28  ;;  %v6421_v28 = vld [vmem:[#allocation42_spill] sm:$0xff] }
 0x1bc   : > { %3546 = vmatpush3.msra.mxu0 %v4676_v53  ;;  %1206 = vmatpush1.msra.mxu1 %v4574_v30  ;;  %v6422_v30 = vld [vmem:[#allocation43_spill] sm:$0xff] }
 0x1bd   : > { %3547 = vmatprep.subr.mxu0 %v6389_v48  ;;  %1207 = vmatprep.subr.mxu1 %v4578_v31  ;;  %v6423_v31 = vld [vmem:[#allocation44_spill] sm:$0xff] }
 0x1be   : > { %3548 = vmatpush3.msra.mxu0 %v4689_v56  ;;  %3549 = vmatprep.mubr.msk.f32.mxu0 %vm4311_vm0, %v6389_v48 }
 0x1bf   : > { %1208 = vmatpush1.msra.mxu1 %v4587_v33  ;;  %1264 = vmatprep.subr.mxu0 %v4704_v60  ;;  %v6424_v33 = vld [vmem:[#allocation45_spill] sm:$0xff] }
 0x1c0   : > { %1209 = vmatprep.subr.mxu1 %v6409_v9  ;;  %1257 = vmatprep.mubr.f32.mxu1 %v6389_v48 }
 0x1c1   : > { %1210 = vmatpush1.msra.mxu1 %v6410_v11  ;;  %1183 = vperm.xlu1 %3825, %v3224_v38   ;;  %v3215_v11 = vld [vmem:[%s4475_s30 + $0x38] sm:$0xff] }
 0x1c2   : > { %1211 = vmatprep.subr.mxu1 %v6411_v13 }
 0x1c3   : > { %1212 = vmatpush1.msra.mxu1 %v6412_v15 }
 0x1c4   : > { %1213 = vmatprep.subr.mxu1 %v6413_v16 }
 0x1c5   : > { %1214 = vmatpush1.msra.mxu1 %v6414_v18  ;;  %1506 = vperm.xlu1 %3825, %v3237_v41   ;;  %v3214_v18 = vld [vmem:[%s4475_s30 + $0x30] sm:$0xff]  ;;  %v861_v41 = vpop.permute.xlu0 %860 }
 0x1c6   : > { %1215 = vmatprep.subr.mxu1 %v6415_v19  ;;  %v6425_v19 = vld [vmem:[#allocation59_spill] sm:$0xff] }
 0x1c7   : > { %1216 = vmatpush1.msra.mxu1 %v6416_v21 }
 0x1c8   : > { %1217 = vmatprep.subr.mxu1 %v6417_v22 }
 0x1c9   : > { %1218 = vmatpush1.msra.mxu1 %v6418_v24  ;;  %2152 = vperm.xlu1 %3825, %v3263_v44  }
 0x1ca   : > { %1219 = vmatprep.subr.mxu1 %v6419_v25 }
 0x1cb   : > { %1220 = vmatpush1.msra.mxu1 %v6420_v27 }
 0x1cc   : > { %1221 = vmatprep.subr.mxu1 %v6421_v28 }
 0x1cd   : > { %1222 = vmatpush1.msra.mxu1 %v6422_v30  ;;  %2798 = vperm.xlu1 %3825, %v3289_v39  }
 0x1ce   : > { %1223 = vmatprep.subr.mxu1 %v6423_v31 }
 0x1cf   : > { %1224 = vmatpush1.msra.mxu1 %v6424_v33 }
 0x1d0   : > { %3552 = vmatprep.subr.mxu1 %v6389_v48 }
 0x24d   : > { %v850_v34 = vpop.f32.mrf.mxu1 }
 0x24e   : > { %v851_v21 = vadd.f32 %v6425_v19, %v850_v34 }
 0x24f   : > { %v3516_v43 = vpop.f32.mrf.mxu1 }
 0x25d   : > { %v936_v55 = vpop.f32.mrf.mxu0 }
 0x25e   : > { %v937_v20 = vadd.f32 %v3212_v37, %v936_v55 }
 0x25f   : > { %v938_v2 = vpop.f32.mrf.mxu0 }
 0x260   : > { %v939_v7 = vadd.f32 %v3213_v58, %v938_v2  ;;  %v3216_v52 = vmul.f32 -1.442695, %v937_v20 }
 0x262   : > { %v3217_v59 = vmul.f32 -1.442695, %v939_v7  ;;  %3846 = vpow2.f32 %v3216_v52 }
 0x264   : > { %3848 = vpow2.f32 %v3217_v59 }
 0x26e   : > { %v1007_v9 = vpop.f32.mrf.mxu1 }
 0x26f   : > { %v1008_v22 = vadd.f32 %v3214_v18, %v1007_v9  ;;  %v3847_v24 = vpop.eup %3846  ;;  %v5077_v18 = vld [vmem:[%s6200_s3 + $0x68] sm:$0xff] }
 0x270   : > { %v1009_v13 = vpop.f32.mrf.mxu1  ;;  %v1015_v28 = vadd.f32 1.0, %v3847_v24  ;;  %v5160_v24 = vld [vmem:[%s6200_s3 + $0x28] sm:$0xff] }
 0x271   : > { %v1010_v15 = vadd.f32 %v3215_v11, %v1009_v13  ;;  %v3849_v25 = vpop.eup %3848  ;;  %v3218_v27 = vmul.f32 -1.442695, %v1008_v22  ;;  %v6432_v11 = vld [vmem:[#allocation56_spill] sm:$0xff]  ;;  %v5154_v22 = vld [vmem:[#allocation8 + $0x1a8] sm:$0xff] }
 0x272   : > { %v1021_v30 = vadd.f32 1.0, %v3849_v25  ;;  %v5163_v25 = vld [vmem:[#allocation8 + $0x1a0] sm:$0xff] }
 0x273   : > { %v3219_v16 = vmul.f32 -1.442695, %v1010_v15 }
 0x275   : > { %3850 = vpow2.f32 %v3219_v16 }
 0x276   : > { %3852 = vtanh.f32 %v851_v21  ;;  %v5150_v21 = vld [vmem:[#allocation8 + $0x1c0] sm:$0xff] }
 0x277   : > { %3854 = vpow2.f32 %v3218_v27  ;;  %v5167_v27 = vld [vmem:[#allocation8 + $0x188] sm:$0xff] }
 0x278   : > { %3856 = vrcp.f32 %v1015_v28  ;;  %v5173_v28 = vld [vmem:[%s6200_s3 + $0x20] sm:$0xff] }
 0x279   : > { %3858 = vrcp.f32 %v1021_v30  ;;  %v5176_v30 = vld [vmem:[#allocation8 + $0x180] sm:$0xff] }
 0x27a   : > { %6433 = vst [vmem:[#allocation48_spill] sm:$0xff] %v5176_v30 }
 0x282   : > { %v3851_v31 = vpop.eup %3850 }
 0x283   : > { %v1033_v33 = vadd.f32 1.0, %v3851_v31  ;;  %v3853_v38 = vpop.eup %3852  ;;  %v5180_v31 = vld [vmem:[#allocation8 + $0x168] sm:$0xff] }
 0x284   : > { %v857_v44 = vsub.f32 %v4892_v42, %v3853_v38  ;;  %v863_v39 = vmul.f32 %v3853_v38, %v861_v41  ;;  %v3855_v43 = vpop.eup %3854  ;;  %v5188_v38 = vld [vmem:[#allocation8 + $0x148] sm:$0xff]  ;;  %v5192_v41 = vld [vmem:[#allocation8 + $0x140] sm:$0xff] }
 0x285   : > { %3860 = vrcp.f32 %v1033_v33  ;;  %v3857_v34 = vpop.eup %3856  ;;  %v1027_v2 = vadd.f32 1.0, %v3855_v43  ;;  %v5184_v33 = vld [vmem:[#allocation8 + $0x160] sm:$0xff]  ;;  %6435 = vst [vmem:[#allocation50_spill] sm:$0xff] %v5192_v41 }
 0x286   : > { %v3859_v55 = vpop.eup %3858  ;;  %v864_v37 = vadd.f32 %v863_v39, %v857_v44  ;;  %6434 = vst [vmem:[#allocation49_spill] sm:$0xff] %v5184_v33  ;;  %v5196_v44 = vld [vmem:[#allocation8 + $0x128] sm:$0xff]  ;;  %v5218_v43 = vld [vmem:[#allocation8 + $0xe0] sm:$0xff] }
 0x287   : > { %3862 = vrcp.f32 %v1027_v2  ;;  %6436 = vst [vmem:[#allocation21_spill] sm:$0xff] %v5196_v44  ;;  %v5204_v39 = vld [vmem:[#allocation8 + $0x108] sm:$0xff]  ;;  %6441 = vst [vmem:[#allocation58_spill] sm:$0xff] %v5218_v43 }
 0x288   : > { %v1036_v20 = vmul.f32 %v3857_v34, %v864_v37  ;;  %6438 = vst [vmem:[#allocation55_spill] sm:$0xff] %v5204_v39  ;;  %v5224_v34 = vld [vmem:[#allocation8 + $0xc0] sm:$0xff]  ;;  %v5233_v37 = vld [vmem:[#allocation8 + $0x88] sm:$0xff] }
 0x289   : > { %6443 = vst [vmem:[#allocation25_spill] sm:$0xff] %v5224_v34  ;;  %6446 = vst [vmem:[#allocation28_spill] sm:$0xff] %v5233_v37  ;;  %v5239_v2 = vld [vmem:[#allocation8 + $0x68] sm:$0xff] }
 0x28a   : > { %6448 = vst [vmem:[#allocation29_spill] sm:$0xff] %v5239_v2 }
 0x292   : > { %v3861_v58 = vpop.eup %3860 }
 0x293   : > { %v1037_v7 = vmul.f32 %v3861_v58, %v3859_v55  ;;  %v5227_v55 = vld [vmem:[#allocation8 + $0xa8] sm:$0xff]  ;;  %v5236_v58 = vld [vmem:[#allocation8 + $0x80] sm:$0xff] }
 0x294   : > { %6444 = vst [vmem:[#allocation26_spill] sm:$0xff] %v5227_v55  ;;  %6447 = vst [vmem:[#allocation30_spill] sm:$0xff] %v5236_v58 }
 0x295   : > { %v5022_v52 = vadd.f32 %v1037_v7, %v1036_v20  ;;  %v5242_v20 = vld [vmem:[#allocation8 + $0x60] sm:$0xff]  ;;  %v5245_v7 = vld [vmem:[#allocation8 + $0x48] sm:$0xff] }
 0x296   : > { %6449 = vst [vmem:[#allocation31_spill] sm:$0xff] %v5242_v20  ;;  %6450 = vst [vmem:[#allocation32_spill] sm:$0xff] %v5245_v7 }
 0x297   : > { %3864 = vtanh.f32 %v5022_v52  ;;  %3550 = vmatmul.mubr.f32.vlgmr.msra.gmra.mxu0 %v5022_v52 }
 0x298   : > { %1265 = vmatpush1.msra.mxu0 %v4708_v61  ;;  %1328 = vmatprep.mubr.f32.mxu0 %v6389_v48  ;;  %v3863_v61 = vpop.eup %3862 }
 0x299   : > { %1266 = vmatprep.subr.mxu0 %v4712_v62 }
 0x29a   : > { %1267 = vmatpush1.msra.mxu0 %v4716_v0 }
 0x29b   : > { %1268 = vmatprep.subr.mxu0 %v4720_v1  ;;  %v6426_v1 = vld [vmem:[#allocation51_spill] sm:$0xff] }
 0x29c   : > { %1269 = vmatpush1.msra.mxu0 %v4724_v3 }
 0x29d   : > { %1270 = vmatprep.subr.mxu0 %v6390_v49  ;;  %v6429_v49 = vld [vmem:[#allocation53_spill] sm:$0xff] }
 0x29e   : > { %1271 = vmatpush1.msra.mxu0 %v6391_v40  ;;  %v6430_v40 = vld [vmem:[#allocation54_spill] sm:$0xff] }
 0x29f   : > { %1272 = vmatprep.subr.mxu0 %v6392_v51  ;;  %v5060_v51 = vld [vmem:[%s6200_s3 + $0x70] sm:$0xff] }
 0x2a0   : > { %1273 = vmatpush1.msra.mxu0 %v4740_v8  ;;  %6431 = vst [vmem:[#allocation47_spill] sm:$0xff] %v5060_v51 }
 0x2a1   : > { %1274 = vmatprep.subr.mxu0 %v4743_v63  ;;  %v6427_v63 = vld [vmem:[#allocation52_spill] sm:$0xff] }
 0x2a2   : > { %1275 = vmatpush1.msra.mxu0 %v6393_v54 }
 0x2a3   : > { %1276 = vmatprep.subr.mxu0 %v4752_v4  ;;  %v5048_v4 = vld [vmem:[%s6200_s3 + $0x78] sm:$0xff] }
 0x2a4   : > { %v3865_v62 = vpop.eup %3864  ;;  %1277 = vmatpush1.msra.mxu0 %v6394_v12  ;;  %6428 = vst [vmem:[#allocation46_spill] sm:$0xff] %v5048_v4 }
 0x2a5   : > { %1278 = vmatprep.subr.mxu0 %v4759_v14  ;;  %v1040_v0 = vmul.f32 %v3865_v62, %v3863_v61  ;;  %v5248_v61 = vld [vmem:[#allocation8 + $0x40] sm:$0xff]  ;;  %v5251_v62 = vld [vmem:[#allocation8 + $0x28] sm:$0xff] }
 0x2a6   : > { %1279 = vmatpush1.msra.mxu0 %v4764_v6  ;;  %6451 = vst [vmem:[#allocation33_spill] sm:$0xff] %v5248_v61  ;;  %6452 = vst [vmem:[#allocation34_spill] sm:$0xff] %v5251_v62 }
 0x2a7   : > { %1280 = vmatprep.subr.mxu0 %v6426_v1  ;;  %v1042_v3 = vcombine.high %v1040_v0, %v1040_v0  ;;  %v1049_v8 = vrot.slane %v1040_v0, %v4909_v57  ;;  %1258 = vmatmul.mubr.f32.vlgmr.msra.gmra.mxu1 %v1040_v0  ;;  %v5257_v1 = vld [vmem:[#allocation8 + $0x8] sm:$0xff] }
 0x2a8   : > { %1281 = vmatpush1.msra.mxu0 %v6427_v63  ;;  %3553 = vmatpush3.msra.mxu1 %v5048_v4  ;;  %6454 = vst [vmem:[#allocation36_spill] sm:$0xff] %v5257_v1 }
 0x2a9   : > { %v1056_v14 = vrot.slane %v1042_v3, %v4909_v57  ;;  %v1057_v6 = vcombine.high %v1049_v8, %v1049_v8  ;;  %v1065_v42 = vrot.slane %v1049_v8, %v4909_v57  ;;  %3220 = vst.sshfl [vmem:[%s4488_s11 + $0x1] sm:$0x1 pattern:$0x73625140] %v1049_v8  ;;  %1282 = vmatprep.subr.mxu0 %v6429_v49  ;;  %v5260_v3 = vld [vmem:[#allocation8] sm:$0xff] }
 0x2aa   : > { %3554 = vmatprep.subr.mxu1 %v6389_v48  ;;  %1283 = vmatpush1.msra.mxu0 %v6430_v40  ;;  %6455 = vst [vmem:[#allocation37_spill] sm:$0xff] %v5260_v3 }
 0x2ab   : > { %3555 = vmatpush3.msra.mxu1 %v5060_v51  ;;  %v1058_v54 = vcombine.high %v1056_v14, %v1056_v14  ;;  %v1072_v12 = vrot.slane %v1056_v14, %v4909_v57  ;;  %v1079_v59 = vrot.slane %v1057_v6, %v4909_v57  ;;  %v1087_v9 = vcombine.high %v1065_v42, %v1065_v42  ;;  %v3226_v42 = vld [vmem:[%s4475_s30 + $0x48] sm:$0xff] }
 0x2ac   : > { %3221 = vst.sshfl [vmem:[%s4488_s11 + $0x9] sm:$0x1 pattern:$0x73625140] %v1057_v6  ;;  %1284 = vmatprep.subr.mxu0 %v6399_v46  ;;  %3556 = vmatprep.subr.mxu1 %v6389_v48  ;;  %v3225_v6 = vld [vmem:[%s4475_s30 + $0x40] sm:$0xff] }
 0x2ad   : > { %3222 = vst.sshfl [vmem:[%s4488_s11 + $0x21] sm:$0x1 pattern:$0x73625140] %v1056_v14  ;;  %1285 = vmatpush1.msra.mxu0 %v6432_v11  ;;  %v1086_v13 = vrot.slane %v1058_v54, %v4909_v57  ;;  %v1088_v15 = vcombine.high %v1072_v12, %v1072_v12  ;;  %v1089_v16 = vcombine.high %v1079_v59, %v1079_v59  ;;  %1101 = vst [vmem:[%s4488_s11 + $0x11] sm:$0x1] %v1087_v9 }
 0x2ae   : > { %3223 = vst.sshfl [vmem:[%s4488_s11 + $0x29] sm:$0x1 pattern:$0x73625140] %v1058_v54  ;;  %1286 = vmatprep.subr.mxu0 %v6400_v36  ;;  %3557 = vmatpush3.msra.mxu1 %v5077_v18  ;;  %v5088_v36 = vld [vmem:[%s6200_s3 + $0x60] sm:$0xff]  ;;  %v3228_v11 = vld [vmem:[%s4475_s30 + $0x58] sm:$0xff] }
 0x2af   : > { %1287 = vmatpush1.msra.mxu0 %v4795_v17  ;;  %3558 = vmatprep.subr.mxu1 %v6389_v48  ;;  %v1090_v46 = vcombine.high %v1086_v13, %v1086_v13  ;;  %1102 = vst [vmem:[%s4488_s11 + $0x19] sm:$0x1] %v1089_v16  ;;  %1105 = vst [vmem:[%s4488_s11 + $0x31] sm:$0x1] %v1088_v15  ;;  %v5098_v17 = vld [vmem:[%s6200_s3 + $0x58] sm:$0xff] }
 0x2b0   : > { %1288 = vmatprep.subr.mxu0 %v6402_v45  ;;  %3559 = vmatpush3.msra.mxu1 %v5088_v36  ;;  %v5147_v45 = vld [vmem:[%s6200_s3 + $0x30] sm:$0xff] }
 0x2b1   : > { %1289 = vmatpush1.msra.mxu0 %v4803_v10  ;;  %3560 = vmatprep.subr.mxu1 %v6389_v48  ;;  %1106 = vst [vmem:[%s4488_s11 + $0x39] sm:$0x1] %v1090_v46  ;;  %v5107_v10 = vld [vmem:[%s6200_s3 + $0x50] sm:$0xff]  ;;  %v3227_v46 = vld [vmem:[%s4475_s30 + $0x50] sm:$0xff] }
 0x2b2   : > { %1290 = vmatprep.subr.mxu0 %v4807_v29  ;;  %3561 = vmatpush3.msra.mxu1 %v5098_v17  ;;  %v5116_v29 = vld [vmem:[%s6200_s3 + $0x48] sm:$0xff] }
 0x2b3   : > { %1291 = vmatpush1.msra.mxu0 %v4811_v5  ;;  %3562 = vmatprep.subr.mxu1 %v6389_v48  ;;  %v5141_v5 = vld [vmem:[#allocation8 + $0x1c8] sm:$0xff] }
 0x2b4   : > { %1292 = vmatprep.subr.mxu0 %v4815_v32  ;;  %3563 = vmatpush3.msra.mxu1 %v5107_v10  ;;  %v5128_v32 = vld [vmem:[#allocation8 + $0x1e8] sm:$0xff] }
 0x2b5   : > { %1293 = vmatpush1.msra.mxu0 %v4819_v23  ;;  %3564 = vmatprep.subr.mxu1 %v6389_v48  ;;  %v5124_v23 = vld [vmem:[%s6200_s3 + $0x40] sm:$0xff] }
 0x2b6   : > { %1294 = vmatprep.subr.mxu0 %v4823_v35  ;;  %3565 = vmatpush3.msra.mxu1 %v5116_v29  ;;  %v5137_v35 = vld [vmem:[#allocation8 + $0x1e0] sm:$0xff] }
 0x2b7   : > { %1295 = vmatpush1.msra.mxu0 %v4827_v26  ;;  %3566 = vmatprep.subr.mxu1 %v6389_v48  ;;  %v5134_v26 = vld [vmem:[%s6200_s3 + $0x38] sm:$0xff] }
 0x2b8   : > { %1329 = vmatmul.mubr.f32.vlgmr.msra.gmra.mxu0 %v1040_v0  ;;  %3567 = vmatpush3.msra.mxu1 %v5124_v23  ;;  %v5254_v0 = vld [vmem:[#allocation8 + $0x20] sm:$0xff] }
 0x2b9   : > { %3568 = vmatprep.subr.mxu1 %v6389_v48  ;;  %1516 = vmatprep.subr.mxu0 %v5128_v32  ;;  %6453 = vst [vmem:[#allocation35_spill] sm:$0xff] %v5254_v0 }
 0x2ba   : > { %3569 = vmatpush3.msra.mxu1 %v5134_v26  ;;  %1517 = vmatpush1.msra.mxu0 %v5137_v35 }
 0x2bb   : > { %3570 = vmatprep.subr.mxu1 %v6389_v48  ;;  %1518 = vmatprep.subr.mxu0 %v5141_v5 }
 0x2bc   : > { %3571 = vmatpush3.msra.mxu1 %v5147_v45  ;;  %1519 = vmatpush1.msra.mxu0 %v5150_v21 }
 0x2bd   : > { %3572 = vmatprep.subr.mxu1 %v6389_v48  ;;  %1520 = vmatprep.subr.mxu0 %v5154_v22 }
 0x2be   : > { %3573 = vmatpush3.msra.mxu1 %v5160_v24  ;;  %1521 = vmatpush1.msra.mxu0 %v5163_v25 }
 0x2bf   : > { %3574 = vmatprep.subr.mxu1 %v6389_v48  ;;  %1522 = vmatprep.subr.mxu0 %v5167_v27 }
 0x2c0   : > { %3575 = vmatpush3.msra.mxu1 %v5173_v28  ;;  %1523 = vmatpush1.msra.mxu0 %v5176_v30 }
 0x2c1   : > { %3576 = vmatprep.subr.mxu1 %v6389_v48  ;;  %1524 = vmatprep.subr.mxu0 %v5180_v31 }
 0x2c2   : > { %3577 = vmatpush3.msra.mxu1 %v4650_v47  ;;  %1525 = vmatpush1.msra.mxu0 %v5184_v33  ;;  %v5200_v47 = vld [vmem:[#allocation8 + $0x120] sm:$0xff] }
 0x2c3   : > { %3578 = vmatprep.subr.mxu1 %v6389_v48  ;;  %1526 = vmatprep.subr.mxu0 %v5188_v38  ;;  %6437 = vst [vmem:[#allocation22_spill] sm:$0xff] %v5200_v47 }
 0x2c4   : > { %3579 = vmatpush3.msra.mxu1 %v4663_v50  ;;  %1527 = vmatpush1.msra.mxu0 %v5192_v41  ;;  %v5210_v50 = vld [vmem:[#allocation8 + $0x100] sm:$0xff] }
 0x2c5   : > { %3580 = vmatprep.subr.mxu1 %v6389_v48  ;;  %1528 = vmatprep.subr.mxu0 %v5196_v44  ;;  %6439 = vst [vmem:[#allocation57_spill] sm:$0xff] %v5210_v50 }
 0x2c6   : > { %3581 = vmatpush3.msra.mxu1 %v4676_v53  ;;  %1529 = vmatpush1.msra.mxu0 %v5200_v47  ;;  %v5214_v53 = vld [vmem:[#allocation8 + $0xe8] sm:$0xff] }
 0x2c7   : > { %3582 = vmatprep.subr.mxu1 %v6389_v48  ;;  %1530 = vmatprep.subr.mxu0 %v5204_v39  ;;  %6440 = vst [vmem:[#allocation23_spill] sm:$0xff] %v5214_v53 }
 0x2c8   : > { %3583 = vmatpush3.msra.mxu1 %v4689_v56  ;;  %3584 = vmatprep.mubr.msk.f32.mxu1 %vm4311_vm0, %v6389_v48  ;;  %v5221_v56 = vld [vmem:[#allocation8 + $0xc8] sm:$0xff] }
 0x2c9   : > { %1531 = vmatpush1.msra.mxu0 %v5210_v50  ;;  %1587 = vmatprep.subr.mxu1 %v4704_v60  ;;  %6442 = vst [vmem:[#allocation24_spill] sm:$0xff] %v5221_v56  ;;  %v5230_v60 = vld [vmem:[#allocation8 + $0xa0] sm:$0xff] }
 0x2ca   : > { %1532 = vmatprep.subr.mxu0 %v5214_v53  ;;  %1580 = vmatprep.mubr.f32.mxu0 %v6389_v48  ;;  %6445 = vst [vmem:[#allocation27_spill] sm:$0xff] %v5230_v60 }
 0x2cb   : > { %1533 = vmatpush1.msra.mxu0 %v5218_v43 }
 0x2cc   : > { %1534 = vmatprep.subr.mxu0 %v5221_v56 }
 0x2cd   : > { %1535 = vmatpush1.msra.mxu0 %v5224_v34 }
 0x2ce   : > { %1536 = vmatprep.subr.mxu0 %v5227_v55 }
 0x2cf   : > { %1537 = vmatpush1.msra.mxu0 %v5230_v60 }
 0x2d0   : > { %1538 = vmatprep.subr.mxu0 %v5233_v37 }
 0x2d1   : > { %1539 = vmatpush1.msra.mxu0 %v5236_v58 }
 0x2d2   : > { %1540 = vmatprep.subr.mxu0 %v5239_v2 }
 0x2d3   : > { %1541 = vmatpush1.msra.mxu0 %v5242_v20 }
 0x2d4   : > { %1542 = vmatprep.subr.mxu0 %v5245_v7 }
 0x2d5   : > { %1543 = vmatpush1.msra.mxu0 %v5248_v61 }
 0x2d6   : > { %1544 = vmatprep.subr.mxu0 %v5251_v62 }
 0x2d7   : > { %1545 = vmatpush1.msra.mxu0 %v5254_v0 }
 0x2d8   : > { %1546 = vmatprep.subr.mxu0 %v5257_v1 }
 0x2d9   : > { %1547 = vmatpush1.msra.mxu0 %v5260_v3 }
 0x2da   : > { %3587 = vmatprep.subr.mxu0 %v6389_v48 }
 0x357   : > { %v1173_v8 = vpop.f32.mrf.mxu0 }
 0x359   : > { %v3551_v63 = vpop.f32.mrf.mxu0 }
 0x35a   : > { %v1174_v63 = vadd.f32 %v6425_v19, %v1173_v8 }
 0x367   : > { %v1259_v14 = vpop.f32.mrf.mxu1 }
 0x368   : > { %v1260_v40 = vadd.f32 %v3225_v6, %v1259_v14 }
 0x369   : > { %v1261_v49 = vpop.f32.mrf.mxu1 }
 0x36a   : > { %v1262_v54 = vadd.f32 %v3226_v42, %v1261_v49  ;;  %v3229_v12 = vmul.f32 -1.442695, %v1260_v40 }
 0x36c   : > { %v3230_v59 = vmul.f32 -1.442695, %v1262_v54  ;;  %3866 = vpow2.f32 %v3229_v12  ;;  %v1184_v54 = vpop.permute.xlu1 %1183 }
 0x36e   : > { %3868 = vpow2.f32 %v3230_v59 }
 0x378   : > { %v1330_v9 = vpop.f32.mrf.mxu0 }
 0x379   : > { %v1331_v3 = vadd.f32 %v3227_v46, %v1330_v9  ;;  %v3867_v1 = vpop.eup %3866  ;;  %v5284_v46 = vld [vmem:[#allocation8 + $0x1b8] sm:$0xff] }
 0x37a   : > { %v1332_v13 = vpop.f32.mrf.mxu0  ;;  %v1338_v14 = vadd.f32 1.0, %v3867_v1 }
 0x37b   : > { %v1333_v15 = vadd.f32 %v3228_v11, %v1332_v13  ;;  %v3869_v0 = vpop.eup %3868  ;;  %v3231_v62 = vmul.f32 -1.442695, %v1331_v3 }
 0x37c   : > { %v1344_v6 = vadd.f32 1.0, %v3869_v0 }
 0x37d   : > { %v3232_v16 = vmul.f32 -1.442695, %v1333_v15 }
 0x37f   : > { %3870 = vpow2.f32 %v3232_v16  ;;  %v5281_v16 = vld [vmem:[#allocation8 + $0x1d0] sm:$0xff] }
 0x380   : > { %3872 = vtanh.f32 %v1174_v63  ;;  %v5287_v63 = vld [vmem:[#allocation8 + $0x1b0] sm:$0xff] }
 0x381   : > { %3874 = vpow2.f32 %v3231_v62  ;;  %v5274_v62 = vld [vmem:[#allocation8 + $0x1f0] sm:$0xff] }
 0x382   : > { %3876 = vrcp.f32 %v1338_v14  ;;  %v5290_v14 = vld [vmem:[#allocation8 + $0x198] sm:$0xff] }
 0x383   : > { %3878 = vrcp.f32 %v1344_v6  ;;  %v5293_v6 = vld [vmem:[#allocation8 + $0x190] sm:$0xff] }
 0x38c   : > { %v3871_v42 = vpop.eup %3870 }
 0x38d   : > { %v1356_v49 = vadd.f32 1.0, %v3871_v42  ;;  %v3873_v40 = vpop.eup %3872  ;;  %v5296_v42 = vld [vmem:[#allocation8 + $0x178] sm:$0xff] }
 0x38e   : > { %v1180_v12 = vsub.f32 %v5022_v52, %v3873_v40  ;;  %v1186_v59 = vmul.f32 %v3873_v40, %v1184_v54  ;;  %v3875_v11 = vpop.eup %3874  ;;  %v5278_v52 = vld [vmem:[#allocation8 + $0x1d8] sm:$0xff]  ;;  %v5305_v54 = vld [vmem:[#allocation8 + $0x150] sm:$0xff] }
 0x38f   : > { %3880 = vrcp.f32 %v1356_v49  ;;  %v3877_v19 = vpop.eup %3876  ;;  %v1350_v15 = vadd.f32 1.0, %v3875_v11  ;;  %v5299_v49 = vld [vmem:[#allocation8 + $0x170] sm:$0xff]  ;;  %v5302_v40 = vld [vmem:[#allocation8 + $0x158] sm:$0xff]  ;;  %6456 = vst [vmem:[#allocation38_spill] sm:$0xff] %v5305_v54 }
 0x390   : > { %v3879_v8 = vpop.eup %3878  ;;  %v1187_v9 = vadd.f32 %v1186_v59, %v1180_v12  ;;  %v5308_v59 = vld [vmem:[#allocation8 + $0x138] sm:$0xff] }
 0x391   : > { %3882 = vrcp.f32 %v1350_v15  ;;  %6457 = vst [vmem:[#allocation39_spill] sm:$0xff] %v5308_v59  ;;  %v5322_v15 = vld [vmem:[#allocation8 + $0xf8] sm:$0xff] }
 0x392   : > { %v1359_v3 = vmul.f32 %v3877_v19, %v1187_v9  ;;  %v5311_v19 = vld [vmem:[#allocation8 + $0x130] sm:$0xff]  ;;  %6461 = vst [vmem:[#allocation43_spill] sm:$0xff] %v5322_v15 }
 0x393   : > { %6458 = vst [vmem:[#allocation40_spill] sm:$0xff] %v5311_v19 }
 0x39c   : > { %v3881_v13 = vpop.eup %3880 }
 0x39d   : > { %v1360_v1 = vmul.f32 %v3881_v13, %v3879_v8  ;;  %v5314_v8 = vld [vmem:[#allocation8 + $0x118] sm:$0xff]  ;;  %v5319_v13 = vld [vmem:[#allocation8 + $0x110] sm:$0xff] }
 0x39e   : > { %v3883_v12 = vpop.eup %3882  ;;  %6459 = vst [vmem:[#allocation41_spill] sm:$0xff] %v5314_v8  ;;  %6460 = vst [vmem:[#allocation42_spill] sm:$0xff] %v5319_v13 }
 0x39f   : > { %v5270_v0 = vadd.f32 %v1360_v1, %v1359_v3 }
 0x3a1   : > { %3884 = vtanh.f32 %v5270_v0  ;;  %3585 = vmatmul.mubr.f32.vlgmr.msra.gmra.mxu1 %v5270_v0 }
 0x3a2   : > { %1588 = vmatpush1.msra.mxu1 %v5274_v62  ;;  %1651 = vmatprep.mubr.f32.mxu1 %v6389_v48 }
 0x3a3   : > { %1589 = vmatprep.subr.mxu1 %v5278_v52 }
 0x3a4   : > { %1590 = vmatpush1.msra.mxu1 %v5281_v16 }
 0x3a5   : > { %1591 = vmatprep.subr.mxu1 %v5284_v46 }
 0x3a6   : > { %1592 = vmatpush1.msra.mxu1 %v5287_v63 }
 0x3a7   : > { %1593 = vmatprep.subr.mxu1 %v5290_v14 }
 0x3a8   : > { %1594 = vmatpush1.msra.mxu1 %v5293_v6 }
 0x3a9   : > { %1595 = vmatprep.subr.mxu1 %v5296_v42 }
 0x3aa   : > { %1596 = vmatpush1.msra.mxu1 %v5299_v49 }
 0x3ab   : > { %1597 = vmatprep.subr.mxu1 %v5302_v40 }
 0x3ac   : > { %1598 = vmatpush1.msra.mxu1 %v5305_v54 }
 0x3ad   : > { %1599 = vmatprep.subr.mxu1 %v5308_v59  ;;  %v5349_v59 = vld [vmem:[#allocation8 + $0xb8] sm:$0xff] }
 0x3ae   : > { %v3885_v11 = vpop.eup %3884  ;;  %1600 = vmatpush1.msra.mxu1 %v5311_v19  ;;  %v5330_v19 = vld [vmem:[#allocation8 + $0xf0] sm:$0xff] }
 0x3af   : > { %1601 = vmatprep.subr.mxu1 %v5314_v8  ;;  %v5317_v9 = vmul.f32 %v3885_v11, %v3883_v12  ;;  %6462 = vst [vmem:[#allocation44_spill] sm:$0xff] %v5330_v19  ;;  %v5341_v8 = vld [vmem:[#allocation8 + $0xd0] sm:$0xff] }
 0x3b0   : > { %1602 = vmatpush1.msra.mxu1 %v5319_v13  ;;  %v5337_v13 = vld [vmem:[#allocation8 + $0xd8] sm:$0xff]  ;;  %6464 = vst [vmem:[#allocation59_spill] sm:$0xff] %v5341_v8 }
 0x3b1   : > { %1603 = vmatprep.subr.mxu1 %v5322_v15  ;;  %v1365_v3 = vcombine.high %v5317_v9, %v5317_v9  ;;  %v1372_v1 = vrot.slane %v5317_v9, %v4909_v57  ;;  %1581 = vmatmul.mubr.f32.vlgmr.msra.gmra.mxu0 %v5317_v9  ;;  %6463 = vst [vmem:[#allocation45_spill] sm:$0xff] %v5337_v13 }
 0x3b2   : > { %1604 = vmatpush1.msra.mxu1 %v5330_v19  ;;  %3588 = vmatpush3.msra.mxu0 %v5048_v4 }
 0x3b3   : > { %v1379_v12 = vrot.slane %v1365_v3, %v4909_v57  ;;  %v1380_v11 = vcombine.high %v1372_v1, %v1372_v1  ;;  %v1388_v15 = vrot.slane %v1372_v1, %v4909_v57  ;;  %3233 = vst.sshfl [vmem:[%s4488_s11 + $0x2] sm:$0x1 pattern:$0x73625140] %v1372_v1  ;;  %1605 = vmatprep.subr.mxu1 %v5337_v13  ;;  %v5352_v13 = vld [vmem:[#allocation8 + $0xb0] sm:$0xff] }
 0x3b4   : > { %3589 = vmatprep.subr.mxu0 %v6389_v48  ;;  %1606 = vmatpush1.msra.mxu1 %v5341_v8 }
 0x3b5   : > { %3590 = vmatpush3.msra.mxu0 %v5060_v51  ;;  %v1381_v4 = vcombine.high %v1379_v12, %v1379_v12  ;;  %v1395_v3 = vrot.slane %v1379_v12, %v4909_v57  ;;  %v1402_v19 = vrot.slane %v1380_v11, %v4909_v57  ;;  %v1410_v1 = vcombine.high %v1388_v15, %v1388_v15  ;;  %v5359_v15 = vld [vmem:[#allocation8 + $0x98] sm:$0xff] }
 0x3b6   : > { %3234 = vst.sshfl [vmem:[%s4488_s11 + $0xa] sm:$0x1 pattern:$0x73625140] %v1380_v11  ;;  %1607 = vmatprep.subr.mxu1 %v5349_v59  ;;  %3591 = vmatprep.subr.mxu0 %v6389_v48 }
 0x3b7   : > { %3235 = vst.sshfl [vmem:[%s4488_s11 + $0x22] sm:$0x1 pattern:$0x73625140] %v1379_v12  ;;  %1608 = vmatpush1.msra.mxu1 %v5352_v13  ;;  %v1409_v51 = vrot.slane %v1381_v4, %v4909_v57  ;;  %v1411_v8 = vcombine.high %v1395_v3, %v1395_v3  ;;  %v1412_v54 = vcombine.high %v1402_v19, %v1402_v19  ;;  %1424 = vst [vmem:[%s4488_s11 + $0x12] sm:$0x1] %v1410_v1 }
 0x3b8   : > { %3236 = vst.sshfl [vmem:[%s4488_s11 + $0x2a] sm:$0x1 pattern:$0x73625140] %v1381_v4  ;;  %1609 = vmatprep.subr.mxu1 %v5359_v15  ;;  %3592 = vmatpush3.msra.mxu0 %v5077_v18  ;;  %v5363_v12 = vld [vmem:[#allocation8 + $0x90] sm:$0xff]  ;;  %v5369_v3 = vld [vmem:[#allocation8 + $0x78] sm:$0xff] }
 0x3b9   : > { %1610 = vmatpush1.msra.mxu1 %v5363_v12  ;;  %3593 = vmatprep.subr.mxu0 %v6389_v48  ;;  %v1413_v11 = vcombine.high %v1409_v51, %v1409_v51  ;;  %1425 = vst [vmem:[%s4488_s11 + $0x1a] sm:$0x1] %v1412_v54  ;;  %1428 = vst [vmem:[%s4488_s11 + $0x32] sm:$0x1] %v1411_v8  ;;  %v5373_v4 = vld [vmem:[#allocation8 + $0x70] sm:$0xff]  ;;  %v5378_v19 = vld [vmem:[#allocation8 + $0x58] sm:$0xff] }
 0x3ba   : > { %1611 = vmatprep.subr.mxu1 %v5369_v3  ;;  %3594 = vmatpush3.msra.mxu0 %v5088_v36  ;;  %v5382_v51 = vld [vmem:[#allocation8 + $0x50] sm:$0xff]  ;;  %v5386_v54 = vld [vmem:[#allocation8 + $0x38] sm:$0xff] }
 0x3bb   : > { %1612 = vmatpush1.msra.mxu1 %v5373_v4  ;;  %3595 = vmatprep.subr.mxu0 %v6389_v48  ;;  %1429 = vst [vmem:[%s4488_s11 + $0x3a] sm:$0x1] %v1413_v11  ;;  %v5390_v8 = vld [vmem:[#allocation8 + $0x30] sm:$0xff]  ;;  %v5394_v1 = vld [vmem:[#allocation8 + $0x18] sm:$0xff] }
 0x3bc   : > { %1613 = vmatprep.subr.mxu1 %v5378_v19  ;;  %3596 = vmatpush3.msra.mxu0 %v5098_v17  ;;  %v5398_v11 = vld [vmem:[#allocation8 + $0x10] sm:$0xff] }
 0x3bd   : > { %1614 = vmatpush1.msra.mxu1 %v5382_v51  ;;  %3597 = vmatprep.subr.mxu0 %v6389_v48 }
 0x3be   : > { %1615 = vmatprep.subr.mxu1 %v5386_v54  ;;  %3598 = vmatpush3.msra.mxu0 %v5107_v10 }
 0x3bf   : > { %1616 = vmatpush1.msra.mxu1 %v5390_v8  ;;  %3599 = vmatprep.subr.mxu0 %v6389_v48 }
 0x3c0   : > { %1617 = vmatprep.subr.mxu1 %v5394_v1  ;;  %3600 = vmatpush3.msra.mxu0 %v5116_v29 }
 0x3c1   : > { %1618 = vmatpush1.msra.mxu1 %v5398_v11  ;;  %3601 = vmatprep.subr.mxu0 %v6389_v48 }
 0x3c2   : > { %1652 = vmatmul.mubr.f32.vlgmr.msra.gmra.mxu1 %v5317_v9  ;;  %3602 = vmatpush3.msra.mxu0 %v5124_v23  ;;  %v5425_v9 = vld [vmem:[%s6200_s3 + $0x18] sm:$0xff] }
 0x3c3   : > { %3603 = vmatprep.subr.mxu0 %v6389_v48  ;;  %1839 = vmatprep.subr.mxu1 %v5128_v32 }
 0x3c4   : > { %3604 = vmatpush3.msra.mxu0 %v5134_v26  ;;  %1840 = vmatpush1.msra.mxu1 %v5137_v35 }
 0x3c5   : > { %3605 = vmatprep.subr.mxu0 %v6389_v48  ;;  %1841 = vmatprep.subr.mxu1 %v5141_v5 }
 0x3c6   : > { %3606 = vmatpush3.msra.mxu0 %v5147_v45  ;;  %1842 = vmatpush1.msra.mxu1 %v5150_v21 }
 0x3c7   : > { %3607 = vmatprep.subr.mxu0 %v6389_v48  ;;  %1843 = vmatprep.subr.mxu1 %v5154_v22 }
 0x3c8   : > { %3608 = vmatpush3.msra.mxu0 %v5160_v24  ;;  %1844 = vmatpush1.msra.mxu1 %v5163_v25 }
 0x3c9   : > { %3609 = vmatprep.subr.mxu0 %v6389_v48  ;;  %1845 = vmatprep.subr.mxu1 %v5167_v27 }
 0x3ca   : > { %3610 = vmatpush3.msra.mxu0 %v5173_v28  ;;  %1846 = vmatpush1.msra.mxu1 %v5176_v30  ;;  %v5434_v30 = vld [vmem:[%s6200_s3 + $0x10] sm:$0xff] }
 0x3cb   : > { %3611 = vmatprep.subr.mxu0 %v6389_v48  ;;  %1847 = vmatprep.subr.mxu1 %v5180_v31 }
 0x3cc   : > { %3612 = vmatpush3.msra.mxu0 %v5425_v9  ;;  %1848 = vmatpush1.msra.mxu1 %v5184_v33  ;;  %v5443_v33 = vld [vmem:[%s6200_s3 + $0x8] sm:$0xff] }
 0x3cd   : > { %3613 = vmatprep.subr.mxu0 %v6389_v48  ;;  %1849 = vmatprep.subr.mxu1 %v5188_v38  ;;  %6465 = vst [vmem:[#allocation51_spill] sm:$0xff] %v5443_v33 }
 0x3ce   : > { %3614 = vmatpush3.msra.mxu0 %v5434_v30  ;;  %1850 = vmatpush1.msra.mxu1 %v5192_v41  ;;  %v5452_v41 = vld [vmem:[%s6200_s3] sm:$0xff] }
 0x3cf   : > { %3615 = vmatprep.subr.mxu0 %v6389_v48  ;;  %1851 = vmatprep.subr.mxu1 %v5196_v44  ;;  %6466 = vst [vmem:[#allocation52_spill] sm:$0xff] %v5452_v41  ;;  %v5458_v44 = vld [vmem:[#allocation8 + $0x1f8] sm:$0xff] }
 0x3d0   : > { %3616 = vmatpush3.msra.mxu0 %v5443_v33  ;;  %1852 = vmatpush1.msra.mxu1 %v5200_v47  ;;  %6467 = vst [vmem:[#allocation53_spill] sm:$0xff] %v5458_v44 }
 0x3d1   : > { %3617 = vmatprep.subr.mxu0 %v6389_v48  ;;  %1853 = vmatprep.subr.mxu1 %v5204_v39  ;;  %v3240_v39 = vld [vmem:[%s4475_s30 + $0x70] sm:$0xff] }
 0x3d2   : > { %3618 = vmatpush3.msra.mxu0 %v5452_v41  ;;  %3619 = vmatprep.mubr.msk.f32.mxu0 %vm4311_vm0, %v6389_v48  ;;  %v3241_v41 = vld [vmem:[%s4475_s30 + $0x78] sm:$0xff] }
 0x3d3   : > { %1854 = vmatpush1.msra.mxu1 %v5210_v50  ;;  %1910 = vmatprep.subr.mxu0 %v5458_v44 }
 0x3d4   : > { %1855 = vmatprep.subr.mxu1 %v5214_v53  ;;  %1903 = vmatprep.mubr.f32.mxu1 %v6389_v48 }
 0x3d5   : > { %1856 = vmatpush1.msra.mxu1 %v5218_v43  ;;  %v3239_v43 = vld [vmem:[%s4475_s30 + $0x68] sm:$0xff] }
 0x3d6   : > { %1857 = vmatprep.subr.mxu1 %v5221_v56  ;;  %v6468_v56 = vld [vmem:[#allocation34_spill] sm:$0xff] }
 0x3d7   : > { %1858 = vmatpush1.msra.mxu1 %v5224_v34  ;;  %v6469_v34 = vld [vmem:[#allocation35_spill] sm:$0xff] }
 0x3d8   : > { %1859 = vmatprep.subr.mxu1 %v5227_v55  ;;  %v6470_v55 = vld [vmem:[#allocation36_spill] sm:$0xff] }
 0x3d9   : > { %1860 = vmatpush1.msra.mxu1 %v5230_v60  ;;  %v6471_v60 = vld [vmem:[#allocation37_spill] sm:$0xff] }
 0x3da   : > { %1861 = vmatprep.subr.mxu1 %v5233_v37 }
 0x3db   : > { %1862 = vmatpush1.msra.mxu1 %v5236_v58 }
 0x3dc   : > { %1863 = vmatprep.subr.mxu1 %v5239_v2 }
 0x3dd   : > { %1864 = vmatpush1.msra.mxu1 %v5242_v20  ;;  %v3238_v20 = vld [vmem:[%s4475_s30 + $0x60] sm:$0xff] }
 0x3de   : > { %1865 = vmatprep.subr.mxu1 %v5245_v7 }
 0x3df   : > { %1866 = vmatpush1.msra.mxu1 %v5248_v61 }
 0x3e0   : > { %1867 = vmatprep.subr.mxu1 %v6468_v56 }
 0x3e1   : > { %1868 = vmatpush1.msra.mxu1 %v6469_v34 }
 0x3e2   : > { %1869 = vmatprep.subr.mxu1 %v6470_v55 }
 0x3e3   : > { %1870 = vmatpush1.msra.mxu1 %v6471_v60 }
 0x3e4   : > { %3622 = vmatprep.subr.mxu1 %v6389_v48 }
 0x461   : > { %v1496_v58 = vpop.f32.mrf.mxu1 }
 0x463   : > { %v3586_v37 = vpop.f32.mrf.mxu1 }
 0x464   : > { %v5486_v37 = vld [vmem:[%s6201_s4] ss:$0 sm:$0xff] }
 0x465   : > { %6472 = vst [vmem:[#allocation54_spill] sm:$0xff] %v5486_v37  ;;  %v1497_v47 = vadd.f32 %v5486_v37, %v1496_v58 }
 0x471   : > { %v1582_v2 = vpop.f32.mrf.mxu0 }
 0x472   : > { %v1583_v53 = vadd.f32 %v3238_v20, %v1582_v2 }
 0x473   : > { %v1584_v7 = vpop.f32.mrf.mxu0 }
 0x474   : > { %v1585_v61 = vadd.f32 %v3239_v43, %v1584_v7  ;;  %v3242_v44 = vmul.f32 -1.442695, %v1583_v53 }
 0x476   : > { %v3243_v56 = vmul.f32 -1.442695, %v1585_v61  ;;  %3886 = vpow2.f32 %v3242_v44 }
 0x478   : > { %3888 = vpow2.f32 %v3243_v56 }
 0x482   : > { %v1653_v50 = vpop.f32.mrf.mxu1 }
 0x483   : > { %v1654_v2 = vadd.f32 %v3240_v39, %v1653_v50  ;;  %v3887_v43 = vpop.eup %3886 }
 0x484   : > { %v1655_v34 = vpop.f32.mrf.mxu1  ;;  %v1661_v7 = vadd.f32 1.0, %v3887_v43 }
 0x485   : > { %v1656_v55 = vadd.f32 %v3241_v41, %v1655_v34  ;;  %v3889_v53 = vpop.eup %3888  ;;  %v3244_v20 = vmul.f32 -1.442695, %v1654_v2  ;;  %v1507_v34 = vpop.permute.xlu1 %1506 }
 0x486   : > { %v1667_v44 = vadd.f32 1.0, %v3889_v53 }
 0x487   : > { %v3245_v60 = vmul.f32 -1.442695, %v1656_v55 }
 0x489   : > { %3890 = vpow2.f32 %v3245_v60 }
 0x48a   : > { %3892 = vtanh.f32 %v1497_v47 }
 0x48b   : > { %3894 = vpow2.f32 %v3244_v20 }
 0x48c   : > { %3896 = vrcp.f32 %v1661_v7  ;;  %v6475_v7 = vld [vmem:[#allocation40_spill] sm:$0xff] }
 0x48d   : > { %3898 = vrcp.f32 %v1667_v44  ;;  %v6476_v44 = vld [vmem:[#allocation41_spill] sm:$0xff] }
 0x496   : > { %v3891_v61 = vpop.eup %3890 }
 0x497   : > { %v1679_v41 = vadd.f32 1.0, %v3891_v61  ;;  %v3893_v56 = vpop.eup %3892 }
 0x498   : > { %v1503_v55 = vsub.f32 %v5270_v0, %v3893_v56  ;;  %v1509_v60 = vmul.f32 %v3893_v56, %v1507_v34  ;;  %v3895_v33 = vpop.eup %3894  ;;  %v6478_v56 = vld [vmem:[#allocation43_spill] sm:$0xff] }
 0x499   : > { %3900 = vrcp.f32 %v1679_v41  ;;  %v3897_v58 = vpop.eup %3896  ;;  %v1673_v47 = vadd.f32 1.0, %v3895_v33  ;;  %v6473_v33 = vld [vmem:[#allocation38_spill] sm:$0xff] }
 0x49a   : > { %v3899_v39 = vpop.eup %3898  ;;  %v1510_v50 = vadd.f32 %v1509_v60, %v1503_v55  ;;  %v6477_v41 = vld [vmem:[#allocation42_spill] sm:$0xff]  ;;  %v6479_v60 = vld [vmem:[#allocation44_spill] sm:$0xff] }
 0x49b   : > { %3902 = vrcp.f32 %v1673_v47 }
 0x49c   : > { %v1682_v2 = vmul.f32 %v3897_v58, %v1510_v50  ;;  %v6480_v58 = vld [vmem:[#allocation46_spill] sm:$0xff] }
 0x4a6   : > { %v3901_v37 = vpop.eup %3900 }
 0x4a7   : > { %v1683_v43 = vmul.f32 %v3901_v37, %v3899_v39  ;;  %v6474_v37 = vld [vmem:[#allocation39_spill] sm:$0xff] }
 0x4a8   : > { %v3903_v0 = vpop.eup %3902 }
 0x4a9   : > { %v5490_v53 = vadd.f32 %v1683_v43, %v1682_v2  ;;  %v6481_v2 = vld [vmem:[#allocation45_spill] sm:$0xff]  ;;  %v6482_v43 = vld [vmem:[#allocation59_spill] sm:$0xff] }
 0x4ab   : > { %3904 = vtanh.f32 %v5490_v53  ;;  %3620 = vmatmul.mubr.f32.vlgmr.msra.gmra.mxu0 %v5490_v53 }
 0x4ac   : > { %1911 = vmatpush1.msra.mxu0 %v5274_v62  ;;  %1974 = vmatprep.mubr.f32.mxu0 %v6389_v48 }
 0x4ad   : > { %1912 = vmatprep.subr.mxu0 %v5278_v52 }
 0x4ae   : > { %1913 = vmatpush1.msra.mxu0 %v5281_v16 }
 0x4af   : > { %1914 = vmatprep.subr.mxu0 %v5284_v46 }
 0x4b0   : > { %1915 = vmatpush1.msra.mxu0 %v5287_v63 }
 0x4b1   : > { %1916 = vmatprep.subr.mxu0 %v5290_v14 }
 0x4b2   : > { %1917 = vmatpush1.msra.mxu0 %v5293_v6 }
 0x4b3   : > { %1918 = vmatprep.subr.mxu0 %v5296_v42 }
 0x4b4   : > { %1919 = vmatpush1.msra.mxu0 %v5299_v49 }
 0x4b5   : > { %1920 = vmatprep.subr.mxu0 %v5302_v40 }
 0x4b6   : > { %1921 = vmatpush1.msra.mxu0 %v6473_v33 }
 0x4b7   : > { %1922 = vmatprep.subr.mxu0 %v6474_v37 }
 0x4b8   : > { %v3905_v20 = vpop.eup %3904  ;;  %1923 = vmatpush1.msra.mxu0 %v6475_v7 }
 0x4b9   : > { %1924 = vmatprep.subr.mxu0 %v6476_v44  ;;  %v1686_v61 = vmul.f32 %v3905_v20, %v3903_v0  ;;  %v6483_v0 = vld [vmem:[#allocation47_spill] sm:$0xff] }
 0x4ba   : > { %1925 = vmatpush1.msra.mxu0 %v6477_v41 }
 0x4bb   : > { %1926 = vmatprep.subr.mxu0 %v6478_v56  ;;  %v1688_v34 = vcombine.high %v1686_v61, %v1686_v61  ;;  %v1695_v55 = vrot.slane %v1686_v61, %v4909_v57  ;;  %1904 = vmatmul.mubr.f32.vlgmr.msra.gmra.mxu1 %v1686_v61 }
 0x4bc   : > { %1927 = vmatpush1.msra.mxu0 %v6479_v60  ;;  %3623 = vmatpush3.msra.mxu1 %v6480_v58 }
 0x4bd   : > { %v1702_v39 = vrot.slane %v1688_v34, %v4909_v57  ;;  %v1703_v50 = vcombine.high %v1695_v55, %v1695_v55  ;;  %v1711_v47 = vrot.slane %v1695_v55, %v4909_v57  ;;  %3246 = vst.sshfl [vmem:[%s4488_s11 + $0x3] sm:$0x1 pattern:$0x73625140] %v1695_v55  ;;  %1928 = vmatprep.subr.mxu0 %v6481_v2 }
 0x4be   : > { %3624 = vmatprep.subr.mxu1 %v6389_v48  ;;  %1929 = vmatpush1.msra.mxu0 %v6482_v43 }
 0x4bf   : > { %3625 = vmatpush3.msra.mxu1 %v6483_v0  ;;  %v1704_v20 = vcombine.high %v1702_v39, %v1702_v39  ;;  %v1718_v60 = vrot.slane %v1702_v39, %v4909_v57  ;;  %v1725_v58 = vrot.slane %v1703_v50, %v4909_v57  ;;  %v1733_v34 = vcombine.high %v1711_v47, %v1711_v47  ;;  %v6506_v47 = vld [vmem:[#allocation34_spill] sm:$0xff] }
 0x4c0   : > { %3247 = vst.sshfl [vmem:[%s4488_s11 + $0xb] sm:$0x1 pattern:$0x73625140] %v1703_v50  ;;  %1930 = vmatprep.subr.mxu0 %v5349_v59  ;;  %3626 = vmatprep.subr.mxu1 %v6389_v48  ;;  %v6505_v50 = vld [vmem:[#allocation33_spill] sm:$0xff] }
 0x4c1   : > { %3248 = vst.sshfl [vmem:[%s4488_s11 + $0x23] sm:$0x1 pattern:$0x73625140] %v1702_v39  ;;  %1931 = vmatpush1.msra.mxu0 %v5352_v13  ;;  %v1732_v55 = vrot.slane %v1704_v20, %v4909_v57  ;;  %v1734_v0 = vcombine.high %v1718_v60, %v1718_v60  ;;  %v1735_v43 = vcombine.high %v1725_v58, %v1725_v58  ;;  %1747 = vst [vmem:[%s4488_s11 + $0x13] sm:$0x1] %v1733_v34 }
 0x4c2   : > { %3249 = vst.sshfl [vmem:[%s4488_s11 + $0x2b] sm:$0x1 pattern:$0x73625140] %v1704_v20  ;;  %1932 = vmatprep.subr.mxu0 %v5359_v15  ;;  %3627 = vmatpush3.msra.mxu1 %v5077_v18  ;;  %v6484_v18 = vld [vmem:[#allocation48_spill] sm:$0xff]  ;;  %v6509_v58 = vld [vmem:[#allocation37_spill] sm:$0xff] }
 0x4c3   : > { %1933 = vmatpush1.msra.mxu0 %v5363_v12  ;;  %3628 = vmatprep.subr.mxu1 %v6389_v48  ;;  %v1736_v39 = vcombine.high %v1732_v55, %v1732_v55  ;;  %1748 = vst [vmem:[%s4488_s11 + $0x1b] sm:$0x1] %v1735_v43  ;;  %1751 = vst [vmem:[%s4488_s11 + $0x33] sm:$0x1] %v1734_v0  ;;  %v6504_v60 = vld [vmem:[#allocation32_spill] sm:$0xff]  ;;  %v6507_v43 = vld [vmem:[#allocation35_spill] sm:$0xff] }
 0x4c4   : > { %1934 = vmatprep.subr.mxu0 %v5369_v3  ;;  %3629 = vmatpush3.msra.mxu1 %v5088_v36  ;;  %v6485_v36 = vld [vmem:[#allocation49_spill] sm:$0xff]  ;;  %v6508_v20 = vld [vmem:[#allocation36_spill] sm:$0xff] }
 0x4c5   : > { %1935 = vmatpush1.msra.mxu0 %v5373_v4  ;;  %3630 = vmatprep.subr.mxu1 %v6389_v48  ;;  %1752 = vst [vmem:[%s4488_s11 + $0x3b] sm:$0x1] %v1736_v39  ;;  %v3251_v39 = vld [vmem:[%s4475_s30 + $0x80] sm:$0xff] }
 0x4c6   : > { %1936 = vmatprep.subr.mxu0 %v5378_v19  ;;  %3631 = vmatpush3.msra.mxu1 %v5098_v17  ;;  %v6486_v17 = vld [vmem:[#allocation50_spill] sm:$0xff] }
 0x4c7   : > { %1937 = vmatpush1.msra.mxu0 %v5382_v51  ;;  %3632 = vmatprep.subr.mxu1 %v6389_v48 }
 0x4c8   : > { %1938 = vmatprep.subr.mxu0 %v5386_v54  ;;  %3633 = vmatpush3.msra.mxu1 %v5107_v10  ;;  %v6487_v10 = vld [vmem:[#allocation21_spill] sm:$0xff] }
 0x4c9   : > { %1939 = vmatpush1.msra.mxu0 %v5390_v8  ;;  %3634 = vmatprep.subr.mxu1 %v6389_v48 }
 0x4ca   : > { %1940 = vmatprep.subr.mxu0 %v5394_v1  ;;  %3635 = vmatpush3.msra.mxu1 %v5116_v29  ;;  %v6488_v29 = vld [vmem:[#allocation51_spill] sm:$0xff] }
 0x4cb   : > { %1941 = vmatpush1.msra.mxu0 %v5398_v11  ;;  %3636 = vmatprep.subr.mxu1 %v6389_v48 }
 0x4cc   : > { %1975 = vmatmul.mubr.f32.vlgmr.msra.gmra.mxu0 %v1686_v61  ;;  %3637 = vmatpush3.msra.mxu1 %v5124_v23  ;;  %v6489_v23 = vld [vmem:[#allocation22_spill] sm:$0xff]  ;;  %v6503_v61 = vld [vmem:[#allocation31_spill] sm:$0xff] }
 0x4cd   : > { %3638 = vmatprep.subr.mxu1 %v6389_v48  ;;  %2162 = vmatprep.subr.mxu0 %v5128_v32  ;;  %v6490_v32 = vld [vmem:[#allocation55_spill] sm:$0xff] }
 0x4ce   : > { %3639 = vmatpush3.msra.mxu1 %v5134_v26  ;;  %2163 = vmatpush1.msra.mxu0 %v5137_v35  ;;  %v6491_v26 = vld [vmem:[#allocation52_spill] sm:$0xff]  ;;  %v6492_v35 = vld [vmem:[#allocation57_spill] sm:$0xff] }
 0x4cf   : > { %3640 = vmatprep.subr.mxu1 %v6389_v48  ;;  %2164 = vmatprep.subr.mxu0 %v5141_v5  ;;  %v6493_v5 = vld [vmem:[#allocation53_spill] sm:$0xff] }
 0x4d0   : > { %3641 = vmatpush3.msra.mxu1 %v5147_v45  ;;  %2165 = vmatpush1.msra.mxu0 %v5150_v21  ;;  %v6494_v45 = vld [vmem:[#allocation23_spill] sm:$0xff]  ;;  %v6495_v21 = vld [vmem:[#allocation58_spill] sm:$0xff] }
 0x4d1   : > { %3642 = vmatprep.subr.mxu1 %v6389_v48  ;;  %2166 = vmatprep.subr.mxu0 %v5154_v22  ;;  %v6496_v22 = vld [vmem:[#allocation24_spill] sm:$0xff] }
 0x4d2   : > { %3643 = vmatpush3.msra.mxu1 %v5160_v24  ;;  %2167 = vmatpush1.msra.mxu0 %v5163_v25  ;;  %v6497_v24 = vld [vmem:[#allocation25_spill] sm:$0xff]  ;;  %v6498_v25 = vld [vmem:[#allocation26_spill] sm:$0xff] }
 0x4d3   : > { %3644 = vmatprep.subr.mxu1 %v6389_v48  ;;  %2168 = vmatprep.subr.mxu0 %v5167_v27  ;;  %v6499_v27 = vld [vmem:[#allocation27_spill] sm:$0xff] }
 0x4d4   : > { %3645 = vmatpush3.msra.mxu1 %v5173_v28  ;;  %2169 = vmatpush1.msra.mxu0 %v6484_v18  ;;  %v6500_v28 = vld [vmem:[#allocation28_spill] sm:$0xff]  ;;  %v3252_v18 = vld [vmem:[%s4475_s30 + $0x88] sm:$0xff] }
 0x4d5   : > { %3646 = vmatprep.subr.mxu1 %v6389_v48  ;;  %2170 = vmatprep.subr.mxu0 %v5180_v31  ;;  %v6501_v31 = vld [vmem:[#allocation30_spill] sm:$0xff] }
 0x4d6   : > { %3647 = vmatpush3.msra.mxu1 %v5425_v9  ;;  %2171 = vmatpush1.msra.mxu0 %v6485_v36 }
 0x4d7   : > { %3648 = vmatprep.subr.mxu1 %v6389_v48  ;;  %2172 = vmatprep.subr.mxu0 %v5188_v38  ;;  %v6502_v38 = vld [vmem:[#allocation29_spill] sm:$0xff] }
 0x4d8   : > { %3649 = vmatpush3.msra.mxu1 %v5434_v30  ;;  %2173 = vmatpush1.msra.mxu0 %v6486_v17 }
 0x4d9   : > { %3650 = vmatprep.subr.mxu1 %v6389_v48  ;;  %2174 = vmatprep.subr.mxu0 %v6487_v10 }
 0x4da   : > { %3651 = vmatpush3.msra.mxu1 %v6488_v29  ;;  %2175 = vmatpush1.msra.mxu0 %v6489_v23 }
 0x4db   : > { %3652 = vmatprep.subr.mxu1 %v6389_v48  ;;  %2176 = vmatprep.subr.mxu0 %v6490_v32 }
 0x4dc   : > { %3653 = vmatpush3.msra.mxu1 %v6491_v26  ;;  %3654 = vmatprep.mubr.msk.f32.mxu1 %vm4311_vm0, %v6389_v48 }
 0x4dd   : > { %2177 = vmatpush1.msra.mxu0 %v6492_v35  ;;  %2233 = vmatprep.subr.mxu1 %v6493_v5 }
 0x4de   : > { %2178 = vmatprep.subr.mxu0 %v6494_v45  ;;  %2226 = vmatprep.mubr.f32.mxu0 %v6389_v48  ;;  %v3254_v45 = vld [vmem:[%s4475_s30 + $0x98] sm:$0xff] }
 0x4df   : > { %2179 = vmatpush1.msra.mxu0 %v6495_v21 }
 0x4e0   : > { %2180 = vmatprep.subr.mxu0 %v6496_v22 }
 0x4e1   : > { %2181 = vmatpush1.msra.mxu0 %v6497_v24 }
 0x4e2   : > { %2182 = vmatprep.subr.mxu0 %v6498_v25  ;;  %v3253_v25 = vld [vmem:[%s4475_s30 + $0x90] sm:$0xff] }
 0x4e3   : > { %2183 = vmatpush1.msra.mxu0 %v6499_v27  ;;  %v6510_v27 = vld [vmem:[#allocation54_spill] sm:$0xff] }
 0x4e4   : > { %2184 = vmatprep.subr.mxu0 %v6500_v28 }
 0x4e5   : > { %2185 = vmatpush1.msra.mxu0 %v6501_v31 }
 0x4e6   : > { %2186 = vmatprep.subr.mxu0 %v6502_v38 }
 0x4e7   : > { %2187 = vmatpush1.msra.mxu0 %v6503_v61 }
 0x4e8   : > { %2188 = vmatprep.subr.mxu0 %v6504_v60 }
 0x4e9   : > { %2189 = vmatpush1.msra.mxu0 %v6505_v50 }
 0x4ea   : > { %2190 = vmatprep.subr.mxu0 %v6506_v47 }
 0x4eb   : > { %2191 = vmatpush1.msra.mxu0 %v6507_v43 }
 0x4ec   : > { %2192 = vmatprep.subr.mxu0 %v6508_v20 }
 0x4ed   : > { %2193 = vmatpush1.msra.mxu0 %v6509_v58 }
 0x4ee   : > { %3657 = vmatprep.subr.mxu0 %v6389_v48 }
 0x56b   : > { %v1819_v34 = vpop.f32.mrf.mxu0 }
 0x56c   : > { %v1820_v28 = vadd.f32 %v6510_v27, %v1819_v34 }
 0x56d   : > { %v3621_v55 = vpop.f32.mrf.mxu0 }
 0x56e   : > { %v1830_v55 = vpop.permute.xlu0 %1829 }
 0x57b   : > { %v1905_v0 = vpop.f32.mrf.mxu1 }
 0x57c   : > { %v1906_v17 = vadd.f32 %v3251_v39, %v1905_v0 }
 0x57d   : > { %v1907_v36 = vpop.f32.mrf.mxu1 }
 0x57e   : > { %v1908_v10 = vadd.f32 %v3252_v18, %v1907_v36  ;;  %v3255_v23 = vmul.f32 -1.442695, %v1906_v17 }
 0x580   : > { %v3256_v32 = vmul.f32 -1.442695, %v1908_v10  ;;  %3906 = vpow2.f32 %v3255_v23 }
 0x582   : > { %3908 = vpow2.f32 %v3256_v32 }
 0x58c   : > { %v1976_v35 = vpop.f32.mrf.mxu0 }
 0x58d   : > { %v1977_v31 = vadd.f32 %v3253_v25, %v1976_v35  ;;  %v3907_v38 = vpop.eup %3906  ;;  %v5752_v25 = vld [vmem:[%s6200_s3 + $0x28] sm:$0xff] }
 0x58e   : > { %v1978_v21 = vpop.f32.mrf.mxu0  ;;  %v1984_v50 = vadd.f32 1.0, %v3907_v38  ;;  %v5765_v38 = vld [vmem:[%s6200_s3 + $0x20] sm:$0xff] }
 0x58f   : > { %v1979_v22 = vadd.f32 %v3254_v45, %v1978_v21  ;;  %v3909_v61 = vpop.eup %3908  ;;  %v3257_v60 = vmul.f32 -1.442695, %v1977_v31  ;;  %v5759_v31 = vld [vmem:[#allocation8 + $0x188] sm:$0xff] }
 0x590   : > { %v1990_v47 = vadd.f32 1.0, %v3909_v61  ;;  %v5768_v61 = vld [vmem:[#allocation8 + $0x180] sm:$0xff] }
 0x591   : > { %v3258_v24 = vmul.f32 -1.442695, %v1979_v22  ;;  %v5669_v22 = vld [vmem:[%s6200_s3 + $0x68] sm:$0xff] }
 0x593   : > { %3910 = vpow2.f32 %v3258_v24  ;;  %v5746_v24 = vld [vmem:[#allocation8 + $0x1a8] sm:$0xff] }
 0x594   : > { %3912 = vtanh.f32 %v1820_v28  ;;  %v5755_v28 = vld [vmem:[#allocation8 + $0x1a0] sm:$0xff] }
 0x595   : > { %3914 = vpow2.f32 %v3257_v60  ;;  %v5772_v60 = vld [vmem:[#allocation8 + $0x168] sm:$0xff] }
 0x596   : > { %3916 = vrcp.f32 %v1984_v50  ;;  %v5776_v50 = vld [vmem:[#allocation8 + $0x160] sm:$0xff] }
 0x597   : > { %3918 = vrcp.f32 %v1990_v47  ;;  %v5780_v47 = vld [vmem:[#allocation8 + $0x148] sm:$0xff] }
 0x5a0   : > { %v3911_v43 = vpop.eup %3910 }
 0x5a1   : > { %v2002_v20 = vadd.f32 1.0, %v3911_v43  ;;  %v3913_v58 = vpop.eup %3912  ;;  %v5784_v43 = vld [vmem:[#allocation8 + $0x140] sm:$0xff] }
 0x5a2   : > { %v1826_v0 = vsub.f32 %v5490_v53, %v3913_v58  ;;  %v1832_v39 = vmul.f32 %v3913_v58, %v1830_v55  ;;  %v3915_v18 = vpop.eup %3914  ;;  %v6512_v53 = vld [vmem:[#allocation59_spill] sm:$0xff]  ;;  %v5796_v58 = vld [vmem:[#allocation8 + $0x108] sm:$0xff]  ;;  %v5810_v55 = vld [vmem:[#allocation8 + $0xe0] sm:$0xff] }
 0x5a3   : > { %3920 = vrcp.f32 %v2002_v20  ;;  %v3917_v34 = vpop.eup %3916  ;;  %v1996_v23 = vadd.f32 1.0, %v3915_v18  ;;  %v5788_v20 = vld [vmem:[#allocation8 + $0x128] sm:$0xff] }
 0x5a4   : > { %v3919_v36 = vpop.eup %3918  ;;  %v1833_v17 = vadd.f32 %v1832_v39, %v1826_v0  ;;  %v5816_v0 = vld [vmem:[#allocation8 + $0xc0] sm:$0xff]  ;;  %v5819_v39 = vld [vmem:[#allocation8 + $0xa8] sm:$0xff] }
 0x5a5   : > { %3922 = vrcp.f32 %v1996_v23  ;;  %v5825_v18 = vld [vmem:[#allocation8 + $0x88] sm:$0xff]  ;;  %v5840_v23 = vld [vmem:[#allocation8 + $0x40] sm:$0xff] }
 0x5a6   : > { %v2005_v32 = vmul.f32 %v3917_v34, %v1833_v17  ;;  %v5828_v34 = vld [vmem:[#allocation8 + $0x80] sm:$0xff] }
 0x5a7   : > { %v5834_v17 = vld [vmem:[#allocation8 + $0x60] sm:$0xff] }
 0x5b0   : > { %v3921_v10 = vpop.eup %3920 }
 0x5b1   : > { %v2006_v35 = vmul.f32 %v3921_v10, %v3919_v36  ;;  %v5831_v36 = vld [vmem:[#allocation8 + $0x68] sm:$0xff] }
 0x5b2   : > { %v5837_v10 = vld [vmem:[#allocation8 + $0x48] sm:$0xff] }
 0x5b3   : > { %v5614_v45 = vadd.f32 %v2006_v35, %v2005_v32  ;;  %v5843_v32 = vld [vmem:[#allocation8 + $0x28] sm:$0xff]  ;;  %v5846_v35 = vld [vmem:[#allocation8 + $0x20] sm:$0xff] }
 0x5b4   : > { %6513 = vst [vmem:[#allocation56_spill] sm:$0xff] %v5843_v32  ;;  %6514 = vst [vmem:[#allocation38_spill] sm:$0xff] %v5846_v35 }
 0x5b5   : > { %3924 = vtanh.f32 %v5614_v45  ;;  %3655 = vmatmul.mubr.f32.vlgmr.msra.gmra.mxu1 %v5614_v45 }
 0x5b6   : > { %2234 = vmatpush1.msra.mxu1 %v5274_v62  ;;  %2297 = vmatprep.mubr.f32.mxu1 %v6389_v48  ;;  %v3923_v62 = vpop.eup %3922 }
 0x5b7   : > { %2235 = vmatprep.subr.mxu1 %v5278_v52 }
 0x5b8   : > { %2236 = vmatpush1.msra.mxu1 %v5281_v16 }
 0x5b9   : > { %2237 = vmatprep.subr.mxu1 %v5284_v46 }
 0x5ba   : > { %2238 = vmatpush1.msra.mxu1 %v5287_v63 }
 0x5bb   : > { %2239 = vmatprep.subr.mxu1 %v5290_v14  ;;  %v6511_v14 = vld [vmem:[#allocation44_spill] sm:$0xff] }
 0x5bc   : > { %2240 = vmatpush1.msra.mxu1 %v5293_v6  ;;  %v5640_v6 = vld [vmem:[%s6200_s3 + $0x78] sm:$0xff] }
 0x5bd   : > { %2241 = vmatprep.subr.mxu1 %v5296_v42 }
 0x5be   : > { %2242 = vmatpush1.msra.mxu1 %v5299_v49 }
 0x5bf   : > { %2243 = vmatprep.subr.mxu1 %v5302_v40 }
 0x5c0   : > { %2244 = vmatpush1.msra.mxu1 %v6473_v33  ;;  %v5652_v33 = vld [vmem:[%s6200_s3 + $0x70] sm:$0xff] }
 0x5c1   : > { %2245 = vmatprep.subr.mxu1 %v6474_v37 }
 0x5c2   : > { %v3925_v52 = vpop.eup %3924  ;;  %2246 = vmatpush1.msra.mxu1 %v6475_v7 }
 0x5c3   : > { %2247 = vmatprep.subr.mxu1 %v6476_v44  ;;  %v2009_v16 = vmul.f32 %v3925_v52, %v3923_v62  ;;  %v5849_v62 = vld [vmem:[#allocation8 + $0x8] sm:$0xff]  ;;  %v5852_v52 = vld [vmem:[#allocation8] sm:$0xff] }
 0x5c4   : > { %2248 = vmatpush1.msra.mxu1 %v6477_v41  ;;  %6515 = vst [vmem:[#allocation39_spill] sm:$0xff] %v5849_v62  ;;  %6516 = vst [vmem:[#allocation40_spill] sm:$0xff] %v5852_v52 }
 0x5c5   : > { %2249 = vmatprep.subr.mxu1 %v6478_v56  ;;  %v2011_v46 = vcombine.high %v2009_v16, %v2009_v16  ;;  %v2018_v63 = vrot.slane %v2009_v16, %v4909_v57  ;;  %2227 = vmatmul.mubr.f32.vlgmr.msra.gmra.mxu0 %v2009_v16 }
 0x5c6   : > { %2250 = vmatpush1.msra.mxu1 %v6511_v14  ;;  %3658 = vmatpush3.msra.mxu0 %v5640_v6  ;;  %v3264_v14 = vld [vmem:[%s4475_s30 + $0xa0] sm:$0xff] }
 0x5c7   : > { %v2025_v42 = vrot.slane %v2011_v46, %v4909_v57  ;;  %v2026_v49 = vcombine.high %v2018_v63, %v2018_v63  ;;  %v2034_v40 = vrot.slane %v2018_v63, %v4909_v57  ;;  %3259 = vst.sshfl [vmem:[%s4488_s11 + $0x4] sm:$0x1 pattern:$0x73625140] %v2018_v63  ;;  %2251 = vmatprep.subr.mxu1 %v6481_v2 }
 0x5c8   : > { %3659 = vmatprep.subr.mxu0 %v6389_v48  ;;  %2252 = vmatpush1.msra.mxu1 %v6512_v53 }
 0x5c9   : > { %3660 = vmatpush3.msra.mxu0 %v5652_v33  ;;  %v2027_v37 = vcombine.high %v2025_v42, %v2025_v42  ;;  %v2041_v7 = vrot.slane %v2025_v42, %v4909_v57  ;;  %v2048_v44 = vrot.slane %v2026_v49, %v4909_v57  ;;  %v2056_v41 = vcombine.high %v2034_v40, %v2034_v40 }
 0x5ca   : > { %3260 = vst.sshfl [vmem:[%s4488_s11 + $0xc] sm:$0x1 pattern:$0x73625140] %v2026_v49  ;;  %2253 = vmatprep.subr.mxu1 %v5349_v59  ;;  %3661 = vmatprep.subr.mxu0 %v6389_v48 }
 0x5cb   : > { %3261 = vst.sshfl [vmem:[%s4488_s11 + $0x24] sm:$0x1 pattern:$0x73625140] %v2025_v42  ;;  %2254 = vmatpush1.msra.mxu1 %v5352_v13  ;;  %v2055_v56 = vrot.slane %v2027_v37, %v4909_v57  ;;  %v2057_v2 = vcombine.high %v2041_v7, %v2041_v7  ;;  %v2058_v21 = vcombine.high %v2048_v44, %v2048_v44  ;;  %2070 = vst [vmem:[%s4488_s11 + $0x14] sm:$0x1] %v2056_v41 }
 0x5cc   : > { %3262 = vst.sshfl [vmem:[%s4488_s11 + $0x2c] sm:$0x1 pattern:$0x73625140] %v2027_v37  ;;  %2255 = vmatprep.subr.mxu1 %v5359_v15  ;;  %3662 = vmatpush3.msra.mxu0 %v5669_v22  ;;  %v5680_v13 = vld [vmem:[%s6200_s3 + $0x60] sm:$0xff]  ;;  %v5690_v15 = vld [vmem:[%s6200_s3 + $0x58] sm:$0xff] }
 0x5cd   : > { %2256 = vmatpush1.msra.mxu1 %v5363_v12  ;;  %3663 = vmatprep.subr.mxu0 %v6389_v48  ;;  %v2059_v59 = vcombine.high %v2055_v56, %v2055_v56  ;;  %2071 = vst [vmem:[%s4488_s11 + $0x1c] sm:$0x1] %v2058_v21  ;;  %2074 = vst [vmem:[%s4488_s11 + $0x34] sm:$0x1] %v2057_v2  ;;  %v5699_v12 = vld [vmem:[%s6200_s3 + $0x50] sm:$0xff]  ;;  %v3265_v42 = vld [vmem:[%s4475_s30 + $0xa8] sm:$0xff] }
 0x5ce   : > { %2257 = vmatprep.subr.mxu1 %v5369_v3  ;;  %3664 = vmatpush3.msra.mxu0 %v5680_v13  ;;  %v5708_v3 = vld [vmem:[%s6200_s3 + $0x48] sm:$0xff] }
 0x5cf   : > { %2258 = vmatpush1.msra.mxu1 %v5373_v4  ;;  %3665 = vmatprep.subr.mxu0 %v6389_v48  ;;  %2075 = vst [vmem:[%s4488_s11 + $0x3c] sm:$0x1] %v2059_v59  ;;  %v5716_v4 = vld [vmem:[%s6200_s3 + $0x40] sm:$0xff]  ;;  %v3267_v41 = vld [vmem:[%s4475_s30 + $0xb8] sm:$0xff] }
 0x5d0   : > { %2259 = vmatprep.subr.mxu1 %v5378_v19  ;;  %3666 = vmatpush3.msra.mxu0 %v5690_v15  ;;  %v5720_v19 = vld [vmem:[#allocation8 + $0x1e8] sm:$0xff]  ;;  %v3266_v59 = vld [vmem:[%s4475_s30 + $0xb0] sm:$0xff] }
 0x5d1   : > { %2260 = vmatpush1.msra.mxu1 %v5382_v51  ;;  %3667 = vmatprep.subr.mxu0 %v6389_v48  ;;  %v5726_v51 = vld [vmem:[%s6200_s3 + $0x38] sm:$0xff] }
 0x5d2   : > { %2261 = vmatprep.subr.mxu1 %v5386_v54  ;;  %3668 = vmatpush3.msra.mxu0 %v5699_v12  ;;  %v5729_v54 = vld [vmem:[#allocation8 + $0x1e0] sm:$0xff] }
 0x5d3   : > { %2262 = vmatpush1.msra.mxu1 %v5390_v8  ;;  %3669 = vmatprep.subr.mxu0 %v6389_v48  ;;  %v5733_v8 = vld [vmem:[#allocation8 + $0x1c8] sm:$0xff] }
 0x5d4   : > { %2263 = vmatprep.subr.mxu1 %v5394_v1  ;;  %3670 = vmatpush3.msra.mxu0 %v5708_v3  ;;  %v5739_v1 = vld [vmem:[%s6200_s3 + $0x30] sm:$0xff] }
 0x5d5   : > { %2264 = vmatpush1.msra.mxu1 %v5398_v11  ;;  %3671 = vmatprep.subr.mxu0 %v6389_v48  ;;  %v5742_v11 = vld [vmem:[#allocation8 + $0x1c0] sm:$0xff] }
 0x5d6   : > { %2298 = vmatmul.mubr.f32.vlgmr.msra.gmra.mxu1 %v2009_v16  ;;  %3672 = vmatpush3.msra.mxu0 %v5716_v4 }
 0x5d7   : > { %3673 = vmatprep.subr.mxu0 %v6389_v48  ;;  %2485 = vmatprep.subr.mxu1 %v5720_v19 }
 0x5d8   : > { %3674 = vmatpush3.msra.mxu0 %v5726_v51  ;;  %2486 = vmatpush1.msra.mxu1 %v5729_v54 }
 0x5d9   : > { %3675 = vmatprep.subr.mxu0 %v6389_v48  ;;  %2487 = vmatprep.subr.mxu1 %v5733_v8 }
 0x5da   : > { %3676 = vmatpush3.msra.mxu0 %v5739_v1  ;;  %2488 = vmatpush1.msra.mxu1 %v5742_v11 }
 0x5db   : > { %3677 = vmatprep.subr.mxu0 %v6389_v48  ;;  %2489 = vmatprep.subr.mxu1 %v5746_v24 }
 0x5dc   : > { %3678 = vmatpush3.msra.mxu0 %v5752_v25  ;;  %2490 = vmatpush1.msra.mxu1 %v5755_v28 }
 0x5dd   : > { %3679 = vmatprep.subr.mxu0 %v6389_v48  ;;  %2491 = vmatprep.subr.mxu1 %v5759_v31 }
 0x5de   : > { %3680 = vmatpush3.msra.mxu0 %v5765_v38  ;;  %2492 = vmatpush1.msra.mxu1 %v5768_v61 }
 0x5df   : > { %3681 = vmatprep.subr.mxu0 %v6389_v48  ;;  %2493 = vmatprep.subr.mxu1 %v5772_v60 }
 0x5e0   : > { %3682 = vmatpush3.msra.mxu0 %v5425_v9  ;;  %2494 = vmatpush1.msra.mxu1 %v5776_v50  ;;  %v5792_v9 = vld [vmem:[#allocation8 + $0x120] sm:$0xff] }
 0x5e1   : > { %3683 = vmatprep.subr.mxu0 %v6389_v48  ;;  %2495 = vmatprep.subr.mxu1 %v5780_v47 }
 0x5e2   : > { %3684 = vmatpush3.msra.mxu0 %v5434_v30  ;;  %2496 = vmatpush1.msra.mxu1 %v5784_v43  ;;  %v5802_v30 = vld [vmem:[#allocation8 + $0x100] sm:$0xff] }
 0x5e3   : > { %3685 = vmatprep.subr.mxu0 %v6389_v48  ;;  %2497 = vmatprep.subr.mxu1 %v5788_v20 }
 0x5e4   : > { %3686 = vmatpush3.msra.mxu0 %v6488_v29  ;;  %2498 = vmatpush1.msra.mxu1 %v5792_v9  ;;  %v5806_v29 = vld [vmem:[#allocation8 + $0xe8] sm:$0xff] }
 0x5e5   : > { %3687 = vmatprep.subr.mxu0 %v6389_v48  ;;  %2499 = vmatprep.subr.mxu1 %v5796_v58 }
 0x5e6   : > { %3688 = vmatpush3.msra.mxu0 %v6491_v26  ;;  %3689 = vmatprep.mubr.msk.f32.mxu0 %vm4311_vm0, %v6389_v48  ;;  %v5813_v26 = vld [vmem:[#allocation8 + $0xc8] sm:$0xff] }
 0x5e7   : > { %2500 = vmatpush1.msra.mxu1 %v5802_v30  ;;  %2556 = vmatprep.subr.mxu0 %v6493_v5  ;;  %v5822_v5 = vld [vmem:[#allocation8 + $0xa0] sm:$0xff] }
 0x5e8   : > { %2501 = vmatprep.subr.mxu1 %v5806_v29  ;;  %2549 = vmatprep.mubr.f32.mxu1 %v6389_v48 }
 0x5e9   : > { %2502 = vmatpush1.msra.mxu1 %v5810_v55 }
 0x5ea   : > { %2503 = vmatprep.subr.mxu1 %v5813_v26 }
 0x5eb   : > { %2504 = vmatpush1.msra.mxu1 %v5816_v0 }
 0x5ec   : > { %2505 = vmatprep.subr.mxu1 %v5819_v39 }
 0x5ed   : > { %2506 = vmatpush1.msra.mxu1 %v5822_v5 }
 0x5ee   : > { %2507 = vmatprep.subr.mxu1 %v5825_v18 }
 0x5ef   : > { %2508 = vmatpush1.msra.mxu1 %v5828_v34 }
 0x5f0   : > { %2509 = vmatprep.subr.mxu1 %v5831_v36 }
 0x5f1   : > { %2510 = vmatpush1.msra.mxu1 %v5834_v17 }
 0x5f2   : > { %2511 = vmatprep.subr.mxu1 %v5837_v10 }
 0x5f3   : > { %2512 = vmatpush1.msra.mxu1 %v5840_v23 }
 0x5f4   : > { %2513 = vmatprep.subr.mxu1 %v5843_v32 }
 0x5f5   : > { %2514 = vmatpush1.msra.mxu1 %v5846_v35 }
 0x5f6   : > { %2515 = vmatprep.subr.mxu1 %v5849_v62 }
 0x5f7   : > { %2516 = vmatpush1.msra.mxu1 %v5852_v52 }
 0x5f8   : > { %3692 = vmatprep.subr.mxu1 %v6389_v48 }
 0x675   : > { %v2142_v16 = vpop.f32.mrf.mxu1 }
 0x677   : > { %v3656_v46 = vpop.f32.mrf.mxu1 }
 0x678   : > { %v2143_v46 = vadd.f32 %v6510_v27, %v2142_v16 }
 0x685   : > { %v2228_v63 = vpop.f32.mrf.mxu0 }
 0x686   : > { %v2229_v40 = vadd.f32 %v3264_v14, %v2228_v63 }
 0x687   : > { %v2230_v49 = vpop.f32.mrf.mxu0 }
 0x688   : > { %v2231_v53 = vadd.f32 %v3265_v42, %v2230_v49  ;;  %v3268_v37 = vmul.f32 -1.442695, %v2229_v40 }
 0x68a   : > { %v3269_v7 = vmul.f32 -1.442695, %v2231_v53  ;;  %3926 = vpow2.f32 %v3268_v37  ;;  %v2153_v53 = vpop.permute.xlu1 %2152 }
 0x68c   : > { %3928 = vpow2.f32 %v3269_v7 }
 0x696   : > { %v2299_v44 = vpop.f32.mrf.mxu1 }
 0x697   : > { %v2300_v52 = vadd.f32 %v3266_v59, %v2299_v44  ;;  %v3927_v62 = vpop.eup %3926  ;;  %v5876_v59 = vld [vmem:[#allocation8 + $0x1b8] sm:$0xff] }
 0x698   : > { %v2301_v56 = vpop.f32.mrf.mxu1  ;;  %v2307_v63 = vadd.f32 1.0, %v3927_v62 }
 0x699   : > { %v2302_v2 = vadd.f32 %v3267_v41, %v2301_v56  ;;  %v3929_v35 = vpop.eup %3928  ;;  %v3270_v32 = vmul.f32 -1.442695, %v2300_v52 }
 0x69a   : > { %v2313_v14 = vadd.f32 1.0, %v3929_v35 }
 0x69b   : > { %v3271_v21 = vmul.f32 -1.442695, %v2302_v2 }
 0x69d   : > { %3930 = vpow2.f32 %v3271_v21  ;;  %v5873_v21 = vld [vmem:[#allocation8 + $0x1d0] sm:$0xff] }
 0x69e   : > { %3932 = vtanh.f32 %v2143_v46  ;;  %v5879_v46 = vld [vmem:[#allocation8 + $0x1b0] sm:$0xff] }
 0x69f   : > { %3934 = vpow2.f32 %v3270_v32  ;;  %v5866_v32 = vld [vmem:[#allocation8 + $0x1f0] sm:$0xff] }
 0x6a0   : > { %3936 = vrcp.f32 %v2307_v63  ;;  %v5882_v63 = vld [vmem:[#allocation8 + $0x198] sm:$0xff] }
 0x6a1   : > { %3938 = vrcp.f32 %v2313_v14  ;;  %v5885_v14 = vld [vmem:[#allocation8 + $0x190] sm:$0xff] }
 0x6aa   : > { %v3931_v42 = vpop.eup %3930 }
 0x6ab   : > { %v2325_v49 = vadd.f32 1.0, %v3931_v42  ;;  %v3933_v40 = vpop.eup %3932  ;;  %v5888_v42 = vld [vmem:[#allocation8 + $0x178] sm:$0xff] }
 0x6ac   : > { %v2149_v37 = vsub.f32 %v5614_v45, %v3933_v40  ;;  %v2155_v7 = vmul.f32 %v3933_v40, %v2153_v53  ;;  %v3935_v41 = vpop.eup %3934  ;;  %v5870_v45 = vld [vmem:[#allocation8 + $0x1d8] sm:$0xff]  ;;  %v5897_v53 = vld [vmem:[#allocation8 + $0x150] sm:$0xff] }
 0x6ad   : > { %3940 = vrcp.f32 %v2325_v49  ;;  %v3937_v27 = vpop.eup %3936  ;;  %v2319_v2 = vadd.f32 1.0, %v3935_v41  ;;  %v5891_v49 = vld [vmem:[#allocation8 + $0x170] sm:$0xff]  ;;  %v5894_v40 = vld [vmem:[#allocation8 + $0x158] sm:$0xff]  ;;  %6517 = vst [vmem:[#allocation41_spill] sm:$0xff] %v5897_v53 }
 0x6ae   : > { %v3939_v16 = vpop.eup %3938  ;;  %v2156_v44 = vadd.f32 %v2155_v7, %v2149_v37  ;;  %v5900_v7 = vld [vmem:[#allocation8 + $0x138] sm:$0xff] }
 0x6af   : > { %3942 = vrcp.f32 %v2319_v2  ;;  %6518 = vst [vmem:[#allocation42_spill] sm:$0xff] %v5900_v7  ;;  %v5914_v2 = vld [vmem:[#allocation8 + $0xf8] sm:$0xff] }
 0x6b0   : > { %v2328_v52 = vmul.f32 %v3937_v27, %v2156_v44  ;;  %v5903_v27 = vld [vmem:[#allocation8 + $0x130] sm:$0xff]  ;;  %6522 = vst [vmem:[#allocation47_spill] sm:$0xff] %v5914_v2 }
 0x6b1   : > { %6519 = vst [vmem:[#allocation43_spill] sm:$0xff] %v5903_v27 }
 0x6ba   : > { %v3941_v56 = vpop.eup %3940 }
 0x6bb   : > { %v2329_v62 = vmul.f32 %v3941_v56, %v3939_v16  ;;  %v5906_v16 = vld [vmem:[#allocation8 + $0x118] sm:$0xff]  ;;  %v5911_v56 = vld [vmem:[#allocation8 + $0x110] sm:$0xff] }
 0x6bc   : > { %v3943_v37 = vpop.eup %3942  ;;  %6520 = vst [vmem:[#allocation46_spill] sm:$0xff] %v5906_v16  ;;  %6521 = vst [vmem:[#allocation45_spill] sm:$0xff] %v5911_v56 }
 0x6bd   : > { %v5862_v35 = vadd.f32 %v2329_v62, %v2328_v52 }
 0x6bf   : > { %3944 = vtanh.f32 %v5862_v35  ;;  %3690 = vmatmul.mubr.f32.vlgmr.msra.gmra.mxu0 %v5862_v35 }
 0x6c0   : > { %2557 = vmatpush1.msra.mxu0 %v5866_v32  ;;  %2620 = vmatprep.mubr.f32.mxu0 %v6389_v48 }
 0x6c1   : > { %2558 = vmatprep.subr.mxu0 %v5870_v45 }
 0x6c2   : > { %2559 = vmatpush1.msra.mxu0 %v5873_v21 }
 0x6c3   : > { %2560 = vmatprep.subr.mxu0 %v5876_v59 }
 0x6c4   : > { %2561 = vmatpush1.msra.mxu0 %v5879_v46 }
 0x6c5   : > { %2562 = vmatprep.subr.mxu0 %v5882_v63 }
 0x6c6   : > { %2563 = vmatpush1.msra.mxu0 %v5885_v14 }
 0x6c7   : > { %2564 = vmatprep.subr.mxu0 %v5888_v42 }
 0x6c8   : > { %2565 = vmatpush1.msra.mxu0 %v5891_v49 }
 0x6c9   : > { %2566 = vmatprep.subr.mxu0 %v5894_v40 }
 0x6ca   : > { %2567 = vmatpush1.msra.mxu0 %v5897_v53 }
 0x6cb   : > { %2568 = vmatprep.subr.mxu0 %v5900_v7  ;;  %v5941_v7 = vld [vmem:[#allocation8 + $0xb8] sm:$0xff] }
 0x6cc   : > { %v3945_v41 = vpop.eup %3944  ;;  %2569 = vmatpush1.msra.mxu0 %v5903_v27  ;;  %v5922_v27 = vld [vmem:[#allocation8 + $0xf0] sm:$0xff] }
 0x6cd   : > { %2570 = vmatprep.subr.mxu0 %v5906_v16  ;;  %v5909_v44 = vmul.f32 %v3945_v41, %v3943_v37  ;;  %6523 = vst [vmem:[#allocation48_spill] sm:$0xff] %v5922_v27  ;;  %v5933_v16 = vld [vmem:[#allocation8 + $0xd0] sm:$0xff] }
 0x6ce   : > { %2571 = vmatpush1.msra.mxu0 %v5911_v56  ;;  %v5929_v56 = vld [vmem:[#allocation8 + $0xd8] sm:$0xff]  ;;  %6525 = vst [vmem:[#allocation50_spill] sm:$0xff] %v5933_v16 }
 0x6cf   : > { %2572 = vmatprep.subr.mxu0 %v5914_v2  ;;  %v2334_v52 = vcombine.high %v5909_v44, %v5909_v44  ;;  %v2341_v62 = vrot.slane %v5909_v44, %v4909_v57  ;;  %2550 = vmatmul.mubr.f32.vlgmr.msra.gmra.mxu1 %v5909_v44  ;;  %6524 = vst [vmem:[#allocation49_spill] sm:$0xff] %v5929_v56 }
 0x6d0   : > { %2573 = vmatpush1.msra.mxu0 %v5922_v27  ;;  %3693 = vmatpush3.msra.mxu1 %v5640_v6 }
 0x6d1   : > { %v2348_v37 = vrot.slane %v2334_v52, %v4909_v57  ;;  %v2349_v41 = vcombine.high %v2341_v62, %v2341_v62  ;;  %v2357_v2 = vrot.slane %v2341_v62, %v4909_v57  ;;  %3272 = vst.sshfl [vmem:[%s4488_s11 + $0x5] sm:$0x1 pattern:$0x73625140] %v2341_v62  ;;  %2574 = vmatprep.subr.mxu0 %v5929_v56  ;;  %v5944_v56 = vld [vmem:[#allocation8 + $0xb0] sm:$0xff] }
 0x6d2   : > { %3694 = vmatprep.subr.mxu1 %v6389_v48  ;;  %2575 = vmatpush1.msra.mxu0 %v5933_v16 }
 0x6d3   : > { %3695 = vmatpush3.msra.mxu1 %v5652_v33  ;;  %v2350_v6 = vcombine.high %v2348_v37, %v2348_v37  ;;  %v2364_v52 = vrot.slane %v2348_v37, %v4909_v57  ;;  %v2371_v27 = vrot.slane %v2349_v41, %v4909_v57  ;;  %v2379_v62 = vcombine.high %v2357_v2, %v2357_v2  ;;  %v5951_v2 = vld [vmem:[#allocation8 + $0x98] sm:$0xff] }
 0x6d4   : > { %3273 = vst.sshfl [vmem:[%s4488_s11 + $0xd] sm:$0x1 pattern:$0x73625140] %v2349_v41  ;;  %2576 = vmatprep.subr.mxu0 %v5941_v7  ;;  %3696 = vmatprep.subr.mxu1 %v6389_v48 }
 0x6d5   : > { %3274 = vst.sshfl [vmem:[%s4488_s11 + $0x25] sm:$0x1 pattern:$0x73625140] %v2348_v37  ;;  %2577 = vmatpush1.msra.mxu0 %v5944_v56  ;;  %v2378_v33 = vrot.slane %v2350_v6, %v4909_v57  ;;  %v2380_v16 = vcombine.high %v2364_v52, %v2364_v52  ;;  %v2381_v53 = vcombine.high %v2371_v27, %v2371_v27  ;;  %2393 = vst [vmem:[%s4488_s11 + $0x15] sm:$0x1] %v2379_v62  ;;  %v2476_v62 = vpop.permute.xlu0 %2475 }
 0x6d6   : > { %3275 = vst.sshfl [vmem:[%s4488_s11 + $0x2d] sm:$0x1 pattern:$0x73625140] %v2350_v6  ;;  %2578 = vmatprep.subr.mxu0 %v5951_v2  ;;  %3697 = vmatpush3.msra.mxu1 %v5669_v22  ;;  %v5955_v37 = vld [vmem:[#allocation8 + $0x90] sm:$0xff]  ;;  %v5961_v52 = vld [vmem:[#allocation8 + $0x78] sm:$0xff] }
 0x6d7   : > { %2579 = vmatpush1.msra.mxu0 %v5955_v37  ;;  %3698 = vmatprep.subr.mxu1 %v6389_v48  ;;  %v2382_v41 = vcombine.high %v2378_v33, %v2378_v33  ;;  %2394 = vst [vmem:[%s4488_s11 + $0x1d] sm:$0x1] %v2381_v53  ;;  %2397 = vst [vmem:[%s4488_s11 + $0x35] sm:$0x1] %v2380_v16  ;;  %v5965_v27 = vld [vmem:[#allocation8 + $0x70] sm:$0xff]  ;;  %v5970_v22 = vld [vmem:[#allocation8 + $0x58] sm:$0xff] }
 0x6d8   : > { %2580 = vmatprep.subr.mxu0 %v5961_v52  ;;  %3699 = vmatpush3.msra.mxu1 %v5680_v13  ;;  %v5974_v53 = vld [vmem:[#allocation8 + $0x50] sm:$0xff]  ;;  %v5978_v13 = vld [vmem:[#allocation8 + $0x38] sm:$0xff] }
 0x6d9   : > { %2581 = vmatpush1.msra.mxu0 %v5965_v27  ;;  %3700 = vmatprep.subr.mxu1 %v6389_v48  ;;  %2398 = vst [vmem:[%s4488_s11 + $0x3d] sm:$0x1] %v2382_v41  ;;  %v5982_v16 = vld [vmem:[#allocation8 + $0x30] sm:$0xff]  ;;  %v5986_v6 = vld [vmem:[#allocation8 + $0x18] sm:$0xff] }
 0x6da   : > { %2582 = vmatprep.subr.mxu0 %v5970_v22  ;;  %3701 = vmatpush3.msra.mxu1 %v5690_v15  ;;  %v5990_v15 = vld [vmem:[#allocation8 + $0x10] sm:$0xff] }
 0x6db   : > { %2583 = vmatpush1.msra.mxu0 %v5974_v53  ;;  %3702 = vmatprep.subr.mxu1 %v6389_v48 }
 0x6dc   : > { %2584 = vmatprep.subr.mxu0 %v5978_v13  ;;  %3703 = vmatpush3.msra.mxu1 %v5699_v12  ;;  %v4142_v12 = vld [vmem:[%s6200_s3 + $0x18] sm:$0xff] }
 0x6dd   : > { %2585 = vmatpush1.msra.mxu0 %v5982_v16  ;;  %3704 = vmatprep.subr.mxu1 %v6389_v48 }
 0x6de   : > { %2586 = vmatprep.subr.mxu0 %v5986_v6  ;;  %3705 = vmatpush3.msra.mxu1 %v5708_v3  ;;  %v4143_v3 = vld [vmem:[%s6200_s3 + $0x10] sm:$0xff] }
 0x6df   : > { %2587 = vmatpush1.msra.mxu0 %v5990_v15  ;;  %3706 = vmatprep.subr.mxu1 %v6389_v48 }
 0x6e0   : > { %2621 = vmatmul.mubr.f32.vlgmr.msra.gmra.mxu0 %v5909_v44  ;;  %3707 = vmatpush3.msra.mxu1 %v5716_v4  ;;  %v4144_v4 = vld [vmem:[%s6200_s3 + $0x8] sm:$0xff] }
 0x6e1   : > { %3708 = vmatprep.subr.mxu1 %v6389_v48  ;;  %2808 = vmatprep.subr.mxu0 %v5720_v19  ;;  %v4145_v19 = vld [vmem:[%s6200_s3] sm:$0xff] }
 0x6e2   : > { %3709 = vmatpush3.msra.mxu1 %v5726_v51  ;;  %2809 = vmatpush1.msra.mxu0 %v5729_v54  ;;  %v4146_v51 = vld [vmem:[#allocation8 + $0x1f8] sm:$0xff] }
 0x6e3   : > { %3710 = vmatprep.subr.mxu1 %v6389_v48  ;;  %2810 = vmatprep.subr.mxu0 %v5733_v8  ;;  %v6526_v54 = vld [vmem:[#allocation56_spill] sm:$0xff]  ;;  %v6527_v8 = vld [vmem:[#allocation38_spill] sm:$0xff] }
 0x6e4   : > { %3711 = vmatpush3.msra.mxu1 %v5739_v1  ;;  %2811 = vmatpush1.msra.mxu0 %v5742_v11  ;;  %v6528_v1 = vld [vmem:[#allocation39_spill] sm:$0xff]  ;;  %v6529_v11 = vld [vmem:[#allocation40_spill] sm:$0xff] }
 0x6e5   : > { %3712 = vmatprep.subr.mxu1 %v6389_v48  ;;  %2812 = vmatprep.subr.mxu0 %v5746_v24 }
 0x6e6   : > { %3713 = vmatpush3.msra.mxu1 %v5752_v25  ;;  %2813 = vmatpush1.msra.mxu0 %v5755_v28 }
 0x6e7   : > { %3714 = vmatprep.subr.mxu1 %v6389_v48  ;;  %2814 = vmatprep.subr.mxu0 %v5759_v31  ;;  %v3277_v31 = vld [vmem:[%s4475_s30 + $0xc0] sm:$0xff] }
 0x6e8   : > { %3715 = vmatpush3.msra.mxu1 %v5765_v38  ;;  %2815 = vmatpush1.msra.mxu0 %v5768_v61  ;;  %v3278_v38 = vld [vmem:[%s4475_s30 + $0xc8] sm:$0xff] }
 0x6e9   : > { %3716 = vmatprep.subr.mxu1 %v6389_v48  ;;  %2816 = vmatprep.subr.mxu0 %v5772_v60 }
 0x6ea   : > { %3717 = vmatpush3.msra.mxu1 %v4142_v12  ;;  %2817 = vmatpush1.msra.mxu0 %v5776_v50 }
 0x6eb   : > { %3718 = vmatprep.subr.mxu1 %v6389_v48  ;;  %2818 = vmatprep.subr.mxu0 %v5780_v47 }
 0x6ec   : > { %3719 = vmatpush3.msra.mxu1 %v4143_v3  ;;  %2819 = vmatpush1.msra.mxu0 %v5784_v43 }
 0x6ed   : > { %3720 = vmatprep.subr.mxu1 %v6389_v48  ;;  %2820 = vmatprep.subr.mxu0 %v5788_v20 }
 0x6ee   : > { %3721 = vmatpush3.msra.mxu1 %v4144_v4  ;;  %2821 = vmatpush1.msra.mxu0 %v5792_v9  ;;  %v3280_v9 = vld [vmem:[%s4475_s30 + $0xd8] sm:$0xff] }
 0x6ef   : > { %3722 = vmatprep.subr.mxu1 %v6389_v48  ;;  %2822 = vmatprep.subr.mxu0 %v5796_v58 }
 0x6f0   : > { %3723 = vmatpush3.msra.mxu1 %v4145_v19  ;;  %3724 = vmatprep.mubr.msk.f32.mxu1 %vm4311_vm0, %v6389_v48 }
 0x6f1   : > { %2823 = vmatpush1.msra.mxu0 %v5802_v30  ;;  %2879 = vmatprep.subr.mxu1 %v4146_v51 }
 0x6f2   : > { %2824 = vmatprep.subr.mxu0 %v5806_v29  ;;  %2872 = vmatprep.mubr.f32.mxu0 %v6389_v48 }
 0x6f3   : > { %2825 = vmatpush1.msra.mxu0 %v5810_v55  ;;  %v3279_v55 = vld [vmem:[%s4475_s30 + $0xd0] sm:$0xff] }
 0x6f4   : > { %2826 = vmatprep.subr.mxu0 %v5813_v26  ;;  %v6062_v26 = vld [vmem:[%s6201_s4] ss:$0 sm:$0xff] }
 0x6f5   : > { %2827 = vmatpush1.msra.mxu0 %v5816_v0 }
 0x6f6   : > { %2828 = vmatprep.subr.mxu0 %v5819_v39 }
 0x6f7   : > { %2829 = vmatpush1.msra.mxu0 %v5822_v5 }
 0x6f8   : > { %2830 = vmatprep.subr.mxu0 %v5825_v18 }
 0x6f9   : > { %2831 = vmatpush1.msra.mxu0 %v5828_v34 }
 0x6fa   : > { %2832 = vmatprep.subr.mxu0 %v5831_v36 }
 0x6fb   : > { %2833 = vmatpush1.msra.mxu0 %v5834_v17 }
 0x6fc   : > { %2834 = vmatprep.subr.mxu0 %v5837_v10 }
 0x6fd   : > { %2835 = vmatpush1.msra.mxu0 %v5840_v23 }
 0x6fe   : > { %2836 = vmatprep.subr.mxu0 %v6526_v54 }
 0x6ff   : > { %2837 = vmatpush1.msra.mxu0 %v6527_v8 }
 0x700   : > { %2838 = vmatprep.subr.mxu0 %v6528_v1 }
 0x701   : > { %2839 = vmatpush1.msra.mxu0 %v6529_v11 }
 0x77f   : > { %v2465_v24 = vpop.f32.mrf.mxu0 }
 0x780   : > { %v2466_v0 = vadd.f32 %v6062_v26, %v2465_v24 }
 0x781   : > { %v3691_v25 = vpop.f32.mrf.mxu0 }
 0x78f   : > { %v2551_v28 = vpop.f32.mrf.mxu1 }
 0x790   : > { %v2552_v60 = vadd.f32 %v3277_v31, %v2551_v28  ;;  %v6537_v31 = vld [vmem:[#allocation49_spill] sm:$0xff] }
 0x791   : > { %v2553_v61 = vpop.f32.mrf.mxu1 }
 0x792   : > { %v2554_v50 = vadd.f32 %v3278_v38, %v2553_v61  ;;  %v3281_v47 = vmul.f32 -1.442695, %v2552_v60  ;;  %v6538_v38 = vld [vmem:[#allocation50_spill] sm:$0xff] }
 0x794   : > { %v3282_v43 = vmul.f32 -1.442695, %v2554_v50  ;;  %3946 = vpow2.f32 %v3281_v47 }
 0x796   : > { %3948 = vpow2.f32 %v3282_v43 }
 0x7a0   : > { %v2622_v20 = vpop.f32.mrf.mxu0 }
 0x7a1   : > { %v2623_v39 = vadd.f32 %v3279_v55, %v2622_v20  ;;  %v3947_v5 = vpop.eup %3946  ;;  %v3293_v55 = vld [vmem:[%s4475_s30 + $0xf8] sm:$0xff] }
 0x7a2   : > { %v2624_v58 = vpop.f32.mrf.mxu0  ;;  %v2630_v36 = vadd.f32 1.0, %v3947_v5 }
 0x7a3   : > { %v2625_v30 = vadd.f32 %v3280_v9, %v2624_v58  ;;  %v3949_v18 = vpop.eup %3948  ;;  %v3283_v34 = vmul.f32 -1.442695, %v2623_v39 }
 0x7a4   : > { %v2636_v17 = vadd.f32 1.0, %v3949_v18 }
 0x7a5   : > { %v3284_v29 = vmul.f32 -1.442695, %v2625_v30 }
 0x7a7   : > { %3950 = vpow2.f32 %v3284_v29 }
 0x7a8   : > { %3952 = vtanh.f32 %v2466_v0 }
 0x7a9   : > { %3954 = vpow2.f32 %v3283_v34 }
 0x7aa   : > { %3956 = vrcp.f32 %v2630_v36 }
 0x7ab   : > { %3958 = vrcp.f32 %v2636_v17 }
 0x7b4   : > { %v3951_v10 = vpop.eup %3950 }
 0x7b5   : > { %v2648_v23 = vadd.f32 1.0, %v3951_v10  ;;  %v3953_v44 = vpop.eup %3952 }
 0x7b6   : > { %v2472_v33 = vsub.f32 %v5862_v35, %v3953_v44  ;;  %v2478_v41 = vmul.f32 %v3953_v44, %v2476_v62  ;;  %v3955_v12 = vpop.eup %3954  ;;  %v6530_v35 = vld [vmem:[#allocation41_spill] sm:$0xff] }
 0x7b7   : > { %3960 = vrcp.f32 %v2648_v23  ;;  %v3957_v3 = vpop.eup %3956  ;;  %v2642_v54 = vadd.f32 1.0, %v3955_v12 }
 0x7b8   : > { %v3959_v4 = vpop.eup %3958  ;;  %v2479_v19 = vadd.f32 %v2478_v41, %v2472_v33  ;;  %v2799_v33 = vpop.permute.xlu1 %2798 }
 0x7b9   : > { %3962 = vrcp.f32 %v2642_v54 }
 0x7ba   : > { %v2651_v8 = vmul.f32 %v3957_v3, %v2479_v19 }
 0x7c4   : > { %v3961_v51 = vpop.eup %3960 }
 0x7c5   : > { %v2652_v1 = vmul.f32 %v3961_v51, %v3959_v4 }
 0x7c7   : > { %v6066_v11 = vadd.f32 %v2652_v1, %v2651_v8 }
 0x7c9   : > { %3964 = vtanh.f32 %v6066_v11  ;;  %3725 = vmatmul.mubr.f32.vlgmr.msra.gmra.mxu1 %v6066_v11 }
 0x7ca   : > { %2880 = vmatpush1.msra.mxu1 %v5866_v32  ;;  %2943 = vmatprep.mubr.f32.mxu1 %v6389_v48  ;;  %v3963_v48 = vpop.eup %3962  ;;  %v6531_v32 = vld [vmem:[#allocation42_spill] sm:$0xff] }
 0x7cb   : > { %2881 = vmatprep.subr.mxu1 %v5870_v45 }
 0x7cc   : > { %2882 = vmatpush1.msra.mxu1 %v5873_v21  ;;  %v6532_v21 = vld [vmem:[#allocation43_spill] sm:$0xff] }
 0x7cd   : > { %2883 = vmatprep.subr.mxu1 %v5876_v59  ;;  %v6533_v59 = vld [vmem:[#allocation46_spill] sm:$0xff] }
 0x7ce   : > { %2884 = vmatpush1.msra.mxu1 %v5879_v46 }
 0x7cf   : > { %2885 = vmatprep.subr.mxu1 %v5882_v63  ;;  %v6534_v63 = vld [vmem:[#allocation45_spill] sm:$0xff] }
 0x7d0   : > { %2886 = vmatpush1.msra.mxu1 %v5885_v14  ;;  %v6535_v14 = vld [vmem:[#allocation47_spill] sm:$0xff] }
 0x7d1   : > { %2887 = vmatprep.subr.mxu1 %v5888_v42 }
 0x7d2   : > { %2888 = vmatpush1.msra.mxu1 %v5891_v49 }
 0x7d3   : > { %2889 = vmatprep.subr.mxu1 %v5894_v40  ;;  %v6536_v40 = vld [vmem:[#allocation48_spill] sm:$0xff] }
 0x7d4   : > { %2890 = vmatpush1.msra.mxu1 %v6530_v35 }
 0x7d5   : > { %2891 = vmatprep.subr.mxu1 %v6531_v32 }
 0x7d6   : > { %v3965_v45 = vpop.eup %3964  ;;  %2892 = vmatpush1.msra.mxu1 %v6532_v21 }
 0x7d7   : > { %2893 = vmatprep.subr.mxu1 %v6533_v59  ;;  %v2655_v46 = vmul.f32 %v3965_v45, %v3963_v48 }
 0x7d8   : > { %2894 = vmatpush1.msra.mxu1 %v6534_v63 }
 0x7d9   : > { %2895 = vmatprep.subr.mxu1 %v6535_v14  ;;  %v2657_v42 = vcombine.high %v2655_v46, %v2655_v46  ;;  %v2664_v49 = vrot.slane %v2655_v46, %v4909_v57  ;;  %2873 = vmatmul.mubr.f32.vlgmr.msra.gmra.mxu0 %v2655_v46 }
 0x7da   : > { %2896 = vmatpush1.msra.mxu1 %v6536_v40 }
 0x7db   : > { %v2671_v24 = vrot.slane %v2657_v42, %v4909_v57  ;;  %v2672_v25 = vcombine.high %v2664_v49, %v2664_v49  ;;  %v2680_v28 = vrot.slane %v2664_v49, %v4909_v57  ;;  %3285 = vst.sshfl [vmem:[%s4488_s11 + $0x6] sm:$0x1 pattern:$0x73625140] %v2664_v49  ;;  %2897 = vmatprep.subr.mxu1 %v6537_v31 }
 0x7dc   : > { %2898 = vmatpush1.msra.mxu1 %v6538_v38 }
 0x7dd   : > { %v2673_v61 = vcombine.high %v2671_v24, %v2671_v24  ;;  %v2687_v60 = vrot.slane %v2671_v24, %v4909_v57  ;;  %v2694_v50 = vrot.slane %v2672_v25, %v4909_v57  ;;  %v2702_v47 = vcombine.high %v2680_v28, %v2680_v28  ;;  %3286 = vst.sshfl [vmem:[%s4488_s11 + $0xe] sm:$0x1 pattern:$0x73625140] %v2672_v25 }
 0x7de   : > { %3287 = vst.sshfl [vmem:[%s4488_s11 + $0x26] sm:$0x1 pattern:$0x73625140] %v2671_v24  ;;  %2899 = vmatprep.subr.mxu1 %v5941_v7 }
 0x7df   : > { %2900 = vmatpush1.msra.mxu1 %v5944_v56  ;;  %v2701_v43 = vrot.slane %v2673_v61, %v4909_v57  ;;  %v2703_v20 = vcombine.high %v2687_v60, %v2687_v60  ;;  %v2704_v9 = vcombine.high %v2694_v50, %v2694_v50  ;;  %2716 = vst [vmem:[%s4488_s11 + $0x16] sm:$0x1] %v2702_v47  ;;  %3288 = vst.sshfl [vmem:[%s4488_s11 + $0x2e] sm:$0x1 pattern:$0x73625140] %v2673_v61 }
 0x7e0   : > { %2901 = vmatprep.subr.mxu1 %v5951_v2 }
 0x7e1   : > { %2902 = vmatpush1.msra.mxu1 %v5955_v37  ;;  %v2705_v58 = vcombine.high %v2701_v43, %v2701_v43  ;;  %2717 = vst [vmem:[%s4488_s11 + $0x1e] sm:$0x1] %v2704_v9  ;;  %2720 = vst [vmem:[%s4488_s11 + $0x36] sm:$0x1] %v2703_v20  ;;  %v3290_v37 = vld [vmem:[%s4475_s30 + $0xe0] sm:$0xff] }
 0x7e2   : > { %2903 = vmatprep.subr.mxu1 %v5961_v52  ;;  %v3291_v52 = vld [vmem:[%s4475_s30 + $0xe8] sm:$0xff] }
 0x7e3   : > { %2904 = vmatpush1.msra.mxu1 %v5965_v27  ;;  %2721 = vst [vmem:[%s4488_s11 + $0x3e] sm:$0x1] %v2705_v58 }
 0x7e4   : > { %2905 = vmatprep.subr.mxu1 %v5970_v22 }
 0x7e5   : > { %2906 = vmatpush1.msra.mxu1 %v5974_v53 }
 0x7e6   : > { %2907 = vmatprep.subr.mxu1 %v5978_v13 }
 0x7e7   : > { %2908 = vmatpush1.msra.mxu1 %v5982_v16 }
 0x7e8   : > { %2909 = vmatprep.subr.mxu1 %v5986_v6 }
 0x7e9   : > { %2910 = vmatpush1.msra.mxu1 %v5990_v15  ;;  %v3292_v15 = vld [vmem:[%s4475_s30 + $0xf0] sm:$0xff]  ;;  %s3310_s30 = sshll.u32 %s4288_s22, 4 }
 0x7ea   : > { %2944 = vmatmul.mubr.f32.vlgmr.msra.gmra.mxu1 %v2655_v46  ;;  %s3060_s15 = sadd.s32 %s4284_s21, %s3310_s30  ;;  %s3063_s21 = sshll.u32 %s4488_s11, 4  ;;  %s6141_s21 = int_to_ptr.vmem [resolvable:$true] %s3063_s21 }
 0x7eb   : > { %s3305_s8 = sshll.u32 %s3060_s15, 7  ;;  %s4200_s18 = scalar_lea.vmem %s6141_s21, 1024 }
 0x7ec   : > { %s6139_s14 = scalar_lea.hbm %s6202_s5, %s3305_s8  ;;  %p4201_p6 = scmp.ne.s32.totalorder %s6141_s21, %s4200_s18 }
 0x7ed   : > { %p4207_p0 = scmp.lt.s32.totalorder %s6141_s21, %s4205_s20  ;;  %p4208_p8 = scmp.lt.s32.totalorder %s4206_s25, %s4200_s18 }
 0x7ee   : > { %p4202_p12 = pnand %p4201_p6, %p6539_p10 }
 0x7ef   : > { %p4209_p9 = por %p4208_p8, %p4207_p0 }
 0x7f0   : > { %p4203_p11 = pneg %p4202_p12 }
 0x7f2   : > { %p4210_p13 = pnand %p4209_p9, %p4203_p11 }
 0x889   : > { %v2788_v7 = vpop.f32.mrf.mxu1 }
 0x88a   : > { %v2789_v39 = vadd.f32 %v6062_v26, %v2788_v7 }
 0x88b   : > { %v3726_v56 = vpop.f32.mrf.mxu1 }
 0x899   : > { %v2874_v2 = vpop.f32.mrf.mxu0 }
 0x89a   : > { %v2875_v22 = vadd.f32 %v3290_v37, %v2874_v2 }
 0x89b   : > { %v2876_v27 = vpop.f32.mrf.mxu0 }
 0x89c   : > { %v2877_v30 = vadd.f32 %v3291_v52, %v2876_v27  ;;  %v3294_v53 = vmul.f32 -1.442695, %v2875_v22 }
 0x89e   : > { %v3295_v29 = vmul.f32 -1.442695, %v2877_v30  ;;  %3966 = vpow2.f32 %v3294_v53 }
 0x8a0   : > { %3968 = vpow2.f32 %v3295_v29 }
 0x8aa   : > { %v2945_v13 = vpop.f32.mrf.mxu1 }
 0x8ab   : > { %v2946_v5 = vadd.f32 %v3292_v15, %v2945_v13  ;;  %v3967_v18 = vpop.eup %3966 }
 0x8ac   : > { %v2947_v16 = vpop.f32.mrf.mxu1  ;;  %v2953_v17 = vadd.f32 1.0, %v3967_v18 }
 0x8ad   : > { %v2948_v6 = vadd.f32 %v3293_v55, %v2947_v16  ;;  %v3969_v34 = vpop.eup %3968  ;;  %v3296_v36 = vmul.f32 -1.442695, %v2946_v5 }
 0x8ae   : > { %v2959_v10 = vadd.f32 1.0, %v3969_v34 }
 0x8af   : > { %v3297_v0 = vmul.f32 -1.442695, %v2948_v6 }
 0x8b1   : > { %3970 = vpow2.f32 %v3297_v0 }
 0x8b2   : > { %3972 = vtanh.f32 %v2789_v39 }
 0x8b3   : > { %3974 = vpow2.f32 %v3296_v36 }
 0x8b4   : > { %3976 = vrcp.f32 %v2953_v17 }
 0x8b5   : > { %3978 = vrcp.f32 %v2959_v10 }
 0x8be   : > { %v3971_v23 = vpop.eup %3970 }
 0x8bf   : > { %v2971_v44 = vadd.f32 1.0, %v3971_v23  ;;  %v3973_v62 = vpop.eup %3972 }
 0x8c0   : > { %v2795_v41 = vsub.f32 %v6066_v11, %v3973_v62  ;;  %v2801_v12 = vmul.f32 %v3973_v62, %v2799_v33  ;;  %v3975_v26 = vpop.eup %3974 }
 0x8c1   : > { %3980 = vrcp.f32 %v2971_v44  ;;  %v3977_v3 = vpop.eup %3976  ;;  %v2965_v54 = vadd.f32 1.0, %v3975_v26 }
 0x8c2   : > { %v3979_v4 = vpop.eup %3978  ;;  %v2802_v19 = vadd.f32 %v2801_v12, %v2795_v41 }
 0x8c3   : > { %3982 = vrcp.f32 %v2965_v54 }
 0x8c4   : > { %v2974_v8 = vmul.f32 %v3977_v3, %v2802_v19 }
 0x8ce   : > { %v3981_v51 = vpop.eup %3980 }
 0x8cf   : > { %v2975_v1 = vmul.f32 %v3981_v51, %v3979_v4 }
 0x8d0   : > { %v3983_v48 = vpop.eup %3982 }
 0x8d1   : > { %v2976_v35 = vadd.f32 %v2975_v1, %v2974_v8 }
 0x8d3   : > { %3984 = vtanh.f32 %v2976_v35  ;;  %3046 = vst [vmem:[#allocation3] sm:$0xff] %v2976_v35 }
 0x8e0   : > { %v3985_v32 = vpop.eup %3984 }
 0x8e1   : > { %v2978_v11 = vmul.f32 %v3985_v32, %v3983_v48 }
 0x8e3   : > { %v2980_v45 = vcombine.high %v2978_v11, %v2978_v11  ;;  %v2987_v21 = vrot.slane %v2978_v11, %v4909_v57  ;;  %3045 = vst [vmem:[#allocation2] sm:$0xff] %v2978_v11 }
 0x8e5   : > { %v2994_v59 = vrot.slane %v2980_v45, %v4909_v57  ;;  %v2995_v46 = vcombine.high %v2987_v21, %v2987_v21  ;;  %v3003_v63 = vrot.slane %v2987_v21, %v4909_v57  ;;  %3298 = vst.sshfl [vmem:[%s4488_s11 + $0x7] sm:$0x1 pattern:$0x73625140] %v2987_v21 }
 0x8e7   : > { %v2996_v14 = vcombine.high %v2994_v59, %v2994_v59  ;;  %v3010_v42 = vrot.slane %v2994_v59, %v4909_v57  ;;  %v3017_v49 = vrot.slane %v2995_v46, %v4909_v57  ;;  %v3025_v40 = vcombine.high %v3003_v63, %v3003_v63  ;;  %3299 = vst.sshfl [vmem:[%s4488_s11 + $0xf] sm:$0x1 pattern:$0x73625140] %v2995_v46 }
 0x8e8   : > { %3300 = vst.sshfl [vmem:[%s4488_s11 + $0x27] sm:$0x1 pattern:$0x73625140] %v2994_v59 }
 0x8e9   : > { %v3024_v24 = vrot.slane %v2996_v14, %v4909_v57  ;;  %v3026_v25 = vcombine.high %v3010_v42, %v3010_v42  ;;  %v3027_v28 = vcombine.high %v3017_v49, %v3017_v49  ;;  %3039 = vst [vmem:[%s4488_s11 + $0x17] sm:$0x1] %v3025_v40  ;;  %3301 = vst.sshfl [vmem:[%s4488_s11 + $0x2f] sm:$0x1 pattern:$0x73625140] %v2996_v14 }
 0x8eb   : > { %v3028_v31 = vcombine.high %v3024_v24, %v3024_v24  ;;  %3040 = vst [vmem:[%s4488_s11 + $0x1f] sm:$0x1] %v3027_v28  ;;  %3043 = vst [vmem:[%s4488_s11 + $0x37] sm:$0x1] %v3026_v25 }
 0x8ed   : > { %3044 = vst [vmem:[%s4488_s11 + $0x3f] sm:$0x1] %v3028_v31 }
 0x8ee   : > { %4213 = shalt.err (!%p4210_p13)
}
 0x8ef   : > { %s4214_s11 = scalar_lea.hbm %s6139_s14, 1024  ;;  %s4218_s27 = scalar_lea.hbm %s6202_s5, 4096 }
 0x8f0   : > { %p4215_p1 = scmp.ne.s32.totalorder %s6139_s14, %s4214_s11  ;;  %p4219_p5 = scmp.lt.s32.totalorder %s6139_s14, %s6202_s5 }
 0x8f1   : > { %p4220_p3 = scmp.lt.s32.totalorder %s4218_s27, %s4214_s11 }
 0x8f2   : > { %p4216_p4 = pnand %p4215_p1, %p6539_p10 }
 0x8f3   : > { %p4221_p2 = por %p4220_p3, %p4219_p5 }
 0x8f4   : > { %p4217_p7 = pneg %p4216_p4 }
 0x8f6   : > { %p4222_p6 = pnand %p4221_p2, %p4217_p7 }
 0x8f8   : > { %4225 = shalt.err (!%p4222_p6)
}
 0x8f9   : > { %s4315_s6 = smov 128   ;;  %s4316_s9 = smov 256  }
 0x8fa   : > { %s4317_s28 = smov 8  }
 0x8fb   : > { %3733 = dma.vmem_to_hbm [thread:$0]  (%p6539_p10), %s6141_s21, 1024, %s6139_s14, %s3048_s2, %s4315_s6, %s4316_s9, %s4317_s28  }
 0x8fc PF: > { %s6540_s30 = sld [smem:[#allocation16_spill]] }
 0x8fd   : > { %s6541_s15 = sld [smem:[#allocation14_spill]] }
 0x8fe   : > { %s6542_s8 = sld [smem:[#allocation19_spill]] }
 0x902   : > { %p3745_p12 = scmp.ge.s32.totalorder %s6540_s30, 2 }
 0x903   : > { %s3078_s22 = sand.u32 1, %s6541_s15  }
 0x904   : > { %p6543_p11 = scmp.ne.s32.totalorder %s6542_s8, 0  ;;  %s3079_s29 = scalar_lea.sflag [#allocation6], %s3078_s22 }
 0x906   : > { %p3740_p0 = pnand %p3745_p12, %p6543_p11 }
 0x908   : > { %p3741_p8 = pneg %p3740_p0 }
 0x90a   : > { %4267 = dma.done.wait (%p3741_p8), %s3079_s29, 1024  }
 0x90b   : > { %4269 = vsyncadd (%p3741_p8), %s3079_s29, 4294966272  ;;  %s22_s25 = sadd.s32 1, %s6540_s30   ;;  %s6544_s16 = sld [smem:[#allocation15_spill]] }
 0x90c   : > { %p19_p9 = scmp.ge.s32.totalorder %s22_s25, 6   ;;  %s6545_s20 = sld [smem:[#allocation20_spill]] }
 0x90d   : > { %s6546_s10 = sld [smem:[#allocation17_spill]]  ;;  %s6548_s18 = smov %s4276_s19 }
 0x90e   : > { %s6547_s7 = sld [smem:[#allocation18_spill]]  ;;  %s6550_s21 = smov %s4292_s23 }
 0x90f   : > { %s6551_s22 = smov %s4296_s24 }
 0x910   :  { %21 = sbr.rel (!%p19_p9) target bundleno = 10 (0xa), region = 153 }
 0x911   : > { %s6549_s19 = smov %s6544_s16 }
 0x913   : > { %s6552_s23 = smov %s6546_s10 }
 0x914   : > { %s6553_s24 = smov %s6547_s7 }
 0x915   :  { %3084 = vsyncpa [#allocation5], 1 }
 0x916   :  { %3086 = vsyncpa [#allocation5 + $0x1], 1 }
 0x917   :  { %3087 = vsyncpa [#allocation9], 1 }
 0x918   :  { %3088 = vsyncpa [#allocation6], 1 }
 0x919   :  { %3090 = vsyncpa [#allocation6 + $0x1], 1 }

</bundles_post_ra>
